<compile_context>
chip_gen: v5e
topology: v5e:2x2
jax: 0.10.0
libtpu: 0.0.40
codegen_flags: <defaults>
</compile_context>

<pallas_src>
import functools

import jax
import jax.numpy as jnp
from jax import lax
from jax.experimental import pallas as pl
from jax.experimental.pallas import tpu as pltpu

F32 = jnp.float32
BF16 = jnp.bfloat16
I8 = jnp.int8
RMS_EPS = 1e-6      # config.rms_norm_eps (attn_norm, mlp_norm, g_norm, AdaLN norm)
BITLIN_EPS = 1e-8   # RMSNorm inside BitLinear
VMEM_LIMIT = 64 * 1024 * 1024


# ----------------------------------------------------------------------------
# helpers
# ----------------------------------------------------------------------------
def _vmem_spec():
    return pl.BlockSpec(memory_space=pltpu.MemorySpace.VMEM)


def _vmem_specs(n):
    return [_vmem_spec() for _ in range(n)]


def _cparams(n_parallel, n_arbitrary=0):
    sem = ("parallel",) * n_parallel + ("arbitrary",) * n_arbitrary
    return pltpu.CompilerParams(dimension_semantics=sem,
                                vmem_limit_bytes=VMEM_LIMIT)


def _tile(n, cap):
    """Largest divisor of n that is <= cap."""
    if n <= cap:
        return n
    for t in range(cap, 0, -1):
        if n % t == 0:
            return t
    return n


def _lane_tile(n, cap=512):
    """Lane-dim (channel) tile: a multiple of 128 dividing n when possible, else n."""
    if n % 128 != 0:
        return n
    t = min(cap, n)
    t -= t % 128
    while n % t:
        t -= 128
    return t


def weight_quant(w):
    """Ternary (1.58-bit) per-tensor weight quant.

    Returns the ternary weight transposed to (in, out), stored as int8 (exact
    {-1,0,1}; cast to bf16 inside the kernel) and the f32 per-tensor dequant
    scale applied in the kernel epilogue."""
    scale = jnp.maximum(jnp.mean(jnp.abs(w)), 1e-5)
    tern = jnp.clip(jnp.round(w / scale), -1.0, 1.0)
    return tern.T.astype(I8), scale.astype(F32)


# ----------------------------------------------------------------------------
# in-kernel math helpers
# ----------------------------------------------------------------------------
def _rms(x, w, eps):
    var = jnp.mean(x * x, axis=-1, keepdims=True)
    return x * lax.rsqrt(var + eps) * w


def _bitlin(x, nw, wq, cs):
    """BitLinear hot path: RMSNorm(1e-8) -> int8-level row quant -> bf16 ternary
    matmul (f32 accumulate) -> dequant epilogue (per-row act scale * weight scale)."""
    xn = _rms(x, nw, BITLIN_EPS)
    amax = jnp.maximum(jnp.max(jnp.abs(xn), axis=-1, keepdims=True), 1e-5)
    s = 127.0 / amax                                       # exact, matches reference
    xq = jnp.clip(jnp.round(xn * s), -128.0, 127.0)        # exact int8 levels
    acc = jnp.dot(xq.astype(BF16), wq.astype(BF16), preferred_element_type=F32)
    return acc * (amax * (1.0 / 127.0)) * cs


# ----------------------------------------------------------------------------
# Pallas kernels
# ----------------------------------------------------------------------------
def _ifg_kernel(x_ref, anw_ref, nw_ref, wq_ref, cs_ref, i_ref, f_ref, g_ref, *, H):
    """attn_norm + fused BitLinear(i|f|g) + HGRN gate activations."""
    x = x_ref[...].astype(F32)
    xn = _rms(x, anw_ref[...], RMS_EPS)                      # attn_norm prologue
    y = _bitlin(xn, nw_ref[...], wq_ref[...], cs_ref[...])    # (tm, 3H)
    i_lin = y[:, :H]
    f_lin = y[:, H:2 * H]
    g_lin = y[:, 2 * H:]
    f = jax.nn.sigmoid(f_lin)
    i_ref[...] = (i_lin * jax.nn.sigmoid(i_lin) * (1.0 - f)).astype(i_ref.dtype)
    f_ref[...] = f.astype(f_ref.dtype)
    g_ref[...] = g_lin.astype(g_ref.dtype)


def _hgrn_kernel(i_ref, f_ref, o_ref, h_sc, *, C):
    """HGRN recurrence h_t = f_t*h_{t-1} + i_t, blocked in C-row chunks.

    Grid = (B, H-tiles, T-chunks); the f32 carry lives in a VMEM scratch across
    the 'arbitrary' T-chunk axis."""
    @pl.when(pl.program_id(2) == 0)
    def _():
        h_sc[...] = jnp.zeros_like(h_sc)

    Tt, Hb = i_ref.shape
    n_chunks = Tt // C

    def chunk_body(c, h):
        base = pl.multiple_of(c * C, C)
        i_blk = i_ref[pl.ds(base, C), :].astype(F32)
        f_blk = f_ref[pl.ds(base, C), :].astype(F32)
        rows = []
        for t in range(C):                                    # unrolled C-step scan
            h = f_blk[t:t + 1, :] * h + i_blk[t:t + 1, :]
            rows.append(h)
        o_ref[pl.ds(base, C), :] = jnp.concatenate(rows, axis=0).astype(o_ref.dtype)
        return h

    h_sc[...] = lax.fori_loop(0, n_chunks, chunk_body, h_sc[...],
                              unroll=bool(n_chunks <= 4))


def _gnorm_oproj_kernel(o_ref, g_ref, gnw_ref, nw_ref, wq_ref, cs_ref, out_ref):
    """FusedRMSNormSwishGate(o, g) fused with the o-proj BitLinear."""
    o = o_ref[...].astype(F32)
    g = g_ref[...].astype(F32)
    gated = _rms(o, gnw_ref[...], RMS_EPS) * g * jax.nn.sigmoid(g)
    out = _bitlin(gated, nw_ref[...], wq_ref[...], cs_ref[...])
    out_ref[...] = out.astype(out_ref.dtype)


def _adaln_pair_kernel(c_ref, *refs, H):
    """Both AdaLNConditioning stacks (attn + mlp) in one kernel:
    HGRNBitMLP(cond) -> RMSNorm -> out_proj -> (scale, shift), twice."""
    ins, outs = refs[:20], refs[20:]
    c = c_ref[...].astype(F32)
    for s in range(2):
        gnw, gwq, gcs, dnw, dwq, dcs, nrm, onw, owq, ocs = ins[s * 10:(s + 1) * 10]
        y = _bitlin(c, gnw[...], gwq[...], gcs[...])           # (B, 4H) gate_proj
        gate = y[:, :2 * H]
        v = y[:, 2 * H:]
        z = gate * jax.nn.sigmoid(gate) * v                    # swiglu
        x = _bitlin(z, dnw[...], dwq[...], dcs[...])           # (B, 2H) down_proj
        xn = _rms(x, nrm[...], RMS_EPS)
        p = _bitlin(xn, onw[...], owq[...], ocs[...])          # (B, 2H) out_proj
        outs[2 * s][...] = p[:, :H]                            # scale
        outs[2 * s + 1][...] = p[:, H:]                        # shift


def _mod_norm_gate_kernel(h_ref, s_ref, b_ref, res_ref, mnw_ref,
                          nw_ref, wq_ref, cs_ref, y_ref, r2_ref):
    """modulate(h) -> residual add -> mlp_norm -> MLP gate BitLinear (fused)."""
    h = h_ref[...].astype(F32)
    hm = h * (1.0 + s_ref[...]) + b_ref[...]
    r = hm + res_ref[...].astype(F32)
    r2_ref[...] = r.astype(r2_ref.dtype)
    xn = _rms(r, mnw_ref[...], RMS_EPS)
    y = _bitlin(xn, nw_ref[...], wq_ref[...], cs_ref[...])
    y_ref[...] = y.astype(y_ref.dtype)


def _swiglu_down_mod_kernel(y_ref, s_ref, b_ref, r2_ref, nw_ref, wq_ref, cs_ref,
                            o_ref, *, I):
    """swiglu -> down-proj BitLinear -> modulate -> residual add (fused epilogue)."""
    y = y_ref[...].astype(F32)
    g = y[:, :I]
    v = y[:, I:]
    z = g * jax.nn.sigmoid(g) * v
    d = _bitlin(z, nw_ref[...], wq_ref[...], cs_ref[...])
    o_ref[...] = (r2_ref[...].astype(F32) + d * (1.0 + s_ref[...]) + b_ref[...])


# ----------------------------------------------------------------------------
# Pallas wrappers
# ----------------------------------------------------------------------------
def attn_ifg(x2d, attn_norm_w, lin, H):
    M, K = x2d.shape
    N = 3 * H
    tm = _tile(M, 256)
    out_spec = pl.BlockSpec((tm, H), lambda i: (i, 0))
    return pl.pallas_call(
        functools.partial(_ifg_kernel, H=H),
        out_shape=(jax.ShapeDtypeStruct((M, H), BF16),) * 3,
        grid=(M // tm,),
        in_specs=[pl.BlockSpec((tm, K), lambda i: (i, 0)),
                  pl.BlockSpec((1, K), lambda i: (0, 0)),
                  pl.BlockSpec((1, K), lambda i: (0, 0)),
                  pl.BlockSpec((K, N), lambda i: (0, 0)),
                  pl.BlockSpec((1, N), lambda i: (0, 0))],
        out_specs=(out_spec, out_spec, out_spec),
        compiler_params=_cparams(1),
    )(x2d, attn_norm_w.reshape(1, K), lin["nw"].reshape(1, K),
      lin["wq"], lin["cs"].reshape(1, N))


def hgrn_core(i_g, f_g):
    B, T, H = i_g.shape
    Hb = _lane_tile(H)                         # channel tile (mult of 128 or full H)
    Tt = _tile(T, 1024)                        # sequence chunk per grid step
    C = 8 if Tt % 8 == 0 else _tile(Tt, 8)     # sublane-dense inner chunk
    nH = H // Hb
    spec = pl.BlockSpec((None, Tt, Hb), lambda b, h, t: (b, t, h))
    return pl.pallas_call(
        functools.partial(_hgrn_kernel, C=C),
        out_shape=jax.ShapeDtypeStruct((B, T, H), BF16),
        grid=(B, nH, T // Tt),
        in_specs=[spec, spec],
        out_specs=spec,
        scratch_shapes=[pltpu.VMEM((1, Hb), F32)],
        compiler_params=_cparams(2, 1),
    )(i_g, f_g)


def gnorm_oproj(o2d, g2d, g_norm_w, lin):
    M, K = o2d.shape
    N = lin["wq"].shape[1]
    tm = _tile(M, 256)
    return pl.pallas_call(
        _gnorm_oproj_kernel,
        out_shape=jax.ShapeDtypeStruct((M, N), BF16),
        grid=(M // tm,),
        in_specs=[pl.BlockSpec((tm, K), lambda i: (i, 0)),
                  pl.BlockSpec((tm, K), lambda i: (i, 0)),
                  pl.BlockSpec((1, K), lambda i: (0, 0)),
                  pl.BlockSpec((1, K), lambda i: (0, 0)),
                  pl.BlockSpec((K, N), lambda i: (0, 0)),
                  pl.BlockSpec((1, N), lambda i: (0, 0))],
        out_specs=pl.BlockSpec((tm, N), lambda i: (i, 0)),
        compiler_params=_cparams(1),
    )(o2d, g2d, g_norm_w.reshape(1, K), lin["nw"].reshape(1, K),
      lin["wq"], lin["cs"].reshape(1, N))


def adaln_both(cond, p_attn, p_mlp, H):
    """Both AdaLN stacks in one (weight-DMA-bound) kernel, with a CostEstimate so
    XLA can overlap it with the attention path (it only depends on `cond`)."""
    B = cond.shape[0]
    args = [cond]
    for p in (p_attn, p_mlp):
        args += [p["gate"]["nw"].reshape(1, H), p["gate"]["wq"],
                 p["gate"]["cs"].reshape(1, 4 * H),
                 p["down"]["nw"].reshape(1, 2 * H), p["down"]["wq"],
                 p["down"]["cs"].reshape(1, 2 * H),
                 p["norm_w"].reshape(1, 2 * H),
                 p["out"]["nw"].reshape(1, 2 * H), p["out"]["wq"],
                 p["out"]["cs"].reshape(1, 2 * H)]
    mm = H * 4 * H + 2 * H * 2 * H + 2 * H * 2 * H
    ce = pl.CostEstimate(flops=int(4 * B * mm),
                         transcendentals=int(8 * B * H),
                         bytes_accessed=int(2 * mm + 4 * B * H + 16 * B * H))
    out_shape = (jax.ShapeDtypeStruct((B, H), F32),) * 4
    return pl.pallas_call(
        functools.partial(_adaln_pair_kernel, H=H),
        out_shape=out_shape,
        in_specs=_vmem_specs(len(args)),
        out_specs=tuple(_vmem_specs(4)),
        cost_estimate=ce,
        compiler_params=pltpu.CompilerParams(vmem_limit_bytes=VMEM_LIMIT),
    )(*args)                                   # scale_a, shift_a, scale_m, shift_m


def mod_norm_gate(h3, scale, shift, residual, mlp_norm_w, lin):
    B, T, H = h3.shape
    N = lin["wq"].shape[1]
    tt = _tile(T, 256)
    spec_th = pl.BlockSpec((None, tt, H), lambda b, t: (b, t, 0))
    spec_1h = pl.BlockSpec((None, 1, H), lambda b, t: (b, 0, 0))
    spec_w1 = pl.BlockSpec((1, H), lambda b, t: (0, 0))
    return pl.pallas_call(
        _mod_norm_gate_kernel,
        out_shape=(jax.ShapeDtypeStruct((B, T, N), BF16),
                   jax.ShapeDtypeStruct((B, T, H), BF16)),
        grid=(B, T // tt),
        in_specs=[spec_th, spec_1h, spec_1h, spec_th, spec_w1, spec_w1,
                  pl.BlockSpec((H, N), lambda b, t: (0, 0)),
                  pl.BlockSpec((1, N), lambda b, t: (0, 0))],
        out_specs=(pl.BlockSpec((None, tt, N), lambda b, t: (b, t, 0)), spec_th),
        compiler_params=_cparams(2),
    )(h3, scale.reshape(B, 1, H), shift.reshape(B, 1, H), residual,
      mlp_norm_w.reshape(1, H), lin["nw"].reshape(1, H),
      lin["wq"], lin["cs"].reshape(1, N))


def swiglu_down_mod(y3, scale, shift, residual2, lin):
    B, T, N2 = y3.shape
    I = N2 // 2
    H = lin["wq"].shape[1]
    tt = _tile(T, 256)
    spec_th = pl.BlockSpec((None, tt, H), lambda b, t: (b, t, 0))
    spec_1h = pl.BlockSpec((None, 1, H), lambda b, t: (b, 0, 0))
    return pl.pallas_call(
        functools.partial(_swiglu_down_mod_kernel, I=I),
        out_shape=jax.ShapeDtypeStruct((B, T, H), F32),
        grid=(B, T // tt),
        in_specs=[pl.BlockSpec((None, tt, N2), lambda b, t: (b, t, 0)),
                  spec_1h, spec_1h, spec_th,
                  pl.BlockSpec((1, I), lambda b, t: (0, 0)),
                  pl.BlockSpec((I, H), lambda b, t: (0, 0)),
                  pl.BlockSpec((1, H), lambda b, t: (0, 0))],
        out_specs=spec_th,
        compiler_params=_cparams(2),
    )(y3, scale.reshape(B, 1, H), shift.reshape(B, 1, H), residual2,
      lin["nw"].reshape(1, I), lin["wq"], lin["cs"].reshape(1, H))


# ----------------------------------------------------------------------------
# parameters (deterministic, synthetic)
# ----------------------------------------------------------------------------
def init_params(key, H, interm, n_timesteps=100, n_labels=10):
    keys = iter(jax.random.split(key, 32))

    def lin(out_f, in_f):
        w = jax.random.normal(next(keys), (out_f, in_f), F32) * 0.02
        wq, ws = weight_quant(w)
        return {"nw": jnp.ones((in_f,), F32),        # BitLinear internal RMSNorm weight
                "wq": wq,                            # (in, out) ternary int8
                "cs": jnp.full((out_f,), ws, F32)}   # per-output-column dequant scale

    def fused_lin(out_fs, in_f):
        # Several BitLinears on the same input, fused into one (in, sum(out)) matmul.
        # Shares the internal RMSNorm weight (default ones); per-head weight scales
        # kept exact via the per-column dequant vector.
        wqs, css = [], []
        for of in out_fs:
            w = jax.random.normal(next(keys), (of, in_f), F32) * 0.02
            wq, ws = weight_quant(w)
            wqs.append(wq)
            css.append(jnp.full((of,), ws, F32))
        return {"nw": jnp.ones((in_f,), F32),
                "wq": jnp.concatenate(wqs, axis=1),
                "cs": jnp.concatenate(css)}

    def adaln():
        return {"gate": lin(4 * H, H),               # HGRNBitMLP.gate_proj: H -> 2*(2H)
                "down": lin(2 * H, 2 * H),           # TODO(synk): shape fix (see header)
                "norm_w": jnp.ones((2 * H,), F32),
                "out": lin(2 * H, 2 * H)}

    return {
        "attn_norm_w": jnp.ones((H,), F32),
        "mlp_norm_w": jnp.ones((H,), F32),
        "attn": {"ifg": fused_lin((H, H, H), H),     # fused i|f|g projection
                 "o": lin(H, H),
                 "g_norm_w": jnp.ones((H,), F32)},
        "attn_adaln": adaln(),
        "mlp_adaln": adaln(),
        "mlp": {"gate": lin(2 * interm, H), "down": lin(H, interm)},
        "t_emb": jax.random.normal(next(keys), (n_timesteps, H), F32) * 0.02,
        "l_emb": jax.random.normal(next(keys), (n_labels, H), F32) * 0.02,
    }


# ----------------------------------------------------------------------------
# forward pass
# ----------------------------------------------------------------------------
def hgrn_bit_block_forward(params, hidden_states, timestep, label):
    B, T, H = hidden_states.shape
    x = hidden_states.astype(F32)                     # residual stream (input)
    x2 = x.reshape(B * T, H)

    # conditioning (embedding gathers kept in plain JAX glue)
    cond = params["t_emb"][timestep] + params["l_emb"][label]               # (B, H)

    # AdaLN conditioning (both stacks, one kernel; depends only on cond so XLA
    # can overlap its weight streaming with the attention path)
    scale_a, shift_a, scale_m, shift_m = adaln_both(
        cond, params["attn_adaln"], params["mlp_adaln"], H)                 # (B, H) each

    # --- HGRNBitAttention (fused_recurrent) ---
    pa = params["attn"]
    i_g, f_g, g_lin = attn_ifg(x2, params["attn_norm_w"], pa["ifg"], H)     # bf16
    o_rec = hgrn_core(i_g.reshape(B, T, H), f_g.reshape(B, T, H))           # (B,T,H) bf16
    attn_out = gnorm_oproj(o_rec.reshape(B * T, H), g_lin,
                           pa["g_norm_w"], pa["o"])                         # (B*T,H) bf16

    # --- modulate + add-norm fused into MLP gate proj; MLP + modulate + residual ---
    pm = params["mlp"]
    y, residual2 = mod_norm_gate(attn_out.reshape(B, T, H), scale_a, shift_a,
                                 x, params["mlp_norm_w"], pm["gate"])       # bf16
    out = swiglu_down_mod(y, scale_m, shift_m, residual2, pm["down"])       # (B,T,H) f32
    return out


# ----------------------------------------------------------------------------
if __name__ == "__main__":
    B, T, H, INTERM = 2, 8, 32, 64
    key = jax.random.PRNGKey(0)
    kx, kp, kt, kl = jax.random.split(key, 4)

    x = jax.random.normal(kx, (B, T, H), F32)
    timestep = jax.random.randint(kt, (B,), 0, 100)
    label = jax.random.randint(kl, (B,), 0, 10)
    params = init_params(kp, H, INTERM)

    fwd = jax.jit(functools.partial(hgrn_bit_block_forward, params))
    out = fwd(x, timestep, label)
    jax.block_until_ready(out)

    assert out.shape == (B, T, H), out.shape
    assert bool(jnp.all(jnp.isfinite(out)))
    print("KERNEL_OK")
</pallas_src>

<mosaic_0001>
module attributes {stable_mosaic.version = 11 : i64} {
  func.func @_gnorm_oproj_kernel(%arg0: i32, %arg1: memref<16x32xbf16, #tpu.memory_space<vmem>>, %arg2: memref<16x32xbf16, #tpu.memory_space<vmem>>, %arg3: memref<1x32xf32, #tpu.memory_space<vmem>>, %arg4: memref<1x32xf32, #tpu.memory_space<vmem>>, %arg5: memref<32x32xi8, #tpu.memory_space<vmem>>, %arg6: memref<1x32xf32, #tpu.memory_space<vmem>>, %arg7: memref<16x32xbf16, #tpu.memory_space<vmem>>) attributes {dimension_semantics = [#tpu.dimension_semantics<parallel>], iteration_bounds = array<i64: 1>, scalar_prefetch = 0 : i64, scratch_operands = 0 : i64, tpu.core_type = #tpu.core_type<tc>, window_params = [{transform_indices = @transform_0, window_bounds = array<i64: 16, 32>}, {transform_indices = @transform_1, window_bounds = array<i64: 16, 32>}, {pipeline_mode = #tpu.pipeline_mode<synchronous>, transform_indices = @transform_2, window_bounds = array<i64: 1, 32>}, {pipeline_mode = #tpu.pipeline_mode<synchronous>, transform_indices = @transform_3, window_bounds = array<i64: 1, 32>}, {pipeline_mode = #tpu.pipeline_mode<synchronous>, transform_indices = @transform_4, window_bounds = array<i64: 32, 32>}, {pipeline_mode = #tpu.pipeline_mode<synchronous>, transform_indices = @transform_5, window_bounds = array<i64: 1, 32>}, {transform_indices = @transform_6, window_bounds = array<i64: 16, 32>}]} {
    %c0 = arith.constant 0 : index
    %c0_0 = arith.constant 0 : index
    %0 = vector.load %arg1[%c0, %c0_0] : memref<16x32xbf16, #tpu.memory_space<vmem>>, vector<16x32xbf16>
    %1 = arith.extf %0 : vector<16x32xbf16> to vector<16x32xf32>
    %c0_1 = arith.constant 0 : index
    %c0_2 = arith.constant 0 : index
    %2 = vector.load %arg2[%c0_1, %c0_2] : memref<16x32xbf16, #tpu.memory_space<vmem>>, vector<16x32xbf16>
    %3 = arith.extf %2 : vector<16x32xbf16> to vector<16x32xf32>
    %c0_3 = arith.constant 0 : index
    %c0_4 = arith.constant 0 : index
    %4 = vector.load %arg3[%c0_3, %c0_4] : memref<1x32xf32, #tpu.memory_space<vmem>>, vector<1x32xf32>
    %5 = arith.mulf %1, %1 : vector<16x32xf32>
    %cst = arith.constant dense<0.000000e+00> : vector<16xf32>
    %6 = vector.multi_reduction <add>, %5, %cst [1] : vector<16x32xf32> to vector<16xf32>
    %7 = vector.shape_cast %6 : vector<16xf32> to vector<16x1xf32>
    %cst_5 = arith.constant 3.200000e+01 : f32
    %8 = vector.broadcast %cst_5 : f32 to vector<16x1xf32>
    %9 = arith.divf %7, %8 : vector<16x1xf32>
    %cst_6 = arith.constant 9.99999997E-7 : f32
    %10 = vector.broadcast %cst_6 : f32 to vector<16x1xf32>
    %11 = arith.addf %9, %10 : vector<16x1xf32>
    %12 = math.rsqrt %11 : vector<16x1xf32>
    %13 = vector.broadcast %12 : vector<16x1xf32> to vector<16x32xf32>
    %14 = arith.mulf %1, %13 : vector<16x32xf32>
    %15 = vector.broadcast %4 : vector<1x32xf32> to vector<16x32xf32>
    %16 = arith.mulf %14, %15 : vector<16x32xf32>
    %17 = arith.mulf %16, %3 : vector<16x32xf32>
    %18 = arith.negf %3 : vector<16x32xf32>
    %19 = math.exp %18 : vector<16x32xf32>
    %cst_7 = arith.constant 1.000000e+00 : f32
    %20 = vector.broadcast %cst_7 : f32 to vector<16x32xf32>
    %21 = arith.addf %20, %19 : vector<16x32xf32>
    %22 = arith.divf %20, %21 : vector<16x32xf32>
    %23 = arith.mulf %17, %22 : vector<16x32xf32>
    %c0_8 = arith.constant 0 : index
    %c0_9 = arith.constant 0 : index
    %24 = vector.load %arg4[%c0_8, %c0_9] : memref<1x32xf32, #tpu.memory_space<vmem>>, vector<1x32xf32>
    %c0_10 = arith.constant 0 : index
    %c0_11 = arith.constant 0 : index
    %25 = vector.load %arg5[%c0_10, %c0_11] : memref<32x32xi8, #tpu.memory_space<vmem>>, vector<32x32xi8>
    %c0_12 = arith.constant 0 : index
    %c0_13 = arith.constant 0 : index
    %26 = vector.load %arg6[%c0_12, %c0_13] : memref<1x32xf32, #tpu.memory_space<vmem>>, vector<1x32xf32>
    %27 = arith.mulf %23, %23 : vector<16x32xf32>
    %cst_14 = arith.constant dense<0.000000e+00> : vector<16xf32>
    %28 = vector.multi_reduction <add>, %27, %cst_14 [1] : vector<16x32xf32> to vector<16xf32>
    %29 = vector.shape_cast %28 : vector<16xf32> to vector<16x1xf32>
    %cst_15 = arith.constant 3.200000e+01 : f32
    %30 = vector.broadcast %cst_15 : f32 to vector<16x1xf32>
    %31 = arith.divf %29, %30 : vector<16x1xf32>
    %cst_16 = arith.constant 9.99999993E-9 : f32
    %32 = vector.broadcast %cst_16 : f32 to vector<16x1xf32>
    %33 = arith.addf %31, %32 : vector<16x1xf32>
    %34 = math.rsqrt %33 : vector<16x1xf32>
    %35 = vector.broadcast %34 : vector<16x1xf32> to vector<16x32xf32>
    %36 = arith.mulf %23, %35 : vector<16x32xf32>
    %37 = vector.broadcast %24 : vector<1x32xf32> to vector<16x32xf32>
    %38 = arith.mulf %36, %37 : vector<16x32xf32>
    %39 = math.absf %38 : vector<16x32xf32>
    %cst_17 = arith.constant dense<0xFF800000> : vector<16xf32>
    %40 = vector.multi_reduction <maximumf>, %39, %cst_17 [1] : vector<16x32xf32> to vector<16xf32>
    %41 = vector.shape_cast %40 : vector<16xf32> to vector<16x1xf32>
    %cst_18 = arith.constant 9.99999974E-6 : f32
    %42 = vector.broadcast %cst_18 : f32 to vector<16x1xf32>
    %43 = arith.maximumf %41, %42 : vector<16x1xf32>
    %cst_19 = arith.constant 1.270000e+02 : f32
    %44 = vector.broadcast %cst_19 : f32 to vector<16x1xf32>
    %45 = arith.divf %44, %43 : vector<16x1xf32>
    %46 = vector.broadcast %45 : vector<16x1xf32> to vector<16x32xf32>
    %47 = arith.mulf %38, %46 : vector<16x32xf32>
    %48 = math.roundeven %47 : vector<16x32xf32>
    %cst_20 = arith.constant -1.280000e+02 : f32
    %cst_21 = arith.constant 1.270000e+02 : f32
    %49 = vector.broadcast %cst_20 : f32 to vector<16x32xf32>
    %50 = arith.maximumf %49, %48 : vector<16x32xf32>
    %51 = vector.broadcast %cst_21 : f32 to vector<16x32xf32>
    %52 = arith.minimumf %51, %50 : vector<16x32xf32>
    %53 = arith.truncf %52 : vector<16x32xf32> to vector<16x32xbf16>
    %54 = arith.sitofp %25 : vector<32x32xi8> to vector<32x32xbf16>
    %cst_22 = arith.constant dense<0.000000e+00> : vector<16x32xf32>
    %55 = tpu.matmul %53, %54, %cst_22 {dimension_numbers = #tpu.dot_dimension_numbers<[1], [0], [0], [1], [0, 0, 1, 1], [], []>} : vector<16x32xbf16>, vector<32x32xbf16>, vector<16x32xf32> -> vector<16x32xf32>
    %cst_23 = arith.constant 0.00787401571 : f32
    %56 = vector.broadcast %cst_23 : f32 to vector<16x1xf32>
    %57 = arith.mulf %43, %56 : vector<16x1xf32>
    %58 = vector.broadcast %57 : vector<16x1xf32> to vector<16x32xf32>
    %59 = arith.mulf %55, %58 : vector<16x32xf32>
    %60 = vector.broadcast %26 : vector<1x32xf32> to vector<16x32xf32>
    %61 = arith.mulf %59, %60 : vector<16x32xf32>
    %62 = arith.truncf %61 : vector<16x32xf32> to vector<16x32xbf16>
    %c0_24 = arith.constant 0 : index
    %c0_25 = arith.constant 0 : index
    %63 = vector.load %arg7[%c0_24, %c0_25] : memref<16x32xbf16, #tpu.memory_space<vmem>>, vector<16x32xbf16>
    tpu.vector_store %arg7[%c0_24, %c0_25], %62 {strides = array<i32>} : memref<16x32xbf16, #tpu.memory_space<vmem>>, vector<16x32xbf16>,
    return
  }
  func.func @transform_0(%arg0: i32) -> (i32, i32) {
    %c0_i32 = arith.constant 0 : i32
    %c0_i32_0 = arith.constant 0 : i32
    return %arg0, %c0_i32 : i32, i32
  }
  func.func @transform_1(%arg0: i32) -> (i32, i32) {
    %c0_i32 = arith.constant 0 : i32
    %c0_i32_0 = arith.constant 0 : i32
    return %arg0, %c0_i32 : i32, i32
  }
  func.func @transform_2(%arg0: i32) -> (i32, i32) {
    %c0_i32 = arith.constant 0 : i32
    %c0_i32_0 = arith.constant 0 : i32
    %c0_i32_1 = arith.constant 0 : i32
    return %c0_i32, %c0_i32_0 : i32, i32
  }
  func.func @transform_3(%arg0: i32) -> (i32, i32) {
    %c0_i32 = arith.constant 0 : i32
    %c0_i32_0 = arith.constant 0 : i32
    %c0_i32_1 = arith.constant 0 : i32
    return %c0_i32, %c0_i32_0 : i32, i32
  }
  func.func @transform_4(%arg0: i32) -> (i32, i32) {
    %c0_i32 = arith.constant 0 : i32
    %c0_i32_0 = arith.constant 0 : i32
    %c0_i32_1 = arith.constant 0 : i32
    return %c0_i32, %c0_i32_0 : i32, i32
  }
  func.func @transform_5(%arg0: i32) -> (i32, i32) {
    %c0_i32 = arith.constant 0 : i32
    %c0_i32_0 = arith.constant 0 : i32
    %c0_i32_1 = arith.constant 0 : i32
    return %c0_i32, %c0_i32_0 : i32, i32
  }
  func.func @transform_6(%arg0: i32) -> (i32, i32) {
    %c0_i32 = arith.constant 0 : i32
    %c0_i32_0 = arith.constant 0 : i32
    return %arg0, %c0_i32 : i32, i32
  }
}

module attributes {stable_mosaic.version = 11 : i64} {
  func.func @_ifg_kernel(%arg0: i32, %arg1: memref<16x32xf32, #tpu.memory_space<vmem>>, %arg2: memref<1x32xf32, #tpu.memory_space<vmem>>, %arg3: memref<1x32xf32, #tpu.memory_space<vmem>>, %arg4: memref<32x96xi8, #tpu.memory_space<vmem>>, %arg5: memref<1x96xf32, #tpu.memory_space<vmem>>, %arg6: memref<16x32xbf16, #tpu.memory_space<vmem>>, %arg7: memref<16x32xbf16, #tpu.memory_space<vmem>>, %arg8: memref<16x32xbf16, #tpu.memory_space<vmem>>) attributes {dimension_semantics = [#tpu.dimension_semantics<parallel>], iteration_bounds = array<i64: 1>, scalar_prefetch = 0 : i64, scratch_operands = 0 : i64, tpu.core_type = #tpu.core_type<tc>, window_params = [{transform_indices = @transform_0, window_bounds = array<i64: 16, 32>}, {pipeline_mode = #tpu.pipeline_mode<synchronous>, transform_indices = @transform_1, window_bounds = array<i64: 1, 32>}, {pipeline_mode = #tpu.pipeline_mode<synchronous>, transform_indices = @transform_2, window_bounds = array<i64: 1, 32>}, {pipeline_mode = #tpu.pipeline_mode<synchronous>, transform_indices = @transform_3, window_bounds = array<i64: 32, 96>}, {pipeline_mode = #tpu.pipeline_mode<synchronous>, transform_indices = @transform_4, window_bounds = array<i64: 1, 96>}, {transform_indices = @transform_5, window_bounds = array<i64: 16, 32>}, {transform_indices = @transform_6, window_bounds = array<i64: 16, 32>}, {transform_indices = @transform_7, window_bounds = array<i64: 16, 32>}]} {
    %c0 = arith.constant 0 : index
    %c0_0 = arith.constant 0 : index
    %0 = vector.load %arg1[%c0, %c0_0] : memref<16x32xf32, #tpu.memory_space<vmem>>, vector<16x32xf32>
    %c0_1 = arith.constant 0 : index
    %c0_2 = arith.constant 0 : index
    %1 = vector.load %arg2[%c0_1, %c0_2] : memref<1x32xf32, #tpu.memory_space<vmem>>, vector<1x32xf32>
    %2 = arith.mulf %0, %0 : vector<16x32xf32>
    %cst = arith.constant dense<0.000000e+00> : vector<16xf32>
    %3 = vector.multi_reduction <add>, %2, %cst [1] : vector<16x32xf32> to vector<16xf32>
    %4 = vector.shape_cast %3 : vector<16xf32> to vector<16x1xf32>
    %cst_3 = arith.constant 3.200000e+01 : f32
    %5 = vector.broadcast %cst_3 : f32 to vector<16x1xf32>
    %6 = arith.divf %4, %5 : vector<16x1xf32>
    %cst_4 = arith.constant 9.99999997E-7 : f32
    %7 = vector.broadcast %cst_4 : f32 to vector<16x1xf32>
    %8 = arith.addf %6, %7 : vector<16x1xf32>
    %9 = math.rsqrt %8 : vector<16x1xf32>
    %10 = vector.broadcast %9 : vector<16x1xf32> to vector<16x32xf32>
    %11 = arith.mulf %0, %10 : vector<16x32xf32>
    %12 = vector.broadcast %1 : vector<1x32xf32> to vector<16x32xf32>
    %13 = arith.mulf %11, %12 : vector<16x32xf32>
    %c0_5 = arith.constant 0 : index
    %c0_6 = arith.constant 0 : index
    %14 = vector.load %arg3[%c0_5, %c0_6] : memref<1x32xf32, #tpu.memory_space<vmem>>, vector<1x32xf32>
    %c0_7 = arith.constant 0 : index
    %c0_8 = arith.constant 0 : index
    %15 = vector.load %arg4[%c0_7, %c0_8] : memref<32x96xi8, #tpu.memory_space<vmem>>, vector<32x96xi8>
    %c0_9 = arith.constant 0 : index
    %c0_10 = arith.constant 0 : index
    %16 = vector.load %arg5[%c0_9, %c0_10] : memref<1x96xf32, #tpu.memory_space<vmem>>, vector<1x96xf32>
    %17 = arith.mulf %13, %13 : vector<16x32xf32>
    %cst_11 = arith.constant dense<0.000000e+00> : vector<16xf32>
    %18 = vector.multi_reduction <add>, %17, %cst_11 [1] : vector<16x32xf32> to vector<16xf32>
    %19 = vector.shape_cast %18 : vector<16xf32> to vector<16x1xf32>
    %cst_12 = arith.constant 3.200000e+01 : f32
    %20 = vector.broadcast %cst_12 : f32 to vector<16x1xf32>
    %21 = arith.divf %19, %20 : vector<16x1xf32>
    %cst_13 = arith.constant 9.99999993E-9 : f32
    %22 = vector.broadcast %cst_13 : f32 to vector<16x1xf32>
    %23 = arith.addf %21, %22 : vector<16x1xf32>
    %24 = math.rsqrt %23 : vector<16x1xf32>
    %25 = vector.broadcast %24 : vector<16x1xf32> to vector<16x32xf32>
    %26 = arith.mulf %13, %25 : vector<16x32xf32>
    %27 = vector.broadcast %14 : vector<1x32xf32> to vector<16x32xf32>
    %28 = arith.mulf %26, %27 : vector<16x32xf32>
    %29 = math.absf %28 : vector<16x32xf32>
    %cst_14 = arith.constant dense<0xFF800000> : vector<16xf32>
    %30 = vector.multi_reduction <maximumf>, %29, %cst_14 [1] : vector<16x32xf32> to vector<16xf32>
    %31 = vector.shape_cast %30 : vector<16xf32> to vector<16x1xf32>
    %cst_15 = arith.constant 9.99999974E-6 : f32
    %32 = vector.broadcast %cst_15 : f32 to vector<16x1xf32>
    %33 = arith.maximumf %31, %32 : vector<16x1xf32>
    %cst_16 = arith.constant 1.270000e+02 : f32
    %34 = vector.broadcast %cst_16 : f32 to vector<16x1xf32>
    %35 = arith.divf %34, %33 : vector<16x1xf32>
    %36 = vector.broadcast %35 : vector<16x1xf32> to vector<16x32xf32>
    %37 = arith.mulf %28, %36 : vector<16x32xf32>
    %38 = math.roundeven %37 : vector<16x32xf32>
    %cst_17 = arith.constant -1.280000e+02 : f32
    %cst_18 = arith.constant 1.270000e+02 : f32
    %39 = vector.broadcast %cst_17 : f32 to vector<16x32xf32>
    %40 = arith.maximumf %39, %38 : vector<16x32xf32>
    %41 = vector.broadcast %cst_18 : f32 to vector<16x32xf32>
    %42 = arith.minimumf %41, %40 : vector<16x32xf32>
    %43 = arith.truncf %42 : vector<16x32xf32> to vector<16x32xbf16>
    %44 = arith.sitofp %15 : vector<32x96xi8> to vector<32x96xbf16>
    %cst_19 = arith.constant dense<0.000000e+00> : vector<16x96xf32>
    %45 = tpu.matmul %43, %44, %cst_19 {dimension_numbers = #tpu.dot_dimension_numbers<[1], [0], [0], [1], [0, 0, 1, 1], [], []>} : vector<16x32xbf16>, vector<32x96xbf16>, vector<16x96xf32> -> vector<16x96xf32>
    %cst_20 = arith.constant 0.00787401571 : f32
    %46 = vector.broadcast %cst_20 : f32 to vector<16x1xf32>
    %47 = arith.mulf %33, %46 : vector<16x1xf32>
    %48 = vector.broadcast %47 : vector<16x1xf32> to vector<16x96xf32>
    %49 = arith.mulf %45, %48 : vector<16x96xf32>
    %50 = vector.broadcast %16 : vector<1x96xf32> to vector<16x96xf32>
    %51 = arith.mulf %49, %50 : vector<16x96xf32>
    %52 = vector.extract_strided_slice %51 {offsets = [0, 0], sizes = [16, 32], strides = [1, 1]} : vector<16x96xf32> to vector<16x32xf32>
    %53 = vector.extract_strided_slice %51 {offsets = [0, 32], sizes = [16, 32], strides = [1, 1]} : vector<16x96xf32> to vector<16x32xf32>
    %54 = vector.extract_strided_slice %51 {offsets = [0, 64], sizes = [16, 32], strides = [1, 1]} : vector<16x96xf32> to vector<16x32xf32>
    %55 = arith.negf %53 : vector<16x32xf32>
    %56 = math.exp %55 : vector<16x32xf32>
    %cst_21 = arith.constant 1.000000e+00 : f32
    %57 = vector.broadcast %cst_21 : f32 to vector<16x32xf32>
    %58 = arith.addf %57, %56 : vector<16x32xf32>
    %59 = arith.divf %57, %58 : vector<16x32xf32>
    %60 = arith.negf %52 : vector<16x32xf32>
    %61 = math.exp %60 : vector<16x32xf32>
    %cst_22 = arith.constant 1.000000e+00 : f32
    %62 = vector.broadcast %cst_22 : f32 to vector<16x32xf32>
    %63 = arith.addf %62, %61 : vector<16x32xf32>
    %64 = arith.divf %62, %63 : vector<16x32xf32>
    %65 = arith.mulf %52, %64 : vector<16x32xf32>
    %cst_23 = arith.constant 1.000000e+00 : f32
    %66 = vector.broadcast %cst_23 : f32 to vector<16x32xf32>
    %67 = arith.subf %66, %59 : vector<16x32xf32>
    %68 = arith.mulf %65, %67 : vector<16x32xf32>
    %69 = arith.truncf %68 : vector<16x32xf32> to vector<16x32xbf16>
    %c0_24 = arith.constant 0 : index
    %c0_25 = arith.constant 0 : index
    %70 = vector.load %arg6[%c0_24, %c0_25] : memref<16x32xbf16, #tpu.memory_space<vmem>>, vector<16x32xbf16>
    tpu.vector_store %arg6[%c0_24, %c0_25], %69 {strides = array<i32>} : memref<16x32xbf16, #tpu.memory_space<vmem>>, vector<16x32xbf16>,
    %71 = arith.truncf %59 : vector<16x32xf32> to vector<16x32xbf16>
    %c0_26 = arith.constant 0 : index
    %c0_27 = arith.constant 0 : index
    %72 = vector.load %arg7[%c0_26, %c0_27] : memref<16x32xbf16, #tpu.memory_space<vmem>>, vector<16x32xbf16>
    tpu.vector_store %arg7[%c0_26, %c0_27], %71 {strides = array<i32>} : memref<16x32xbf16, #tpu.memory_space<vmem>>, vector<16x32xbf16>,
    %73 = arith.truncf %54 : vector<16x32xf32> to vector<16x32xbf16>
    %c0_28 = arith.constant 0 : index
    %c0_29 = arith.constant 0 : index
    %74 = vector.load %arg8[%c0_28, %c0_29] : memref<16x32xbf16, #tpu.memory_space<vmem>>, vector<16x32xbf16>
    tpu.vector_store %arg8[%c0_28, %c0_29], %73 {strides = array<i32>} : memref<16x32xbf16, #tpu.memory_space<vmem>>, vector<16x32xbf16>,
    return
  }
  func.func @transform_0(%arg0: i32) -> (i32, i32) {
    %c0_i32 = arith.constant 0 : i32
    %c0_i32_0 = arith.constant 0 : i32
    return %arg0, %c0_i32 : i32, i32
  }
  func.func @transform_1(%arg0: i32) -> (i32, i32) {
    %c0_i32 = arith.constant 0 : i32
    %c0_i32_0 = arith.constant 0 : i32
    %c0_i32_1 = arith.constant 0 : i32
    return %c0_i32, %c0_i32_0 : i32, i32
  }
  func.func @transform_2(%arg0: i32) -> (i32, i32) {
    %c0_i32 = arith.constant 0 : i32
    %c0_i32_0 = arith.constant 0 : i32
    %c0_i32_1 = arith.constant 0 : i32
    return %c0_i32, %c0_i32_0 : i32, i32
  }
  func.func @transform_3(%arg0: i32) -> (i32, i32) {
    %c0_i32 = arith.constant 0 : i32
    %c0_i32_0 = arith.constant 0 : i32
    %c0_i32_1 = arith.constant 0 : i32
    return %c0_i32, %c0_i32_0 : i32, i32
  }
  func.func @transform_4(%arg0: i32) -> (i32, i32) {
    %c0_i32 = arith.constant 0 : i32
    %c0_i32_0 = arith.constant 0 : i32
    %c0_i32_1 = arith.constant 0 : i32
    return %c0_i32, %c0_i32_0 : i32, i32
  }
  func.func @transform_5(%arg0: i32) -> (i32, i32) {
    %c0_i32 = arith.constant 0 : i32
    %c0_i32_0 = arith.constant 0 : i32
    return %arg0, %c0_i32 : i32, i32
  }
  func.func @transform_6(%arg0: i32) -> (i32, i32) {
    %c0_i32 = arith.constant 0 : i32
    %c0_i32_0 = arith.constant 0 : i32
    return %arg0, %c0_i32 : i32, i32
  }
  func.func @transform_7(%arg0: i32) -> (i32, i32) {
    %c0_i32 = arith.constant 0 : i32
    %c0_i32_0 = arith.constant 0 : i32
    return %arg0, %c0_i32 : i32, i32
  }
}

module attributes {stable_mosaic.version = 11 : i64} {
  func.func @_hgrn_kernel(%arg0: i32, %arg1: i32, %arg2: i32, %arg3: memref<1x8x32xbf16, #tpu.memory_space<vmem>>, %arg4: memref<1x8x32xbf16, #tpu.memory_space<vmem>>, %arg5: memref<1x8x32xbf16, #tpu.memory_space<vmem>>, %arg6: memref<1x32xf32, #tpu.memory_space<vmem>>) attributes {dimension_semantics = [#tpu.dimension_semantics<parallel>, #tpu.dimension_semantics<parallel>, #tpu.dimension_semantics<arbitrary>], iteration_bounds = array<i64: 2, 1, 1>, scalar_prefetch = 0 : i64, scratch_operands = 1 : i64, tpu.core_type = #tpu.core_type<tc>, window_params = [{transform_indices = @transform_0, window_bounds = array<i64: 1, 8, 32>}, {transform_indices = @transform_1, window_bounds = array<i64: 1, 8, 32>}, {transform_indices = @transform_2, window_bounds = array<i64: 1, 8, 32>}]} {
    %c0_i32 = arith.constant 0 : i32
    %0 = arith.cmpi eq, %arg2, %c0_i32 : i32
    %1 = arith.extui %0 : i1 to i32
    %c0_i32_0 = arith.constant 0 : i32
    %2 = arith.cmpi ne, %1, %c0_i32_0 : i32
    scf.if %2 {
      %cst = arith.constant 0.000000e+00 : f32
      %53 = vector.broadcast %cst : f32 to vector<1x32xf32>
      %c0_11 = arith.constant 0 : index
      %c0_12 = arith.constant 0 : index
      %54 = vector.load %arg6[%c0_11, %c0_12] : memref<1x32xf32, #tpu.memory_space<vmem>>, vector<1x32xf32>
      tpu.vector_store %arg6[%c0_11, %c0_12], %53 {strides = array<i32>} : memref<1x32xf32, #tpu.memory_space<vmem>>, vector<1x32xf32>,
    } else {
    }
    %c0 = arith.constant 0 : index
    %c0_1 = arith.constant 0 : index
    %3 = vector.load %arg6[%c0, %c0_1] : memref<1x32xf32, #tpu.memory_space<vmem>>, vector<1x32xf32>
    %c0_i32_2 = arith.constant 0 : i32
    %c8_i32 = arith.constant 8 : i32
    %4 = arith.muli %c0_i32_2, %c8_i32 : i32
    %5 = tpu.assume_multiple %4, 8 : i32
    %c0_3 = arith.constant 0 : index
    %6 = arith.index_cast %5 : i32 to index
    %c0_4 = arith.constant 0 : index
    %7 = vector.load %arg3[%c0_3, %6, %c0_4] : memref<1x8x32xbf16, #tpu.memory_space<vmem>>, vector<1x8x32xbf16>
    %8 = vector.shape_cast %7 : vector<1x8x32xbf16> to vector<8x32xbf16>
    %9 = arith.extf %8 : vector<8x32xbf16> to vector<8x32xf32>
    %c0_5 = arith.constant 0 : index
    %10 = arith.index_cast %5 : i32 to index
    %c0_6 = arith.constant 0 : index
    %11 = vector.load %arg4[%c0_5, %10, %c0_6] : memref<1x8x32xbf16, #tpu.memory_space<vmem>>, vector<1x8x32xbf16>
    %12 = vector.shape_cast %11 : vector<1x8x32xbf16> to vector<8x32xbf16>
    %13 = arith.extf %12 : vector<8x32xbf16> to vector<8x32xf32>
    %14 = vector.extract_strided_slice %13 {offsets = [0, 0], sizes = [1, 32], strides = [1, 1]} : vector<8x32xf32> to vector<1x32xf32>
    %15 = arith.mulf %14, %3 : vector<1x32xf32>
    %16 = vector.extract_strided_slice %9 {offsets = [0, 0], sizes = [1, 32], strides = [1, 1]} : vector<8x32xf32> to vector<1x32xf32>
    %17 = arith.addf %15, %16 : vector<1x32xf32>
    %18 = vector.extract_strided_slice %13 {offsets = [1, 0], sizes = [1, 32], strides = [1, 1]} : vector<8x32xf32> to vector<1x32xf32>
    %19 = arith.mulf %18, %17 : vector<1x32xf32>
    %20 = vector.extract_strided_slice %9 {offsets = [1, 0], sizes = [1, 32], strides = [1, 1]} : vector<8x32xf32> to vector<1x32xf32>
    %21 = arith.addf %19, %20 : vector<1x32xf32>
    %22 = vector.extract_strided_slice %13 {offsets = [2, 0], sizes = [1, 32], strides = [1, 1]} : vector<8x32xf32> to vector<1x32xf32>
    %23 = arith.mulf %22, %21 : vector<1x32xf32>
    %24 = vector.extract_strided_slice %9 {offsets = [2, 0], sizes = [1, 32], strides = [1, 1]} : vector<8x32xf32> to vector<1x32xf32>
    %25 = arith.addf %23, %24 : vector<1x32xf32>
    %26 = vector.extract_strided_slice %13 {offsets = [3, 0], sizes = [1, 32], strides = [1, 1]} : vector<8x32xf32> to vector<1x32xf32>
    %27 = arith.mulf %26, %25 : vector<1x32xf32>
    %28 = vector.extract_strided_slice %9 {offsets = [3, 0], sizes = [1, 32], strides = [1, 1]} : vector<8x32xf32> to vector<1x32xf32>
    %29 = arith.addf %27, %28 : vector<1x32xf32>
    %30 = vector.extract_strided_slice %13 {offsets = [4, 0], sizes = [1, 32], strides = [1, 1]} : vector<8x32xf32> to vector<1x32xf32>
    %31 = arith.mulf %30, %29 : vector<1x32xf32>
    %32 = vector.extract_strided_slice %9 {offsets = [4, 0], sizes = [1, 32], strides = [1, 1]} : vector<8x32xf32> to vector<1x32xf32>
    %33 = arith.addf %31, %32 : vector<1x32xf32>
    %34 = vector.extract_strided_slice %13 {offsets = [5, 0], sizes = [1, 32], strides = [1, 1]} : vector<8x32xf32> to vector<1x32xf32>
    %35 = arith.mulf %34, %33 : vector<1x32xf32>
    %36 = vector.extract_strided_slice %9 {offsets = [5, 0], sizes = [1, 32], strides = [1, 1]} : vector<8x32xf32> to vector<1x32xf32>
    %37 = arith.addf %35, %36 : vector<1x32xf32>
    %38 = vector.extract_strided_slice %13 {offsets = [6, 0], sizes = [1, 32], strides = [1, 1]} : vector<8x32xf32> to vector<1x32xf32>
    %39 = arith.mulf %38, %37 : vector<1x32xf32>
    %40 = vector.extract_strided_slice %9 {offsets = [6, 0], sizes = [1, 32], strides = [1, 1]} : vector<8x32xf32> to vector<1x32xf32>
    %41 = arith.addf %39, %40 : vector<1x32xf32>
    %42 = vector.extract_strided_slice %13 {offsets = [7, 0], sizes = [1, 32], strides = [1, 1]} : vector<8x32xf32> to vector<1x32xf32>
    %43 = arith.mulf %42, %41 : vector<1x32xf32>
    %44 = vector.extract_strided_slice %9 {offsets = [7, 0], sizes = [1, 32], strides = [1, 1]} : vector<8x32xf32> to vector<1x32xf32>
    %45 = arith.addf %43, %44 : vector<1x32xf32>
    %46 = tpu.concatenate %17, %21, %25, %29, %33, %37, %41, %45 in 0 : vector<1x32xf32>, vector<1x32xf32>, vector<1x32xf32>, vector<1x32xf32>, vector<1x32xf32>, vector<1x32xf32>, vector<1x32xf32>, vector<1x32xf32> -> vector<8x32xf32>
    %47 = arith.truncf %46 : vector<8x32xf32> to vector<8x32xbf16>
    %c0_7 = arith.constant 0 : index
    %48 = arith.index_cast %5 : i32 to index
    %c0_8 = arith.constant 0 : index
    %49 = vector.load %arg5[%c0_7, %48, %c0_8] : memref<1x8x32xbf16, #tpu.memory_space<vmem>>, vector<1x8x32xbf16>
    %50 = vector.shape_cast %49 : vector<1x8x32xbf16> to vector<8x32xbf16>
    %51 = vector.shape_cast %47 : vector<8x32xbf16> to vector<1x8x32xbf16>
    tpu.vector_store %arg5[%c0_7, %48, %c0_8], %51 {strides = array<i32>} : memref<1x8x32xbf16, #tpu.memory_space<vmem>>, vector<1x8x32xbf16>,
    %c1_i32 = arith.constant 1 : i32
    %c0_9 = arith.constant 0 : index
    %c0_10 = arith.constant 0 : index
    %52 = vector.load %arg6[%c0_9, %c0_10] : memref<1x32xf32, #tpu.memory_space<vmem>>, vector<1x32xf32>
    tpu.vector_store %arg6[%c0_9, %c0_10], %45 {strides = array<i32>} : memref<1x32xf32, #tpu.memory_space<vmem>>, vector<1x32xf32>,
    return
  }
  func.func @transform_0(%arg0: i32, %arg1: i32, %arg2: i32) -> (i32, i32, i32) {
    %c0_i32 = arith.constant 0 : i32
    return %arg0, %arg2, %arg1 : i32, i32, i32
  }
  func.func @transform_1(%arg0: i32, %arg1: i32, %arg2: i32) -> (i32, i32, i32) {
    %c0_i32 = arith.constant 0 : i32
    return %arg0, %arg2, %arg1 : i32, i32, i32
  }
  func.func @transform_2(%arg0: i32, %arg1: i32, %arg2: i32) -> (i32, i32, i32) {
    %c0_i32 = arith.constant 0 : i32
    return %arg0, %arg2, %arg1 : i32, i32, i32
  }
}

module attributes {stable_mosaic.version = 11 : i64} {
  func.func @_adaln_pair_kernel(%arg0: memref<2x32xf32, #tpu.memory_space<vmem>>, %arg1: memref<1x32xf32, #tpu.memory_space<vmem>>, %arg2: memref<32x128xi8, #tpu.memory_space<vmem>>, %arg3: memref<1x128xf32, #tpu.memory_space<vmem>>, %arg4: memref<1x64xf32, #tpu.memory_space<vmem>>, %arg5: memref<64x64xi8, #tpu.memory_space<vmem>>, %arg6: memref<1x64xf32, #tpu.memory_space<vmem>>, %arg7: memref<1x64xf32, #tpu.memory_space<vmem>>, %arg8: memref<1x64xf32, #tpu.memory_space<vmem>>, %arg9: memref<64x64xi8, #tpu.memory_space<vmem>>, %arg10: memref<1x64xf32, #tpu.memory_space<vmem>>, %arg11: memref<1x32xf32, #tpu.memory_space<vmem>>, %arg12: memref<32x128xi8, #tpu.memory_space<vmem>>, %arg13: memref<1x128xf32, #tpu.memory_space<vmem>>, %arg14: memref<1x64xf32, #tpu.memory_space<vmem>>, %arg15: memref<64x64xi8, #tpu.memory_space<vmem>>, %arg16: memref<1x64xf32, #tpu.memory_space<vmem>>, %arg17: memref<1x64xf32, #tpu.memory_space<vmem>>, %arg18: memref<1x64xf32, #tpu.memory_space<vmem>>, %arg19: memref<64x64xi8, #tpu.memory_space<vmem>>, %arg20: memref<1x64xf32, #tpu.memory_space<vmem>>, %arg21: memref<2x32xf32, #tpu.memory_space<vmem>>, %arg22: memref<2x32xf32, #tpu.memory_space<vmem>>, %arg23: memref<2x32xf32, #tpu.memory_space<vmem>>, %arg24: memref<2x32xf32, #tpu.memory_space<vmem>>) attributes {dimension_semantics = [], scalar_prefetch = 0 : i64, scratch_operands = 0 : i64, tpu.core_type = #tpu.core_type<tc>} {
    %c0 = arith.constant 0 : index
    %c0_0 = arith.constant 0 : index
    %0 = vector.load %arg0[%c0, %c0_0] : memref<2x32xf32, #tpu.memory_space<vmem>>, vector<2x32xf32>
    %c0_1 = arith.constant 0 : index
    %c0_2 = arith.constant 0 : index
    %1 = vector.load %arg1[%c0_1, %c0_2] : memref<1x32xf32, #tpu.memory_space<vmem>>, vector<1x32xf32>
    %c0_3 = arith.constant 0 : index
    %c0_4 = arith.constant 0 : index
    %2 = vector.load %arg2[%c0_3, %c0_4] : memref<32x128xi8, #tpu.memory_space<vmem>>, vector<32x128xi8>
    %c0_5 = arith.constant 0 : index
    %c0_6 = arith.constant 0 : index
    %3 = vector.load %arg3[%c0_5, %c0_6] : memref<1x128xf32, #tpu.memory_space<vmem>>, vector<1x128xf32>
    %4 = arith.mulf %0, %0 : vector<2x32xf32>
    %cst = arith.constant dense<0.000000e+00> : vector<2xf32>
    %5 = vector.multi_reduction <add>, %4, %cst [1] : vector<2x32xf32> to vector<2xf32>
    %6 = vector.shape_cast %5 : vector<2xf32> to vector<2x1xf32>
    %cst_7 = arith.constant 3.200000e+01 : f32
    %7 = vector.broadcast %cst_7 : f32 to vector<2x1xf32>
    %8 = arith.divf %6, %7 : vector<2x1xf32>
    %cst_8 = arith.constant 9.99999993E-9 : f32
    %9 = vector.broadcast %cst_8 : f32 to vector<2x1xf32>
    %10 = arith.addf %8, %9 : vector<2x1xf32>
    %11 = math.rsqrt %10 : vector<2x1xf32>
    %12 = vector.broadcast %11 : vector<2x1xf32> to vector<2x32xf32>
    %13 = arith.mulf %0, %12 : vector<2x32xf32>
    %14 = vector.broadcast %1 : vector<1x32xf32> to vector<2x32xf32>
    %15 = arith.mulf %13, %14 : vector<2x32xf32>
    %16 = math.absf %15 : vector<2x32xf32>
    %cst_9 = arith.constant dense<0xFF800000> : vector<2xf32>
    %17 = vector.multi_reduction <maximumf>, %16, %cst_9 [1] : vector<2x32xf32> to vector<2xf32>
    %18 = vector.shape_cast %17 : vector<2xf32> to vector<2x1xf32>
    %cst_10 = arith.constant 9.99999974E-6 : f32
    %19 = vector.broadcast %cst_10 : f32 to vector<2x1xf32>
    %20 = arith.maximumf %18, %19 : vector<2x1xf32>
    %cst_11 = arith.constant 1.270000e+02 : f32
    %21 = vector.broadcast %cst_11 : f32 to vector<2x1xf32>
    %22 = arith.divf %21, %20 : vector<2x1xf32>
    %23 = vector.broadcast %22 : vector<2x1xf32> to vector<2x32xf32>
    %24 = arith.mulf %15, %23 : vector<2x32xf32>
    %25 = math.roundeven %24 : vector<2x32xf32>
    %cst_12 = arith.constant -1.280000e+02 : f32
    %cst_13 = arith.constant 1.270000e+02 : f32
    %26 = vector.broadcast %cst_12 : f32 to vector<2x32xf32>
    %27 = arith.maximumf %26, %25 : vector<2x32xf32>
    %28 = vector.broadcast %cst_13 : f32 to vector<2x32xf32>
    %29 = arith.minimumf %28, %27 : vector<2x32xf32>
    %30 = arith.truncf %29 : vector<2x32xf32> to vector<2x32xbf16>
    %31 = arith.sitofp %2 : vector<32x128xi8> to vector<32x128xbf16>
    %cst_14 = arith.constant dense<0.000000e+00> : vector<2x128xf32>
    %32 = tpu.matmul %30, %31, %cst_14 {dimension_numbers = #tpu.dot_dimension_numbers<[1], [0], [0], [1], [0, 0, 1, 1], [], []>} : vector<2x32xbf16>, vector<32x128xbf16>, vector<2x128xf32> -> vector<2x128xf32>
    %cst_15 = arith.constant 0.00787401571 : f32
    %33 = vector.broadcast %cst_15 : f32 to vector<2x1xf32>
    %34 = arith.mulf %20, %33 : vector<2x1xf32>
    %35 = vector.broadcast %34 : vector<2x1xf32> to vector<2x128xf32>
    %36 = arith.mulf %32, %35 : vector<2x128xf32>
    %37 = vector.broadcast %3 : vector<1x128xf32> to vector<2x128xf32>
    %38 = arith.mulf %36, %37 : vector<2x128xf32>
    %39 = vector.extract_strided_slice %38 {offsets = [0, 0], sizes = [2, 64], strides = [1, 1]} : vector<2x128xf32> to vector<2x64xf32>
    %40 = vector.extract_strided_slice %38 {offsets = [0, 64], sizes = [2, 64], strides = [1, 1]} : vector<2x128xf32> to vector<2x64xf32>
    %41 = arith.negf %39 : vector<2x64xf32>
    %42 = math.exp %41 : vector<2x64xf32>
    %cst_16 = arith.constant 1.000000e+00 : f32
    %43 = vector.broadcast %cst_16 : f32 to vector<2x64xf32>
    %44 = arith.addf %43, %42 : vector<2x64xf32>
    %45 = arith.divf %43, %44 : vector<2x64xf32>
    %46 = arith.mulf %39, %45 : vector<2x64xf32>
    %47 = arith.mulf %46, %40 : vector<2x64xf32>
    %c0_17 = arith.constant 0 : index
    %c0_18 = arith.constant 0 : index
    %48 = vector.load %arg4[%c0_17, %c0_18] : memref<1x64xf32, #tpu.memory_space<vmem>>, vector<1x64xf32>
    %c0_19 = arith.constant 0 : index
    %c0_20 = arith.constant 0 : index
    %49 = vector.load %arg5[%c0_19, %c0_20] : memref<64x64xi8, #tpu.memory_space<vmem>>, vector<64x64xi8>
    %c0_21 = arith.constant 0 : index
    %c0_22 = arith.constant 0 : index
    %50 = vector.load %arg6[%c0_21, %c0_22] : memref<1x64xf32, #tpu.memory_space<vmem>>, vector<1x64xf32>
    %51 = arith.mulf %47, %47 : vector<2x64xf32>
    %cst_23 = arith.constant dense<0.000000e+00> : vector<2xf32>
    %52 = vector.multi_reduction <add>, %51, %cst_23 [1] : vector<2x64xf32> to vector<2xf32>
    %53 = vector.shape_cast %52 : vector<2xf32> to vector<2x1xf32>
    %cst_24 = arith.constant 6.400000e+01 : f32
    %54 = vector.broadcast %cst_24 : f32 to vector<2x1xf32>
    %55 = arith.divf %53, %54 : vector<2x1xf32>
    %cst_25 = arith.constant 9.99999993E-9 : f32
    %56 = vector.broadcast %cst_25 : f32 to vector<2x1xf32>
    %57 = arith.addf %55, %56 : vector<2x1xf32>
    %58 = math.rsqrt %57 : vector<2x1xf32>
    %59 = vector.broadcast %58 : vector<2x1xf32> to vector<2x64xf32>
    %60 = arith.mulf %47, %59 : vector<2x64xf32>
    %61 = vector.broadcast %48 : vector<1x64xf32> to vector<2x64xf32>
    %62 = arith.mulf %60, %61 : vector<2x64xf32>
    %63 = math.absf %62 : vector<2x64xf32>
    %cst_26 = arith.constant dense<0xFF800000> : vector<2xf32>
    %64 = vector.multi_reduction <maximumf>, %63, %cst_26 [1] : vector<2x64xf32> to vector<2xf32>
    %65 = vector.shape_cast %64 : vector<2xf32> to vector<2x1xf32>
    %cst_27 = arith.constant 9.99999974E-6 : f32
    %66 = vector.broadcast %cst_27 : f32 to vector<2x1xf32>
    %67 = arith.maximumf %65, %66 : vector<2x1xf32>
    %cst_28 = arith.constant 1.270000e+02 : f32
    %68 = vector.broadcast %cst_28 : f32 to vector<2x1xf32>
    %69 = arith.divf %68, %67 : vector<2x1xf32>
    %70 = vector.broadcast %69 : vector<2x1xf32> to vector<2x64xf32>
    %71 = arith.mulf %62, %70 : vector<2x64xf32>
    %72 = math.roundeven %71 : vector<2x64xf32>
    %cst_29 = arith.constant -1.280000e+02 : f32
    %cst_30 = arith.constant 1.270000e+02 : f32
    %73 = vector.broadcast %cst_29 : f32 to vector<2x64xf32>
    %74 = arith.maximumf %73, %72 : vector<2x64xf32>
    %75 = vector.broadcast %cst_30 : f32 to vector<2x64xf32>
    %76 = arith.minimumf %75, %74 : vector<2x64xf32>
    %77 = arith.truncf %76 : vector<2x64xf32> to vector<2x64xbf16>
    %78 = arith.sitofp %49 : vector<64x64xi8> to vector<64x64xbf16>
    %cst_31 = arith.constant dense<0.000000e+00> : vector<2x64xf32>
    %79 = tpu.matmul %77, %78, %cst_31 {dimension_numbers = #tpu.dot_dimension_numbers<[1], [0], [0], [1], [0, 0, 1, 1], [], []>} : vector<2x64xbf16>, vector<64x64xbf16>, vector<2x64xf32> -> vector<2x64xf32>
    %cst_32 = arith.constant 0.00787401571 : f32
    %80 = vector.broadcast %cst_32 : f32 to vector<2x1xf32>
    %81 = arith.mulf %67, %80 : vector<2x1xf32>
    %82 = vector.broadcast %81 : vector<2x1xf32> to vector<2x64xf32>
    %83 = arith.mulf %79, %82 : vector<2x64xf32>
    %84 = vector.broadcast %50 : vector<1x64xf32> to vector<2x64xf32>
    %85 = arith.mulf %83, %84 : vector<2x64xf32>
    %c0_33 = arith.constant 0 : index
    %c0_34 = arith.constant 0 : index
    %86 = vector.load %arg7[%c0_33, %c0_34] : memref<1x64xf32, #tpu.memory_space<vmem>>, vector<1x64xf32>
    %87 = arith.mulf %85, %85 : vector<2x64xf32>
    %cst_35 = arith.constant dense<0.000000e+00> : vector<2xf32>
    %88 = vector.multi_reduction <add>, %87, %cst_35 [1] : vector<2x64xf32> to vector<2xf32>
    %89 = vector.shape_cast %88 : vector<2xf32> to vector<2x1xf32>
    %cst_36 = arith.constant 6.400000e+01 : f32
    %90 = vector.broadcast %cst_36 : f32 to vector<2x1xf32>
    %91 = arith.divf %89, %90 : vector<2x1xf32>
    %cst_37 = arith.constant 9.99999997E-7 : f32
    %92 = vector.broadcast %cst_37 : f32 to vector<2x1xf32>
    %93 = arith.addf %91, %92 : vector<2x1xf32>
    %94 = math.rsqrt %93 : vector<2x1xf32>
    %95 = vector.broadcast %94 : vector<2x1xf32> to vector<2x64xf32>
    %96 = arith.mulf %85, %95 : vector<2x64xf32>
    %97 = vector.broadcast %86 : vector<1x64xf32> to vector<2x64xf32>
    %98 = arith.mulf %96, %97 : vector<2x64xf32>
    %c0_38 = arith.constant 0 : index
    %c0_39 = arith.constant 0 : index
    %99 = vector.load %arg8[%c0_38, %c0_39] : memref<1x64xf32, #tpu.memory_space<vmem>>, vector<1x64xf32>
    %c0_40 = arith.constant 0 : index
    %c0_41 = arith.constant 0 : index
    %100 = vector.load %arg9[%c0_40, %c0_41] : memref<64x64xi8, #tpu.memory_space<vmem>>, vector<64x64xi8>
    %c0_42 = arith.constant 0 : index
    %c0_43 = arith.constant 0 : index
    %101 = vector.load %arg10[%c0_42, %c0_43] : memref<1x64xf32, #tpu.memory_space<vmem>>, vector<1x64xf32>
    %102 = arith.mulf %98, %98 : vector<2x64xf32>
    %cst_44 = arith.constant dense<0.000000e+00> : vector<2xf32>
    %103 = vector.multi_reduction <add>, %102, %cst_44 [1] : vector<2x64xf32> to vector<2xf32>
    %104 = vector.shape_cast %103 : vector<2xf32> to vector<2x1xf32>
    %cst_45 = arith.constant 6.400000e+01 : f32
    %105 = vector.broadcast %cst_45 : f32 to vector<2x1xf32>
    %106 = arith.divf %104, %105 : vector<2x1xf32>
    %cst_46 = arith.constant 9.99999993E-9 : f32
    %107 = vector.broadcast %cst_46 : f32 to vector<2x1xf32>
    %108 = arith.addf %106, %107 : vector<2x1xf32>
    %109 = math.rsqrt %108 : vector<2x1xf32>
    %110 = vector.broadcast %109 : vector<2x1xf32> to vector<2x64xf32>
    %111 = arith.mulf %98, %110 : vector<2x64xf32>
    %112 = vector.broadcast %99 : vector<1x64xf32> to vector<2x64xf32>
    %113 = arith.mulf %111, %112 : vector<2x64xf32>
    %114 = math.absf %113 : vector<2x64xf32>
    %cst_47 = arith.constant dense<0xFF800000> : vector<2xf32>
    %115 = vector.multi_reduction <maximumf>, %114, %cst_47 [1] : vector<2x64xf32> to vector<2xf32>
    %116 = vector.shape_cast %115 : vector<2xf32> to vector<2x1xf32>
    %cst_48 = arith.constant 9.99999974E-6 : f32
    %117 = vector.broadcast %cst_48 : f32 to vector<2x1xf32>
    %118 = arith.maximumf %116, %117 : vector<2x1xf32>
    %cst_49 = arith.constant 1.270000e+02 : f32
    %119 = vector.broadcast %cst_49 : f32 to vector<2x1xf32>
    %120 = arith.divf %119, %118 : vector<2x1xf32>
    %121 = vector.broadcast %120 : vector<2x1xf32> to vector<2x64xf32>
    %122 = arith.mulf %113, %121 : vector<2x64xf32>
    %123 = math.roundeven %122 : vector<2x64xf32>
    %cst_50 = arith.constant -1.280000e+02 : f32
    %cst_51 = arith.constant 1.270000e+02 : f32
    %124 = vector.broadcast %cst_50 : f32 to vector<2x64xf32>
    %125 = arith.maximumf %124, %123 : vector<2x64xf32>
    %126 = vector.broadcast %cst_51 : f32 to vector<2x64xf32>
    %127 = arith.minimumf %126, %125 : vector<2x64xf32>
    %128 = arith.truncf %127 : vector<2x64xf32> to vector<2x64xbf16>
    %129 = arith.sitofp %100 : vector<64x64xi8> to vector<64x64xbf16>
    %cst_52 = arith.constant dense<0.000000e+00> : vector<2x64xf32>
    %130 = tpu.matmul %128, %129, %cst_52 {dimension_numbers = #tpu.dot_dimension_numbers<[1], [0], [0], [1], [0, 0, 1, 1], [], []>} : vector<2x64xbf16>, vector<64x64xbf16>, vector<2x64xf32> -> vector<2x64xf32>
    %cst_53 = arith.constant 0.00787401571 : f32
    %131 = vector.broadcast %cst_53 : f32 to vector<2x1xf32>
    %132 = arith.mulf %118, %131 : vector<2x1xf32>
    %133 = vector.broadcast %132 : vector<2x1xf32> to vector<2x64xf32>
    %134 = arith.mulf %130, %133 : vector<2x64xf32>
    %135 = vector.broadcast %101 : vector<1x64xf32> to vector<2x64xf32>
    %136 = arith.mulf %134, %135 : vector<2x64xf32>
    %137 = vector.extract_strided_slice %136 {offsets = [0, 0], sizes = [2, 32], strides = [1, 1]} : vector<2x64xf32> to vector<2x32xf32>
    %c0_54 = arith.constant 0 : index
    %c0_55 = arith.constant 0 : index
    %138 = vector.load %arg21[%c0_54, %c0_55] : memref<2x32xf32, #tpu.memory_space<vmem>>, vector<2x32xf32>
    tpu.vector_store %arg21[%c0_54, %c0_55], %137 {strides = array<i32>} : memref<2x32xf32, #tpu.memory_space<vmem>>, vector<2x32xf32>,
    %139 = vector.extract_strided_slice %136 {offsets = [0, 32], sizes = [2, 32], strides = [1, 1]} : vector<2x64xf32> to vector<2x32xf32>
    %c0_56 = arith.constant 0 : index
    %c0_57 = arith.constant 0 : index
    %140 = vector.load %arg22[%c0_56, %c0_57] : memref<2x32xf32, #tpu.memory_space<vmem>>, vector<2x32xf32>
    tpu.vector_store %arg22[%c0_56, %c0_57], %139 {strides = array<i32>} : memref<2x32xf32, #tpu.memory_space<vmem>>, vector<2x32xf32>,
    %c0_58 = arith.constant 0 : index
    %c0_59 = arith.constant 0 : index
    %141 = vector.load %arg11[%c0_58, %c0_59] : memref<1x32xf32, #tpu.memory_space<vmem>>, vector<1x32xf32>
    %c0_60 = arith.constant 0 : index
    %c0_61 = arith.constant 0 : index
    %142 = vector.load %arg12[%c0_60, %c0_61] : memref<32x128xi8, #tpu.memory_space<vmem>>, vector<32x128xi8>
    %c0_62 = arith.constant 0 : index
    %c0_63 = arith.constant 0 : index
    %143 = vector.load %arg13[%c0_62, %c0_63] : memref<1x128xf32, #tpu.memory_space<vmem>>, vector<1x128xf32>
    %144 = arith.mulf %0, %0 : vector<2x32xf32>
    %cst_64 = arith.constant dense<0.000000e+00> : vector<2xf32>
    %145 = vector.multi_reduction <add>, %144, %cst_64 [1] : vector<2x32xf32> to vector<2xf32>
    %146 = vector.shape_cast %145 : vector<2xf32> to vector<2x1xf32>
    %cst_65 = arith.constant 3.200000e+01 : f32
    %147 = vector.broadcast %cst_65 : f32 to vector<2x1xf32>
    %148 = arith.divf %146, %147 : vector<2x1xf32>
    %cst_66 = arith.constant 9.99999993E-9 : f32
    %149 = vector.broadcast %cst_66 : f32 to vector<2x1xf32>
    %150 = arith.addf %148, %149 : vector<2x1xf32>
    %151 = math.rsqrt %150 : vector<2x1xf32>
    %152 = vector.broadcast %151 : vector<2x1xf32> to vector<2x32xf32>
    %153 = arith.mulf %0, %152 : vector<2x32xf32>
    %154 = vector.broadcast %141 : vector<1x32xf32> to vector<2x32xf32>
    %155 = arith.mulf %153, %154 : vector<2x32xf32>
    %156 = math.absf %155 : vector<2x32xf32>
    %cst_67 = arith.constant dense<0xFF800000> : vector<2xf32>
    %157 = vector.multi_reduction <maximumf>, %156, %cst_67 [1] : vector<2x32xf32> to vector<2xf32>
    %158 = vector.shape_cast %157 : vector<2xf32> to vector<2x1xf32>
    %cst_68 = arith.constant 9.99999974E-6 : f32
    %159 = vector.broadcast %cst_68 : f32 to vector<2x1xf32>
    %160 = arith.maximumf %158, %159 : vector<2x1xf32>
    %cst_69 = arith.constant 1.270000e+02 : f32
    %161 = vector.broadcast %cst_69 : f32 to vector<2x1xf32>
    %162 = arith.divf %161, %160 : vector<2x1xf32>
    %163 = vector.broadcast %162 : vector<2x1xf32> to vector<2x32xf32>
    %164 = arith.mulf %155, %163 : vector<2x32xf32>
    %165 = math.roundeven %164 : vector<2x32xf32>
    %cst_70 = arith.constant -1.280000e+02 : f32
    %cst_71 = arith.constant 1.270000e+02 : f32
    %166 = vector.broadcast %cst_70 : f32 to vector<2x32xf32>
    %167 = arith.maximumf %166, %165 : vector<2x32xf32>
    %168 = vector.broadcast %cst_71 : f32 to vector<2x32xf32>
    %169 = arith.minimumf %168, %167 : vector<2x32xf32>
    %170 = arith.truncf %169 : vector<2x32xf32> to vector<2x32xbf16>
    %171 = arith.sitofp %142 : vector<32x128xi8> to vector<32x128xbf16>
    %cst_72 = arith.constant dense<0.000000e+00> : vector<2x128xf32>
    %172 = tpu.matmul %170, %171, %cst_72 {dimension_numbers = #tpu.dot_dimension_numbers<[1], [0], [0], [1], [0, 0, 1, 1], [], []>} : vector<2x32xbf16>, vector<32x128xbf16>, vector<2x128xf32> -> vector<2x128xf32>
    %cst_73 = arith.constant 0.00787401571 : f32
    %173 = vector.broadcast %cst_73 : f32 to vector<2x1xf32>
    %174 = arith.mulf %160, %173 : vector<2x1xf32>
    %175 = vector.broadcast %174 : vector<2x1xf32> to vector<2x128xf32>
    %176 = arith.mulf %172, %175 : vector<2x128xf32>
    %177 = vector.broadcast %143 : vector<1x128xf32> to vector<2x128xf32>
    %178 = arith.mulf %176, %177 : vector<2x128xf32>
    %179 = vector.extract_strided_slice %178 {offsets = [0, 0], sizes = [2, 64], strides = [1, 1]} : vector<2x128xf32> to vector<2x64xf32>
    %180 = vector.extract_strided_slice %178 {offsets = [0, 64], sizes = [2, 64], strides = [1, 1]} : vector<2x128xf32> to vector<2x64xf32>
    %181 = arith.negf %179 : vector<2x64xf32>
    %182 = math.exp %181 : vector<2x64xf32>
    %cst_74 = arith.constant 1.000000e+00 : f32
    %183 = vector.broadcast %cst_74 : f32 to vector<2x64xf32>
    %184 = arith.addf %183, %182 : vector<2x64xf32>
    %185 = arith.divf %183, %184 : vector<2x64xf32>
    %186 = arith.mulf %179, %185 : vector<2x64xf32>
    %187 = arith.mulf %186, %180 : vector<2x64xf32>
    %c0_75 = arith.constant 0 : index
    %c0_76 = arith.constant 0 : index
    %188 = vector.load %arg14[%c0_75, %c0_76] : memref<1x64xf32, #tpu.memory_space<vmem>>, vector<1x64xf32>
    %c0_77 = arith.constant 0 : index
    %c0_78 = arith.constant 0 : index
    %189 = vector.load %arg15[%c0_77, %c0_78] : memref<64x64xi8, #tpu.memory_space<vmem>>, vector<64x64xi8>
    %c0_79 = arith.constant 0 : index
    %c0_80 = arith.constant 0 : index
    %190 = vector.load %arg16[%c0_79, %c0_80] : memref<1x64xf32, #tpu.memory_space<vmem>>, vector<1x64xf32>
    %191 = arith.mulf %187, %187 : vector<2x64xf32>
    %cst_81 = arith.constant dense<0.000000e+00> : vector<2xf32>
    %192 = vector.multi_reduction <add>, %191, %cst_81 [1] : vector<2x64xf32> to vector<2xf32>
    %193 = vector.shape_cast %192 : vector<2xf32> to vector<2x1xf32>
    %cst_82 = arith.constant 6.400000e+01 : f32
    %194 = vector.broadcast %cst_82 : f32 to vector<2x1xf32>
    %195 = arith.divf %193, %194 : vector<2x1xf32>
    %cst_83 = arith.constant 9.99999993E-9 : f32
    %196 = vector.broadcast %cst_83 : f32 to vector<2x1xf32>
    %197 = arith.addf %195, %196 : vector<2x1xf32>
    %198 = math.rsqrt %197 : vector<2x1xf32>
    %199 = vector.broadcast %198 : vector<2x1xf32> to vector<2x64xf32>
    %200 = arith.mulf %187, %199 : vector<2x64xf32>
    %201 = vector.broadcast %188 : vector<1x64xf32> to vector<2x64xf32>
    %202 = arith.mulf %200, %201 : vector<2x64xf32>
    %203 = math.absf %202 : vector<2x64xf32>
    %cst_84 = arith.constant dense<0xFF800000> : vector<2xf32>
    %204 = vector.multi_reduction <maximumf>, %203, %cst_84 [1] : vector<2x64xf32> to vector<2xf32>
    %205 = vector.shape_cast %204 : vector<2xf32> to vector<2x1xf32>
    %cst_85 = arith.constant 9.99999974E-6 : f32
    %206 = vector.broadcast %cst_85 : f32 to vector<2x1xf32>
    %207 = arith.maximumf %205, %206 : vector<2x1xf32>
    %cst_86 = arith.constant 1.270000e+02 : f32
    %208 = vector.broadcast %cst_86 : f32 to vector<2x1xf32>
    %209 = arith.divf %208, %207 : vector<2x1xf32>
    %210 = vector.broadcast %209 : vector<2x1xf32> to vector<2x64xf32>
    %211 = arith.mulf %202, %210 : vector<2x64xf32>
    %212 = math.roundeven %211 : vector<2x64xf32>
    %cst_87 = arith.constant -1.280000e+02 : f32
    %cst_88 = arith.constant 1.270000e+02 : f32
    %213 = vector.broadcast %cst_87 : f32 to vector<2x64xf32>
    %214 = arith.maximumf %213, %212 : vector<2x64xf32>
    %215 = vector.broadcast %cst_88 : f32 to vector<2x64xf32>
    %216 = arith.minimumf %215, %214 : vector<2x64xf32>
    %217 = arith.truncf %216 : vector<2x64xf32> to vector<2x64xbf16>
    %218 = arith.sitofp %189 : vector<64x64xi8> to vector<64x64xbf16>
    %cst_89 = arith.constant dense<0.000000e+00> : vector<2x64xf32>
    %219 = tpu.matmul %217, %218, %cst_89 {dimension_numbers = #tpu.dot_dimension_numbers<[1], [0], [0], [1], [0, 0, 1, 1], [], []>} : vector<2x64xbf16>, vector<64x64xbf16>, vector<2x64xf32> -> vector<2x64xf32>
    %cst_90 = arith.constant 0.00787401571 : f32
    %220 = vector.broadcast %cst_90 : f32 to vector<2x1xf32>
    %221 = arith.mulf %207, %220 : vector<2x1xf32>
    %222 = vector.broadcast %221 : vector<2x1xf32> to vector<2x64xf32>
    %223 = arith.mulf %219, %222 : vector<2x64xf32>
    %224 = vector.broadcast %190 : vector<1x64xf32> to vector<2x64xf32>
    %225 = arith.mulf %223, %224 : vector<2x64xf32>
    %c0_91 = arith.constant 0 : index
    %c0_92 = arith.constant 0 : index
    %226 = vector.load %arg17[%c0_91, %c0_92] : memref<1x64xf32, #tpu.memory_space<vmem>>, vector<1x64xf32>
    %227 = arith.mulf %225, %225 : vector<2x64xf32>
    %cst_93 = arith.constant dense<0.000000e+00> : vector<2xf32>
    %228 = vector.multi_reduction <add>, %227, %cst_93 [1] : vector<2x64xf32> to vector<2xf32>
    %229 = vector.shape_cast %228 : vector<2xf32> to vector<2x1xf32>
    %cst_94 = arith.constant 6.400000e+01 : f32
    %230 = vector.broadcast %cst_94 : f32 to vector<2x1xf32>
    %231 = arith.divf %229, %230 : vector<2x1xf32>
    %cst_95 = arith.constant 9.99999997E-7 : f32
    %232 = vector.broadcast %cst_95 : f32 to vector<2x1xf32>
    %233 = arith.addf %231, %232 : vector<2x1xf32>
    %234 = math.rsqrt %233 : vector<2x1xf32>
    %235 = vector.broadcast %234 : vector<2x1xf32> to vector<2x64xf32>
    %236 = arith.mulf %225, %235 : vector<2x64xf32>
    %237 = vector.broadcast %226 : vector<1x64xf32> to vector<2x64xf32>
    %238 = arith.mulf %236, %237 : vector<2x64xf32>
    %c0_96 = arith.constant 0 : index
    %c0_97 = arith.constant 0 : index
    %239 = vector.load %arg18[%c0_96, %c0_97] : memref<1x64xf32, #tpu.memory_space<vmem>>, vector<1x64xf32>
    %c0_98 = arith.constant 0 : index
    %c0_99 = arith.constant 0 : index
    %240 = vector.load %arg19[%c0_98, %c0_99] : memref<64x64xi8, #tpu.memory_space<vmem>>, vector<64x64xi8>
    %c0_100 = arith.constant 0 : index
    %c0_101 = arith.constant 0 : index
    %241 = vector.load %arg20[%c0_100, %c0_101] : memref<1x64xf32, #tpu.memory_space<vmem>>, vector<1x64xf32>
    %242 = arith.mulf %238, %238 : vector<2x64xf32>
    %cst_102 = arith.constant dense<0.000000e+00> : vector<2xf32>
    %243 = vector.multi_reduction <add>, %242, %cst_102 [1] : vector<2x64xf32> to vector<2xf32>
    %244 = vector.shape_cast %243 : vector<2xf32> to vector<2x1xf32>
    %cst_103 = arith.constant 6.400000e+01 : f32
    %245 = vector.broadcast %cst_103 : f32 to vector<2x1xf32>
    %246 = arith.divf %244, %245 : vector<2x1xf32>
    %cst_104 = arith.constant 9.99999993E-9 : f32
    %247 = vector.broadcast %cst_104 : f32 to vector<2x1xf32>
    %248 = arith.addf %246, %247 : vector<2x1xf32>
    %249 = math.rsqrt %248 : vector<2x1xf32>
    %250 = vector.broadcast %249 : vector<2x1xf32> to vector<2x64xf32>
    %251 = arith.mulf %238, %250 : vector<2x64xf32>
    %252 = vector.broadcast %239 : vector<1x64xf32> to vector<2x64xf32>
    %253 = arith.mulf %251, %252 : vector<2x64xf32>
    %254 = math.absf %253 : vector<2x64xf32>
    %cst_105 = arith.constant dense<0xFF800000> : vector<2xf32>
    %255 = vector.multi_reduction <maximumf>, %254, %cst_105 [1] : vector<2x64xf32> to vector<2xf32>
    %256 = vector.shape_cast %255 : vector<2xf32> to vector<2x1xf32>
    %cst_106 = arith.constant 9.99999974E-6 : f32
    %257 = vector.broadcast %cst_106 : f32 to vector<2x1xf32>
    %258 = arith.maximumf %256, %257 : vector<2x1xf32>
    %cst_107 = arith.constant 1.270000e+02 : f32
    %259 = vector.broadcast %cst_107 : f32 to vector<2x1xf32>
    %260 = arith.divf %259, %258 : vector<2x1xf32>
    %261 = vector.broadcast %260 : vector<2x1xf32> to vector<2x64xf32>
    %262 = arith.mulf %253, %261 : vector<2x64xf32>
    %263 = math.roundeven %262 : vector<2x64xf32>
    %cst_108 = arith.constant -1.280000e+02 : f32
    %cst_109 = arith.constant 1.270000e+02 : f32
    %264 = vector.broadcast %cst_108 : f32 to vector<2x64xf32>
    %265 = arith.maximumf %264, %263 : vector<2x64xf32>
    %266 = vector.broadcast %cst_109 : f32 to vector<2x64xf32>
    %267 = arith.minimumf %266, %265 : vector<2x64xf32>
    %268 = arith.truncf %267 : vector<2x64xf32> to vector<2x64xbf16>
    %269 = arith.sitofp %240 : vector<64x64xi8> to vector<64x64xbf16>
    %cst_110 = arith.constant dense<0.000000e+00> : vector<2x64xf32>
    %270 = tpu.matmul %268, %269, %cst_110 {dimension_numbers = #tpu.dot_dimension_numbers<[1], [0], [0], [1], [0, 0, 1, 1], [], []>} : vector<2x64xbf16>, vector<64x64xbf16>, vector<2x64xf32> -> vector<2x64xf32>
    %cst_111 = arith.constant 0.00787401571 : f32
    %271 = vector.broadcast %cst_111 : f32 to vector<2x1xf32>
    %272 = arith.mulf %258, %271 : vector<2x1xf32>
    %273 = vector.broadcast %272 : vector<2x1xf32> to vector<2x64xf32>
    %274 = arith.mulf %270, %273 : vector<2x64xf32>
    %275 = vector.broadcast %241 : vector<1x64xf32> to vector<2x64xf32>
    %276 = arith.mulf %274, %275 : vector<2x64xf32>
    %277 = vector.extract_strided_slice %276 {offsets = [0, 0], sizes = [2, 32], strides = [1, 1]} : vector<2x64xf32> to vector<2x32xf32>
    %c0_112 = arith.constant 0 : index
    %c0_113 = arith.constant 0 : index
    %278 = vector.load %arg23[%c0_112, %c0_113] : memref<2x32xf32, #tpu.memory_space<vmem>>, vector<2x32xf32>
    tpu.vector_store %arg23[%c0_112, %c0_113], %277 {strides = array<i32>} : memref<2x32xf32, #tpu.memory_space<vmem>>, vector<2x32xf32>,
    %279 = vector.extract_strided_slice %276 {offsets = [0, 32], sizes = [2, 32], strides = [1, 1]} : vector<2x64xf32> to vector<2x32xf32>
    %c0_114 = arith.constant 0 : index
    %c0_115 = arith.constant 0 : index
    %280 = vector.load %arg24[%c0_114, %c0_115] : memref<2x32xf32, #tpu.memory_space<vmem>>, vector<2x32xf32>
    tpu.vector_store %arg24[%c0_114, %c0_115], %279 {strides = array<i32>} : memref<2x32xf32, #tpu.memory_space<vmem>>, vector<2x32xf32>,
    return
  }
}

module attributes {stable_mosaic.version = 11 : i64} {
  func.func @_mod_norm_gate_kernel(%arg0: i32, %arg1: i32, %arg2: memref<1x8x32xbf16, #tpu.memory_space<vmem>>, %arg3: memref<1x1x32xf32, #tpu.memory_space<vmem>>, %arg4: memref<1x1x32xf32, #tpu.memory_space<vmem>>, %arg5: memref<1x8x32xf32, #tpu.memory_space<vmem>>, %arg6: memref<1x32xf32, #tpu.memory_space<vmem>>, %arg7: memref<1x32xf32, #tpu.memory_space<vmem>>, %arg8: memref<32x128xi8, #tpu.memory_space<vmem>>, %arg9: memref<1x128xf32, #tpu.memory_space<vmem>>, %arg10: memref<1x8x128xbf16, #tpu.memory_space<vmem>>, %arg11: memref<1x8x32xbf16, #tpu.memory_space<vmem>>) attributes {dimension_semantics = [#tpu.dimension_semantics<parallel>, #tpu.dimension_semantics<parallel>], iteration_bounds = array<i64: 2, 1>, scalar_prefetch = 0 : i64, scratch_operands = 0 : i64, tpu.core_type = #tpu.core_type<tc>, window_params = [{transform_indices = @transform_0, window_bounds = array<i64: 1, 8, 32>}, {transform_indices = @transform_1, window_bounds = array<i64: 1, 1, 32>}, {transform_indices = @transform_2, window_bounds = array<i64: 1, 1, 32>}, {transform_indices = @transform_3, window_bounds = array<i64: 1, 8, 32>}, {pipeline_mode = #tpu.pipeline_mode<synchronous>, transform_indices = @transform_4, window_bounds = array<i64: 1, 32>}, {pipeline_mode = #tpu.pipeline_mode<synchronous>, transform_indices = @transform_5, window_bounds = array<i64: 1, 32>}, {pipeline_mode = #tpu.pipeline_mode<synchronous>, transform_indices = @transform_6, window_bounds = array<i64: 32, 128>}, {pipeline_mode = #tpu.pipeline_mode<synchronous>, transform_indices = @transform_7, window_bounds = array<i64: 1, 128>}, {transform_indices = @transform_8, window_bounds = array<i64: 1, 8, 128>}, {transform_indices = @transform_9, window_bounds = array<i64: 1, 8, 32>}]} {
    %c0 = arith.constant 0 : index
    %c0_0 = arith.constant 0 : index
    %c0_1 = arith.constant 0 : index
    %0 = vector.load %arg2[%c0, %c0_0, %c0_1] : memref<1x8x32xbf16, #tpu.memory_space<vmem>>, vector<1x8x32xbf16>
    %1 = vector.shape_cast %0 : vector<1x8x32xbf16> to vector<8x32xbf16>
    %2 = arith.extf %1 : vector<8x32xbf16> to vector<8x32xf32>
    %c0_2 = arith.constant 0 : index
    %c0_3 = arith.constant 0 : index
    %c0_4 = arith.constant 0 : index
    %3 = vector.load %arg3[%c0_2, %c0_3, %c0_4] : memref<1x1x32xf32, #tpu.memory_space<vmem>>, vector<1x1x32xf32>
    %4 = vector.shape_cast %3 : vector<1x1x32xf32> to vector<1x32xf32>
    %cst = arith.constant 1.000000e+00 : f32
    %5 = vector.broadcast %cst : f32 to vector<1x32xf32>
    %6 = arith.addf %5, %4 : vector<1x32xf32>
    %7 = vector.broadcast %6 : vector<1x32xf32> to vector<8x32xf32>
    %8 = arith.mulf %2, %7 : vector<8x32xf32>
    %c0_5 = arith.constant 0 : index
    %c0_6 = arith.constant 0 : index
    %c0_7 = arith.constant 0 : index
    %9 = vector.load %arg4[%c0_5, %c0_6, %c0_7] : memref<1x1x32xf32, #tpu.memory_space<vmem>>, vector<1x1x32xf32>
    %10 = vector.shape_cast %9 : vector<1x1x32xf32> to vector<1x32xf32>
    %11 = vector.broadcast %10 : vector<1x32xf32> to vector<8x32xf32>
    %12 = arith.addf %8, %11 : vector<8x32xf32>
    %c0_8 = arith.constant 0 : index
    %c0_9 = arith.constant 0 : index
    %c0_10 = arith.constant 0 : index
    %13 = vector.load %arg5[%c0_8, %c0_9, %c0_10] : memref<1x8x32xf32, #tpu.memory_space<vmem>>, vector<1x8x32xf32>
    %14 = vector.shape_cast %13 : vector<1x8x32xf32> to vector<8x32xf32>
    %15 = arith.addf %12, %14 : vector<8x32xf32>
    %16 = arith.truncf %15 : vector<8x32xf32> to vector<8x32xbf16>
    %c0_11 = arith.constant 0 : index
    %c0_12 = arith.constant 0 : index
    %c0_13 = arith.constant 0 : index
    %17 = vector.load %arg11[%c0_11, %c0_12, %c0_13] : memref<1x8x32xbf16, #tpu.memory_space<vmem>>, vector<1x8x32xbf16>
    %18 = vector.shape_cast %17 : vector<1x8x32xbf16> to vector<8x32xbf16>
    %19 = vector.shape_cast %16 : vector<8x32xbf16> to vector<1x8x32xbf16>
    tpu.vector_store %arg11[%c0_11, %c0_12, %c0_13], %19 {strides = array<i32>} : memref<1x8x32xbf16, #tpu.memory_space<vmem>>, vector<1x8x32xbf16>,
    %c0_14 = arith.constant 0 : index
    %c0_15 = arith.constant 0 : index
    %20 = vector.load %arg6[%c0_14, %c0_15] : memref<1x32xf32, #tpu.memory_space<vmem>>, vector<1x32xf32>
    %21 = arith.mulf %15, %15 : vector<8x32xf32>
    %cst_16 = arith.constant dense<0.000000e+00> : vector<8xf32>
    %22 = vector.multi_reduction <add>, %21, %cst_16 [1] : vector<8x32xf32> to vector<8xf32>
    %23 = vector.shape_cast %22 : vector<8xf32> to vector<8x1xf32>
    %cst_17 = arith.constant 3.200000e+01 : f32
    %24 = vector.broadcast %cst_17 : f32 to vector<8x1xf32>
    %25 = arith.divf %23, %24 : vector<8x1xf32>
    %cst_18 = arith.constant 9.99999997E-7 : f32
    %26 = vector.broadcast %cst_18 : f32 to vector<8x1xf32>
    %27 = arith.addf %25, %26 : vector<8x1xf32>
    %28 = math.rsqrt %27 : vector<8x1xf32>
    %29 = vector.broadcast %28 : vector<8x1xf32> to vector<8x32xf32>
    %30 = arith.mulf %15, %29 : vector<8x32xf32>
    %31 = vector.broadcast %20 : vector<1x32xf32> to vector<8x32xf32>
    %32 = arith.mulf %30, %31 : vector<8x32xf32>
    %c0_19 = arith.constant 0 : index
    %c0_20 = arith.constant 0 : index
    %33 = vector.load %arg7[%c0_19, %c0_20] : memref<1x32xf32, #tpu.memory_space<vmem>>, vector<1x32xf32>
    %c0_21 = arith.constant 0 : index
    %c0_22 = arith.constant 0 : index
    %34 = vector.load %arg8[%c0_21, %c0_22] : memref<32x128xi8, #tpu.memory_space<vmem>>, vector<32x128xi8>
    %c0_23 = arith.constant 0 : index
    %c0_24 = arith.constant 0 : index
    %35 = vector.load %arg9[%c0_23, %c0_24] : memref<1x128xf32, #tpu.memory_space<vmem>>, vector<1x128xf32>
    %36 = arith.mulf %32, %32 : vector<8x32xf32>
    %cst_25 = arith.constant dense<0.000000e+00> : vector<8xf32>
    %37 = vector.multi_reduction <add>, %36, %cst_25 [1] : vector<8x32xf32> to vector<8xf32>
    %38 = vector.shape_cast %37 : vector<8xf32> to vector<8x1xf32>
    %cst_26 = arith.constant 3.200000e+01 : f32
    %39 = vector.broadcast %cst_26 : f32 to vector<8x1xf32>
    %40 = arith.divf %38, %39 : vector<8x1xf32>
    %cst_27 = arith.constant 9.99999993E-9 : f32
    %41 = vector.broadcast %cst_27 : f32 to vector<8x1xf32>
    %42 = arith.addf %40, %41 : vector<8x1xf32>
    %43 = math.rsqrt %42 : vector<8x1xf32>
    %44 = vector.broadcast %43 : vector<8x1xf32> to vector<8x32xf32>
    %45 = arith.mulf %32, %44 : vector<8x32xf32>
    %46 = vector.broadcast %33 : vector<1x32xf32> to vector<8x32xf32>
    %47 = arith.mulf %45, %46 : vector<8x32xf32>
    %48 = math.absf %47 : vector<8x32xf32>
    %cst_28 = arith.constant dense<0xFF800000> : vector<8xf32>
    %49 = vector.multi_reduction <maximumf>, %48, %cst_28 [1] : vector<8x32xf32> to vector<8xf32>
    %50 = vector.shape_cast %49 : vector<8xf32> to vector<8x1xf32>
    %cst_29 = arith.constant 9.99999974E-6 : f32
    %51 = vector.broadcast %cst_29 : f32 to vector<8x1xf32>
    %52 = arith.maximumf %50, %51 : vector<8x1xf32>
    %cst_30 = arith.constant 1.270000e+02 : f32
    %53 = vector.broadcast %cst_30 : f32 to vector<8x1xf32>
    %54 = arith.divf %53, %52 : vector<8x1xf32>
    %55 = vector.broadcast %54 : vector<8x1xf32> to vector<8x32xf32>
    %56 = arith.mulf %47, %55 : vector<8x32xf32>
    %57 = math.roundeven %56 : vector<8x32xf32>
    %cst_31 = arith.constant -1.280000e+02 : f32
    %cst_32 = arith.constant 1.270000e+02 : f32
    %58 = vector.broadcast %cst_31 : f32 to vector<8x32xf32>
    %59 = arith.maximumf %58, %57 : vector<8x32xf32>
    %60 = vector.broadcast %cst_32 : f32 to vector<8x32xf32>
    %61 = arith.minimumf %60, %59 : vector<8x32xf32>
    %62 = arith.truncf %61 : vector<8x32xf32> to vector<8x32xbf16>
    %63 = arith.sitofp %34 : vector<32x128xi8> to vector<32x128xbf16>
    %cst_33 = arith.constant dense<0.000000e+00> : vector<8x128xf32>
    %64 = tpu.matmul %62, %63, %cst_33 {dimension_numbers = #tpu.dot_dimension_numbers<[1], [0], [0], [1], [0, 0, 1, 1], [], []>} : vector<8x32xbf16>, vector<32x128xbf16>, vector<8x128xf32> -> vector<8x128xf32>
    %cst_34 = arith.constant 0.00787401571 : f32
    %65 = vector.broadcast %cst_34 : f32 to vector<8x1xf32>
    %66 = arith.mulf %52, %65 : vector<8x1xf32>
    %67 = vector.broadcast %66 : vector<8x1xf32> to vector<8x128xf32>
    %68 = arith.mulf %64, %67 : vector<8x128xf32>
    %69 = vector.broadcast %35 : vector<1x128xf32> to vector<8x128xf32>
    %70 = arith.mulf %68, %69 : vector<8x128xf32>
    %71 = arith.truncf %70 : vector<8x128xf32> to vector<8x128xbf16>
    %c0_35 = arith.constant 0 : index
    %c0_36 = arith.constant 0 : index
    %c0_37 = arith.constant 0 : index
    %72 = vector.load %arg10[%c0_35, %c0_36, %c0_37] : memref<1x8x128xbf16, #tpu.memory_space<vmem>>, vector<1x8x128xbf16>
    %73 = vector.shape_cast %72 : vector<1x8x128xbf16> to vector<8x128xbf16>
    %74 = vector.shape_cast %71 : vector<8x128xbf16> to vector<1x8x128xbf16>
    tpu.vector_store %arg10[%c0_35, %c0_36, %c0_37], %74 {strides = array<i32>} : memref<1x8x128xbf16, #tpu.memory_space<vmem>>, vector<1x8x128xbf16>,
    return
  }
  func.func @transform_0(%arg0: i32, %arg1: i32) -> (i32, i32, i32) {
    %c0_i32 = arith.constant 0 : i32
    %c0_i32_0 = arith.constant 0 : i32
    return %arg0, %arg1, %c0_i32 : i32, i32, i32
  }
  func.func @transform_1(%arg0: i32, %arg1: i32) -> (i32, i32, i32) {
    %c0_i32 = arith.constant 0 : i32
    %c0_i32_0 = arith.constant 0 : i32
    %c0_i32_1 = arith.constant 0 : i32
    return %arg0, %c0_i32, %c0_i32_0 : i32, i32, i32
  }
  func.func @transform_2(%arg0: i32, %arg1: i32) -> (i32, i32, i32) {
    %c0_i32 = arith.constant 0 : i32
    %c0_i32_0 = arith.constant 0 : i32
    %c0_i32_1 = arith.constant 0 : i32
    return %arg0, %c0_i32, %c0_i32_0 : i32, i32, i32
  }
  func.func @transform_3(%arg0: i32, %arg1: i32) -> (i32, i32, i32) {
    %c0_i32 = arith.constant 0 : i32
    %c0_i32_0 = arith.constant 0 : i32
    return %arg0, %arg1, %c0_i32 : i32, i32, i32
  }
  func.func @transform_4(%arg0: i32, %arg1: i32) -> (i32, i32) {
    %c0_i32 = arith.constant 0 : i32
    %c0_i32_0 = arith.constant 0 : i32
    %c0_i32_1 = arith.constant 0 : i32
    return %c0_i32, %c0_i32_0 : i32, i32
  }
  func.func @transform_5(%arg0: i32, %arg1: i32) -> (i32, i32) {
    %c0_i32 = arith.constant 0 : i32
    %c0_i32_0 = arith.constant 0 : i32
    %c0_i32_1 = arith.constant 0 : i32
    return %c0_i32, %c0_i32_0 : i32, i32
  }
  func.func @transform_6(%arg0: i32, %arg1: i32) -> (i32, i32) {
    %c0_i32 = arith.constant 0 : i32
    %c0_i32_0 = arith.constant 0 : i32
    %c0_i32_1 = arith.constant 0 : i32
    return %c0_i32, %c0_i32_0 : i32, i32
  }
  func.func @transform_7(%arg0: i32, %arg1: i32) -> (i32, i32) {
    %c0_i32 = arith.constant 0 : i32
    %c0_i32_0 = arith.constant 0 : i32
    %c0_i32_1 = arith.constant 0 : i32
    return %c0_i32, %c0_i32_0 : i32, i32
  }
  func.func @transform_8(%arg0: i32, %arg1: i32) -> (i32, i32, i32) {
    %c0_i32 = arith.constant 0 : i32
    %c0_i32_0 = arith.constant 0 : i32
    return %arg0, %arg1, %c0_i32 : i32, i32, i32
  }
  func.func @transform_9(%arg0: i32, %arg1: i32) -> (i32, i32, i32) {
    %c0_i32 = arith.constant 0 : i32
    %c0_i32_0 = arith.constant 0 : i32
    return %arg0, %arg1, %c0_i32 : i32, i32, i32
  }
}

module attributes {stable_mosaic.version = 11 : i64} {
  func.func @_swiglu_down_mod_kernel(%arg0: i32, %arg1: i32, %arg2: memref<1x8x128xbf16, #tpu.memory_space<vmem>>, %arg3: memref<1x1x32xf32, #tpu.memory_space<vmem>>, %arg4: memref<1x1x32xf32, #tpu.memory_space<vmem>>, %arg5: memref<1x8x32xbf16, #tpu.memory_space<vmem>>, %arg6: memref<1x64xf32, #tpu.memory_space<vmem>>, %arg7: memref<64x32xi8, #tpu.memory_space<vmem>>, %arg8: memref<1x32xf32, #tpu.memory_space<vmem>>, %arg9: memref<1x8x32xf32, #tpu.memory_space<vmem>>) attributes {dimension_semantics = [#tpu.dimension_semantics<parallel>, #tpu.dimension_semantics<parallel>], iteration_bounds = array<i64: 2, 1>, scalar_prefetch = 0 : i64, scratch_operands = 0 : i64, tpu.core_type = #tpu.core_type<tc>, window_params = [{transform_indices = @transform_0, window_bounds = array<i64: 1, 8, 128>}, {transform_indices = @transform_1, window_bounds = array<i64: 1, 1, 32>}, {transform_indices = @transform_2, window_bounds = array<i64: 1, 1, 32>}, {transform_indices = @transform_3, window_bounds = array<i64: 1, 8, 32>}, {pipeline_mode = #tpu.pipeline_mode<synchronous>, transform_indices = @transform_4, window_bounds = array<i64: 1, 64>}, {pipeline_mode = #tpu.pipeline_mode<synchronous>, transform_indices = @transform_5, window_bounds = array<i64: 64, 32>}, {pipeline_mode = #tpu.pipeline_mode<synchronous>, transform_indices = @transform_6, window_bounds = array<i64: 1, 32>}, {transform_indices = @transform_7, window_bounds = array<i64: 1, 8, 32>}]} {
    %c0 = arith.constant 0 : index
    %c0_0 = arith.constant 0 : index
    %c0_1 = arith.constant 0 : index
    %0 = vector.load %arg2[%c0, %c0_0, %c0_1] : memref<1x8x128xbf16, #tpu.memory_space<vmem>>, vector<1x8x128xbf16>
    %1 = vector.shape_cast %0 : vector<1x8x128xbf16> to vector<8x128xbf16>
    %2 = arith.extf %1 : vector<8x128xbf16> to vector<8x128xf32>
    %3 = vector.extract_strided_slice %2 {offsets = [0, 0], sizes = [8, 64], strides = [1, 1]} : vector<8x128xf32> to vector<8x64xf32>
    %4 = vector.extract_strided_slice %2 {offsets = [0, 64], sizes = [8, 64], strides = [1, 1]} : vector<8x128xf32> to vector<8x64xf32>
    %5 = arith.negf %3 : vector<8x64xf32>
    %6 = math.exp %5 : vector<8x64xf32>
    %cst = arith.constant 1.000000e+00 : f32
    %7 = vector.broadcast %cst : f32 to vector<8x64xf32>
    %8 = arith.addf %7, %6 : vector<8x64xf32>
    %9 = arith.divf %7, %8 : vector<8x64xf32>
    %10 = arith.mulf %3, %9 : vector<8x64xf32>
    %11 = arith.mulf %10, %4 : vector<8x64xf32>
    %c0_2 = arith.constant 0 : index
    %c0_3 = arith.constant 0 : index
    %12 = vector.load %arg6[%c0_2, %c0_3] : memref<1x64xf32, #tpu.memory_space<vmem>>, vector<1x64xf32>
    %c0_4 = arith.constant 0 : index
    %c0_5 = arith.constant 0 : index
    %13 = vector.load %arg7[%c0_4, %c0_5] : memref<64x32xi8, #tpu.memory_space<vmem>>, vector<64x32xi8>
    %c0_6 = arith.constant 0 : index
    %c0_7 = arith.constant 0 : index
    %14 = vector.load %arg8[%c0_6, %c0_7] : memref<1x32xf32, #tpu.memory_space<vmem>>, vector<1x32xf32>
    %15 = arith.mulf %11, %11 : vector<8x64xf32>
    %cst_8 = arith.constant dense<0.000000e+00> : vector<8xf32>
    %16 = vector.multi_reduction <add>, %15, %cst_8 [1] : vector<8x64xf32> to vector<8xf32>
    %17 = vector.shape_cast %16 : vector<8xf32> to vector<8x1xf32>
    %cst_9 = arith.constant 6.400000e+01 : f32
    %18 = vector.broadcast %cst_9 : f32 to vector<8x1xf32>
    %19 = arith.divf %17, %18 : vector<8x1xf32>
    %cst_10 = arith.constant 9.99999993E-9 : f32
    %20 = vector.broadcast %cst_10 : f32 to vector<8x1xf32>
    %21 = arith.addf %19, %20 : vector<8x1xf32>
    %22 = math.rsqrt %21 : vector<8x1xf32>
    %23 = vector.broadcast %22 : vector<8x1xf32> to vector<8x64xf32>
    %24 = arith.mulf %11, %23 : vector<8x64xf32>
    %25 = vector.broadcast %12 : vector<1x64xf32> to vector<8x64xf32>
    %26 = arith.mulf %24, %25 : vector<8x64xf32>
    %27 = math.absf %26 : vector<8x64xf32>
    %cst_11 = arith.constant dense<0xFF800000> : vector<8xf32>
    %28 = vector.multi_reduction <maximumf>, %27, %cst_11 [1] : vector<8x64xf32> to vector<8xf32>
    %29 = vector.shape_cast %28 : vector<8xf32> to vector<8x1xf32>
    %cst_12 = arith.constant 9.99999974E-6 : f32
    %30 = vector.broadcast %cst_12 : f32 to vector<8x1xf32>
    %31 = arith.maximumf %29, %30 : vector<8x1xf32>
    %cst_13 = arith.constant 1.270000e+02 : f32
    %32 = vector.broadcast %cst_13 : f32 to vector<8x1xf32>
    %33 = arith.divf %32, %31 : vector<8x1xf32>
    %34 = vector.broadcast %33 : vector<8x1xf32> to vector<8x64xf32>
    %35 = arith.mulf %26, %34 : vector<8x64xf32>
    %36 = math.roundeven %35 : vector<8x64xf32>
    %cst_14 = arith.constant -1.280000e+02 : f32
    %cst_15 = arith.constant 1.270000e+02 : f32
    %37 = vector.broadcast %cst_14 : f32 to vector<8x64xf32>
    %38 = arith.maximumf %37, %36 : vector<8x64xf32>
    %39 = vector.broadcast %cst_15 : f32 to vector<8x64xf32>
    %40 = arith.minimumf %39, %38 : vector<8x64xf32>
    %41 = arith.truncf %40 : vector<8x64xf32> to vector<8x64xbf16>
    %42 = arith.sitofp %13 : vector<64x32xi8> to vector<64x32xbf16>
    %cst_16 = arith.constant dense<0.000000e+00> : vector<8x32xf32>
    %43 = tpu.matmul %41, %42, %cst_16 {dimension_numbers = #tpu.dot_dimension_numbers<[1], [0], [0], [1], [0, 0, 1, 1], [], []>} : vector<8x64xbf16>, vector<64x32xbf16>, vector<8x32xf32> -> vector<8x32xf32>
    %cst_17 = arith.constant 0.00787401571 : f32
    %44 = vector.broadcast %cst_17 : f32 to vector<8x1xf32>
    %45 = arith.mulf %31, %44 : vector<8x1xf32>
    %46 = vector.broadcast %45 : vector<8x1xf32> to vector<8x32xf32>
    %47 = arith.mulf %43, %46 : vector<8x32xf32>
    %48 = vector.broadcast %14 : vector<1x32xf32> to vector<8x32xf32>
    %49 = arith.mulf %47, %48 : vector<8x32xf32>
    %c0_18 = arith.constant 0 : index
    %c0_19 = arith.constant 0 : index
    %c0_20 = arith.constant 0 : index
    %50 = vector.load %arg5[%c0_18, %c0_19, %c0_20] : memref<1x8x32xbf16, #tpu.memory_space<vmem>>, vector<1x8x32xbf16>
    %51 = vector.shape_cast %50 : vector<1x8x32xbf16> to vector<8x32xbf16>
    %52 = arith.extf %51 : vector<8x32xbf16> to vector<8x32xf32>
    %c0_21 = arith.constant 0 : index
    %c0_22 = arith.constant 0 : index
    %c0_23 = arith.constant 0 : index
    %53 = vector.load %arg3[%c0_21, %c0_22, %c0_23] : memref<1x1x32xf32, #tpu.memory_space<vmem>>, vector<1x1x32xf32>
    %54 = vector.shape_cast %53 : vector<1x1x32xf32> to vector<1x32xf32>
    %cst_24 = arith.constant 1.000000e+00 : f32
    %55 = vector.broadcast %cst_24 : f32 to vector<1x32xf32>
    %56 = arith.addf %55, %54 : vector<1x32xf32>
    %57 = vector.broadcast %56 : vector<1x32xf32> to vector<8x32xf32>
    %58 = arith.mulf %49, %57 : vector<8x32xf32>
    %59 = arith.addf %52, %58 : vector<8x32xf32>
    %c0_25 = arith.constant 0 : index
    %c0_26 = arith.constant 0 : index
    %c0_27 = arith.constant 0 : index
    %60 = vector.load %arg4[%c0_25, %c0_26, %c0_27] : memref<1x1x32xf32, #tpu.memory_space<vmem>>, vector<1x1x32xf32>
    %61 = vector.shape_cast %60 : vector<1x1x32xf32> to vector<1x32xf32>
    %62 = vector.broadcast %61 : vector<1x32xf32> to vector<8x32xf32>
    %63 = arith.addf %59, %62 : vector<8x32xf32>
    %c0_28 = arith.constant 0 : index
    %c0_29 = arith.constant 0 : index
    %c0_30 = arith.constant 0 : index
    %64 = vector.load %arg9[%c0_28, %c0_29, %c0_30] : memref<1x8x32xf32, #tpu.memory_space<vmem>>, vector<1x8x32xf32>
    %65 = vector.shape_cast %64 : vector<1x8x32xf32> to vector<8x32xf32>
    %66 = vector.shape_cast %63 : vector<8x32xf32> to vector<1x8x32xf32>
    tpu.vector_store %arg9[%c0_28, %c0_29, %c0_30], %66 {strides = array<i32>} : memref<1x8x32xf32, #tpu.memory_space<vmem>>, vector<1x8x32xf32>,
    return
  }
  func.func @transform_0(%arg0: i32, %arg1: i32) -> (i32, i32, i32) {
    %c0_i32 = arith.constant 0 : i32
    %c0_i32_0 = arith.constant 0 : i32
    return %arg0, %arg1, %c0_i32 : i32, i32, i32
  }
  func.func @transform_1(%arg0: i32, %arg1: i32) -> (i32, i32, i32) {
    %c0_i32 = arith.constant 0 : i32
    %c0_i32_0 = arith.constant 0 : i32
    %c0_i32_1 = arith.constant 0 : i32
    return %arg0, %c0_i32, %c0_i32_0 : i32, i32, i32
  }
  func.func @transform_2(%arg0: i32, %arg1: i32) -> (i32, i32, i32) {
    %c0_i32 = arith.constant 0 : i32
    %c0_i32_0 = arith.constant 0 : i32
    %c0_i32_1 = arith.constant 0 : i32
    return %arg0, %c0_i32, %c0_i32_0 : i32, i32, i32
  }
  func.func @transform_3(%arg0: i32, %arg1: i32) -> (i32, i32, i32) {
    %c0_i32 = arith.constant 0 : i32
    %c0_i32_0 = arith.constant 0 : i32
    return %arg0, %arg1, %c0_i32 : i32, i32, i32
  }
  func.func @transform_4(%arg0: i32, %arg1: i32) -> (i32, i32) {
    %c0_i32 = arith.constant 0 : i32
    %c0_i32_0 = arith.constant 0 : i32
    %c0_i32_1 = arith.constant 0 : i32
    return %c0_i32, %c0_i32_0 : i32, i32
  }
  func.func @transform_5(%arg0: i32, %arg1: i32) -> (i32, i32) {
    %c0_i32 = arith.constant 0 : i32
    %c0_i32_0 = arith.constant 0 : i32
    %c0_i32_1 = arith.constant 0 : i32
    return %c0_i32, %c0_i32_0 : i32, i32
  }
  func.func @transform_6(%arg0: i32, %arg1: i32) -> (i32, i32) {
    %c0_i32 = arith.constant 0 : i32
    %c0_i32_0 = arith.constant 0 : i32
    %c0_i32_1 = arith.constant 0 : i32
    return %c0_i32, %c0_i32_0 : i32, i32
  }
  func.func @transform_7(%arg0: i32, %arg1: i32) -> (i32, i32, i32) {
    %c0_i32 = arith.constant 0 : i32
    %c0_i32_0 = arith.constant 0 : i32
    return %arg0, %arg1, %c0_i32 : i32, i32, i32
  }
}

</mosaic_0001>

<bundles_post_ra>
// kernel: hgrn_bit_block_forward.8
= control target key start
LH: loop header
LB: loop body
LE: loop exit
PB: predicated region body
PF: predicated region fallthrough
CT: control target
= control target key end

     0   :  { %s485_s9 = smov 0   ;;  %s487_s10 = smov 0   ;;  %s526_s0 = inlined_call_operand.vmem [shape: bf16[2,8,32], index: 0, kind: input, shape index: {}]   ;;  %s527_s1 = inlined_call_operand.vmem [shape: bf16[2,8,32], index: 1, kind: input, shape index: {}]   ;;  %s528_s2 = inlined_call_operand.vmem [shape: bf16[2,8,32], index: 2, kind: output, shape index: {}]  }
   0x1   :  { %s489_s11 = smov 0  }
   0x2 LB: > { %s31_s12 = sadd.s32 1, %s463_s10  ;;  %p414_p0 = scmp.ge.s32.totalorder %s467_s11, 1  ;;  %s467_s11 = sphi %s489_s11, %s12_s11   ;;  %s463_s10 = sphi %s487_s10, %s530_s10   ;;  %s459_s9 = sphi %s485_s9, %s529_s9  }
   0x3   : > { %p33_p1 = scmp.ge.s32.totalorder %s31_s12, 2  ;;  %p163_p2 = scmp.lt.s32.totalorder %s467_s11, 3 }
   0x5   : > { %s532_s12 = smov (%p33_p1, %s31_s12), 0  ;;  %p164_p3 = pnand %p414_p0, %p163_p2 }
   0x6   : > { %p205_p4 = scmp.lt.s32.totalorder (!%p164_p3), %s459_s9, 1 }
   0x7   : > { %167 = sbr.rel (%p164_p3) target bundleno = 71 (0x47), region = 28 }
   0xc   : > { %vm239_vm0 = vcmask 253952   ;;  %v469_v0 = vmov 0.0   ;;  %s534_s9 = smov (!%p205_p4, %s459_s9), 1  ;;  %vm283_vm1 = vcmask 1040384   ;;  %vm285_vm2 = vcmask 1041408  }
   0xd   : > { %240 = vst.msk [vmem:[#allocation2] sm:$0x1] %vm239_vm0, %v469_v0  ;;  %s503_s13 = sshll.u32 %s534_s9, 2  ;;  %vm287_vm3 = vcmask 1042432   ;;  %vm289_vm4 = vcmask 1043456   ;;  %vm291_vm5 = vcmask 1044480  }
   0xe   : > { %s214_s16 = scalar_lea.vmem %s526_s0, %s503_s13  ;;  %s224_s19 = scalar_lea.vmem %s527_s1, %s503_s13  ;;  %vm293_vm6 = vcmask 1045504   ;;  %vm300_vm7 = vcmask 261127   ;;  %vm295_vm8 = vcmask 1046528   ;;  %vm298_vm9 = vcmask 257024  }
   0xf   : > { %v242_v1 = vld [vmem:[%s214_s16] sm:$0xf]  ;;  %s234_s22 = scalar_lea.vmem %s528_s2, %s503_s13 }
  0x10   : > { %v244_v2 = vld [vmem:[%s224_s19] sm:$0xf]  ;;  %v243_v3 = vunpack.c.l.bf16 %v242_v1 }
  0x11   : > { %v245_v4 = vunpack.c.l.bf16 %v244_v2 }
  0x14   : > { %v241_v5 = vld [vmem:[#allocation2] sm:$0x1] }
  0x15   : > { %v246_v6 = vmul.f32 %v245_v4, %v241_v5 }
  0x17   : > { %v247_v7 = vadd.f32 %v246_v6, %v243_v3 }
  0x19   : > { %v249_v8 = vrot.slane %v247_v7, 7 }
  0x1b   : > { %v251_v9 = vmul.f32 %v249_v8, %v245_v4 }
  0x1d   : > { %v252_v10 = vadd.f32 %v251_v9, %v243_v3 }
  0x1f   : > { %v254_v11 = vrot.slane %v252_v10, 7  ;;  %v284_v27 = vsel %vm283_vm1, %v247_v7, %v252_v10 }
  0x21   : > { %v256_v12 = vmul.f32 %v254_v11, %v245_v4 }
  0x23   : > { %v257_v13 = vadd.f32 %v256_v12, %v243_v3 }
  0x25   : > { %v259_v14 = vrot.slane %v257_v13, 7  ;;  %v286_v28 = vsel %vm285_vm2, %v284_v27, %v257_v13 }
  0x27   : > { %v261_v15 = vmul.f32 %v259_v14, %v245_v4 }
  0x29   : > { %v262_v16 = vadd.f32 %v261_v15, %v243_v3 }
  0x2b   : > { %v264_v17 = vrot.slane %v262_v16, 7  ;;  %v288_v30 = vsel %vm287_vm3, %v286_v28, %v262_v16 }
  0x2d   : > { %v266_v18 = vmul.f32 %v264_v17, %v245_v4 }
  0x2f   : > { %v267_v19 = vadd.f32 %v266_v18, %v243_v3 }
  0x31   : > { %v269_v20 = vrot.slane %v267_v19, 7  ;;  %v290_v31 = vsel %vm289_vm4, %v288_v30, %v267_v19 }
  0x33   : > { %v271_v21 = vmul.f32 %v269_v20, %v245_v4 }
  0x35   : > { %v272_v22 = vadd.f32 %v271_v21, %v243_v3 }
  0x37   : > { %v274_v23 = vrot.slane %v272_v22, 7  ;;  %v292_v33 = vsel %vm291_vm5, %v290_v31, %v272_v22 }
  0x39   : > { %v276_v24 = vmul.f32 %v274_v23, %v245_v4 }
  0x3b   : > { %v277_v25 = vadd.f32 %v276_v24, %v243_v3 }
  0x3d   : > { %v279_v26 = vrot.slane %v277_v25, 7  ;;  %v294_v34 = vsel %vm293_vm6, %v292_v33, %v277_v25 }
  0x3f   : > { %v281_v29 = vmul.f32 %v279_v26, %v245_v4 }
  0x41   : > { %v282_v32 = vadd.f32 %v281_v29, %v243_v3 }
  0x43   : > { %301 = vst.msk [vmem:[#allocation2 - $0x7] sm:$0x80] %vm300_vm7, %v282_v32  ;;  %v296_v35 = vsel %vm295_vm8, %v294_v34, %v282_v32 }
  0x44   : > { %v297_v36 = vpack.c.bf16 %v296_v35, %v296_v35 }
  0x46   : > { %299 = vst.msk [vmem:[%s234_s22] sm:$0xf] %vm298_vm9, %v297_v36 }
  0x47 PF: > { %s12_s11 = sadd.s32 1, %s467_s11   ;;  %s529_s9 = smov %s463_s10 }
  0x48   : > { %p9_p5 = scmp.ge.s32.totalorder %s12_s11, 4   ;;  %s530_s10 = smov %s532_s12 }
  0x4a   :  { %11 = sbr.rel (!%p9_p5) target bundleno = 2 (0x2), region = 65 }

// kernel: hgrn_bit_block_forward.7
= control target key start
LH: loop header
LB: loop body
LE: loop exit
PB: predicated region body
PF: predicated region fallthrough
CT: control target
= control target key end

     0   :  { %13 = vsyncpa [#allocation3], 0  ;;  %s387_s27 = smov [#allocation2]   ;;  %s388_s29 = smov 128   ;;  %s479_s0 = inlined_call_operand.hbm [shape: f32[16,32], index: 0, kind: input, shape index: {}]   ;;  %s480_s1 = inlined_call_operand.vmem [shape: f32[1,32], index: 1, kind: input, shape index: {}, may-alias: {1,2}]   ;;  %s481_s2 = inlined_call_operand.vmem [shape: f32[1,32], index: 2, kind: input, shape index: {}, may-alias: {1,2}]   ;;  %s482_s3 = inlined_call_operand.vmem [shape: s8[32,96], index: 3, kind: input, shape index: {}]   ;;  %s483_s4 = inlined_call_operand.vmem [shape: f32[1,96], index: 4, kind: input, shape index: {}]   ;;  %s484_s5 = inlined_call_operand.vmem [shape: bf16[16,32], index: 5, kind: output, shape index: {0}]   ;;  %s485_s6 = inlined_call_operand.vmem [shape: bf16[16,32], index: 6, kind: output, shape index: {1}]   ;;  %s486_s7 = inlined_call_operand.vmem [shape: bf16[16,32], index: 7, kind: output, shape index: {2}]  }
   0x1   :  { %s18_s26 = sshll.u32 %s479_s0, 4  ;;  %s20_s28 = sshll.u32 %s387_s27, 4  ;;  %s19_s26 = int_to_ptr.hbm [resolvable:$true] %s18_s26  ;;  %s21_s28 = int_to_ptr.vmem [resolvable:$true] %s20_s28 }
   0x2   :  { %s389_s30 = smov 8  }
   0x3   :  { %26 = dma.hbm_to_vmem [thread:$0]  %s19_s26, 256, %s21_s28, [#allocation3], %s388_s29, %s388_s29, %s389_s30  }
   0x4   :  { %385 = dma.done.wait [#allocation3], 256  }
   0x5   :  { %386 = vsyncadd [#allocation3], 4294967040  ;;  %v40_v0 = vld [vmem:[#allocation2] sm:$0xff]  ;;  %vm45_vm0 = vcmask 261120   ;;  %v41_v2 = vld [vmem:[#allocation2 + $0x8] sm:$0xff]  ;;  %v390_v6 = vmov 32.0  }
   0x6   :  { %v43_v1 = vmul.f32 %v40_v0, %v40_v0  ;;  %v44_v4 = vmul.f32 %v41_v2, %v41_v2  ;;  %339 = vrcp.f32 %v390_v6  ;;  %v336_v27 = vld [vmem:[%s480_s1] ss:$0 sm:$0xff]  ;;  %s392_s12 = smov 64  }
   0x7   :  { %v337_v56 = vld [vmem:[%s481_s2] ss:$0 sm:$0xff] }
   0x8   :  { %v46_v3 = vsel %vm45_vm0, %v43_v1, 0.0  ;;  %v49_v5 = vsel %vm45_vm0, %v44_v4, 0.0 }
   0x9   :  { %47 = vadd.xlane.f32.xlu0 %v46_v3 }
   0xc   :  { %v340_v7 = vpop.eup %339 }
   0xd   :  { %v53_v8 = vmul.f32 32.0, %v340_v7  ;;  %vm57_vm1 = vweird.f32 %v340_v7 }
   0xf   :  { %v54_v9 = vsub.f32 1.0, %v53_v8 }
  0x11   :  { %50 = vadd.xlane.f32.xlu0 %v49_v5  ;;  %v55_v10 = vmul.f32 %v340_v7, %v54_v9 }
  0x13   :  { %v56_v11 = vadd.f32 %v340_v7, %v55_v10 }
  0x15   :  { %v58_v12 = vsel %vm57_vm1, %v340_v7, %v56_v11  ;;  %v91_v7 = vld [vmem:[%s482_s3] sm:$0xff] }
  0x16   :  { %v183_v8 = vunpack.c.2.s8 %v91_v7  ;;  %v184_v9 = vunpack.c.3.s8 %v91_v7  ;;  %v181_v10 = vunpack.c.0.s8 %v91_v7  ;;  %v182_v11 = vunpack.c.1.s8 %v91_v7 }
  0x7c   :  { %v48_v13 = vpop.xlane.xlu0 %47 }
  0x7d   :  { %v59_v14 = vmul.f32 %v58_v12, %v48_v13  ;;  %v188_v13 = vcvt.s32.f32 %v184_v9 }
  0x7f   :  { %v61_v15 = vadd.f32 1e-06, %v59_v14  ;;  %v185_v14 = vcvt.s32.f32 %v181_v10 }
  0x81   :  { %341 = vrsqrt.f32 %v61_v15  ;;  %vm69_vm3 = vweird.f32 %v61_v15 }
  0x84   :  { %v51_v16 = vpop.xlane.xlu0 %50 }
  0x85   :  { %v60_v17 = vmul.f32 %v58_v12, %v51_v16 }
  0x87   :  { %v342_v18 = vpop.eup %341  ;;  %v62_v19 = vadd.f32 1e-06, %v60_v17 }
  0x88   :  { %v64_v20 = vmul.f32 %v342_v18, %v61_v15  ;;  %vm70_vm2 = vweird.f32 %v342_v18  ;;  %v186_v15 = vcvt.s32.f32 %v182_v11 }
  0x89   :  { %343 = vrsqrt.f32 %v62_v19  ;;  %vm71_vm4 = vmor %vm69_vm3, %vm70_vm2  ;;  %vm79_vm6 = vweird.f32 %v62_v19 }
  0x8a   :  { %v65_v21 = vmul.f32 %v342_v18, %v64_v20  ;;  %v189_v17 = vpack.c.bf16 %v186_v15, %v185_v14 }
  0x8c   :  { %v66_v22 = vmul.f32 0.5, %v65_v21 }
  0x8e   :  { %v67_v23 = vsub.f32 1.5, %v66_v22 }
  0x8f   :  { %v344_v24 = vpop.eup %343 }
  0x90   :  { %v68_v25 = vmul.f32 %v342_v18, %v67_v23  ;;  %v74_v26 = vmul.f32 %v344_v24, %v62_v19  ;;  %vm80_vm5 = vweird.f32 %v344_v24 }
  0x91   :  { %vm81_vm7 = vmor %vm79_vm6, %vm80_vm5 }
  0x92   :  { %v75_v28 = vmul.f32 %v344_v24, %v74_v26  ;;  %v72_v29 = vsel %vm71_vm4, %v342_v18, %v68_v25 }
  0x93   :  { %v83_v30 = vmul.f32 %v72_v29, %v40_v0 }
  0x94   :  { %v76_v31 = vmul.f32 0.5, %v75_v28 }
  0x95   :  { %v88_v32 = vmul.f32 %v336_v27, %v83_v30 }
  0x96   :  { %v77_v33 = vsub.f32 1.5, %v76_v31 }
  0x97   :  { %v93_v34 = vmul.f32 %v88_v32, %v88_v32 }
  0x98   :  { %v78_v35 = vmul.f32 %v344_v24, %v77_v33 }
  0x99   :  { %v95_v36 = vsel %vm45_vm0, %v93_v34, 0.0 }
  0x9a   :  { %96 = vadd.xlane.f32.xlu1 %v95_v36  ;;  %v82_v37 = vsel %vm81_vm7, %v344_v24, %v78_v35 }
  0x9b   :  { %v84_v38 = vmul.f32 %v82_v37, %v41_v2 }
  0x9d   :  { %v89_v39 = vmul.f32 %v336_v27, %v84_v38 }
  0x9f   :  { %v94_v40 = vmul.f32 %v89_v39, %v89_v39 }
  0xa1   :  { %v98_v41 = vsel %vm45_vm0, %v94_v40, 0.0 }
  0xa2   :  { %99 = vadd.xlane.f32.xlu1 %v98_v41 }
 0x10d   :  { %v97_v42 = vpop.xlane.xlu1 %96 }
 0x10e   :  { %v101_v43 = vmul.f32 %v97_v42, %v58_v12 }
 0x110   :  { %v103_v44 = vadd.f32 1e-08, %v101_v43 }
 0x112   :  { %345 = vrsqrt.f32 %v103_v44  ;;  %vm111_vm9 = vweird.f32 %v103_v44 }
 0x115   :  { %v100_v45 = vpop.xlane.xlu1 %99 }
 0x116   :  { %v102_v46 = vmul.f32 %v100_v45, %v58_v12  ;;  %v187_v12 = vcvt.s32.f32 %v183_v8 }
 0x118   :  { %v346_v47 = vpop.eup %345  ;;  %v104_v48 = vadd.f32 1e-08, %v102_v46  ;;  %v190_v16 = vpack.c.bf16 %v188_v13, %v187_v12 }
 0x119   :  { %v106_v49 = vmul.f32 %v346_v47, %v103_v44  ;;  %vm112_vm8 = vweird.f32 %v346_v47 }
 0x11a   :  { %347 = vrsqrt.f32 %v104_v48  ;;  %vm113_vm10 = vmor %vm111_vm9, %vm112_vm8  ;;  %vm121_vm12 = vweird.f32 %v104_v48  ;;  %200 = vmatpush.bf16.msra.mxu0 %v190_v16 }
 0x11b   :  { %v107_v50 = vmul.f32 %v346_v47, %v106_v49 }
 0x11d   :  { %v108_v51 = vmul.f32 0.5, %v107_v50 }
 0x11e   :  { %201 = vmatpush.bf16.msra.mxu0 %v189_v17 }
 0x11f   :  { %v109_v52 = vsub.f32 1.5, %v108_v51 }
 0x120   :  { %v348_v53 = vpop.eup %347 }
 0x121   :  { %v110_v54 = vmul.f32 %v346_v47, %v109_v52  ;;  %v116_v55 = vmul.f32 %v348_v53, %v104_v48  ;;  %vm122_vm11 = vweird.f32 %v348_v53 }
 0x122   :  { %vm123_vm13 = vmor %vm121_vm12, %vm122_vm11 }
 0x123   :  { %v117_v57 = vmul.f32 %v348_v53, %v116_v55  ;;  %v114_v58 = vsel %vm113_vm10, %v346_v47, %v110_v54 }
 0x124   :  { %v125_v59 = vmul.f32 %v114_v58, %v88_v32 }
 0x125   :  { %v118_v60 = vmul.f32 0.5, %v117_v57 }
 0x126   :  { %v130_v61 = vmul.f32 %v337_v56, %v125_v59 }
 0x127   :  { %v119_v62 = vsub.f32 1.5, %v118_v60 }
 0x128   :  { %v132_v63 = vand.u32 2147483647, %v130_v61 }
 0x129   :  { %v120_v0 = vmul.f32 %v348_v53, %v119_v62 }
 0x12a   :  { %v134_v1 = vsel %vm45_vm0, %v132_v63, -inf }
 0x12b   :  { %135 = vmax.xlane.f32.xlu2 %v134_v1  ;;  %v124_v2 = vsel %vm123_vm13, %v348_v53, %v120_v0 }
 0x12c   :  { %v126_v3 = vmul.f32 %v124_v2, %v89_v39  ;;  %v338_v2 = vld [vmem:[%s483_s4] ss:$0 sm:$0xff]  ;;  %s391_s4 = smov 96  }
 0x12e   :  { %v131_v4 = vmul.f32 %v337_v56, %v126_v3 }
 0x130   :  { %v133_v5 = vand.u32 2147483647, %v131_v4 }
 0x132   :  { %v137_v6 = vsel %vm45_vm0, %v133_v5, -inf }
 0x133   :  { %138 = vmax.xlane.f32.xlu2 %v137_v6 }
 0x19e   :  { %v136_v18 = vpop.xlane.xlu2 %135 }
 0x19f   :  { %v140_v19 = vmax.f32 %v136_v18, 1e-05 }
 0x1a1   :  { %349 = vrcp.f32 %v140_v19  ;;  %v153_v25 = vand.u32 2147483648, %v140_v19  ;;  %v151_v27 = vand.u32 2147483647, %v140_v19  ;;  %vm147_vm15 = vweird.f32 %v140_v19 }
 0x1a2   :  { %v208_v1 = vmul.f32 0.007874016, %v140_v19 }
 0x1a3   :  { %v154_v30 = vor.u32 1.1754944e-38, %v153_v25  ;;  %vm152_vm2 = vcmp.eq.f32.partialorder %v151_v27, 8.507059e+37 }
 0x1a6   :  { %v139_v20 = vpop.xlane.xlu2 %138 }
 0x1a7   :  { %v350_v21 = vpop.eup %349  ;;  %v141_v22 = vmax.f32 %v139_v20, 1e-05 }
 0x1a8   :  { %v143_v23 = vmul.f32 %v350_v21, %v140_v19  ;;  %vm148_vm14 = vweird.f32 %v350_v21 }
 0x1a9   :  { %351 = vrcp.f32 %v141_v22  ;;  %vm149_vm1 = vmor %vm147_vm15, %vm148_vm14  ;;  %v168_v36 = vand.u32 2147483648, %v141_v22  ;;  %v166_v38 = vand.u32 2147483647, %v141_v22  ;;  %vm162_vm4 = vweird.f32 %v141_v22 }
 0x1aa   :  { %v144_v24 = vsub.f32 1.0, %v143_v23  ;;  %v209_v7 = vmul.f32 0.007874016, %v141_v22 }
 0x1ab   :  { %v169_v42 = vor.u32 1.1754944e-38, %v168_v36  ;;  %vm167_vm6 = vcmp.eq.f32.partialorder %v166_v38, 8.507059e+37 }
 0x1ac   :  { %v145_v26 = vmul.f32 %v350_v21, %v144_v24 }
 0x1ae   :  { %v146_v28 = vadd.f32 %v350_v21, %v145_v26 }
 0x1af   :  { %v352_v29 = vpop.eup %351 }
 0x1b0   :  { %v158_v31 = vmul.f32 %v352_v29, %v141_v22  ;;  %v150_v32 = vsel %vm149_vm1, %v350_v21, %v146_v28  ;;  %vm163_vm3 = vweird.f32 %v352_v29  ;;  %vm271_vm1 = vcmask 257024  }
 0x1b1   :  { %v155_v33 = vsel %vm152_vm2, %v154_v30, %v150_v32  ;;  %vm164_vm5 = vmor %vm162_vm4, %vm163_vm3 }
 0x1b2   :  { %v159_v34 = vsub.f32 1.0, %v158_v31  ;;  %v156_v35 = vmul.f32 127.0, %v155_v33 }
 0x1b4   :  { %v160_v37 = vmul.f32 %v352_v29, %v159_v34  ;;  %v172_v39 = vmul.f32 %v156_v35, %v130_v61 }
 0x1b6   :  { %v161_v40 = vadd.f32 %v352_v29, %v160_v37  ;;  %v316_v41 = vcvt.f32.s32 %v172_v39  ;;  %v319_v49 = vand.u32 2147483648, %v172_v39  ;;  %v314_v50 = vand.u32 2147483647, %v172_v39 }
 0x1b8   :  { %v165_v43 = vsel %vm164_vm5, %v352_v29, %v161_v40  ;;  %v317_v44 = vcvt.s32.f32 %v316_v41  ;;  %vm315_vm7 = vcmp.lt.f32.partialorder %v314_v50, 8388608.0 }
 0x1b9   :  { %v170_v45 = vsel %vm167_vm6, %v169_v42, %v165_v43 }
 0x1ba   :  { %v171_v46 = vmul.f32 127.0, %v170_v45  ;;  %v318_v47 = vand.u32 2147483647, %v317_v44 }
 0x1bc   :  { %v173_v48 = vmul.f32 %v171_v46, %v131_v4  ;;  %v320_v51 = vor.u32 %v319_v49, %v318_v47 }
 0x1be   :  { %v324_v52 = vcvt.f32.s32 %v173_v48  ;;  %v322_v54 = vand.u32 2147483647, %v173_v48  ;;  %v321_v55 = vsel %vm315_vm7, %v320_v51, %v172_v39  ;;  %v327_v57 = vand.u32 2147483648, %v173_v48 }
 0x1bf   :  { %v176_v59 = vmax.f32 %v321_v55, -128.0 }
 0x1c0   :  { %v325_v53 = vcvt.s32.f32 %v324_v52  ;;  %vm323_vm8 = vcmp.lt.f32.partialorder %v322_v54, 8388608.0 }
 0x1c1   :  { %v178_v62 = vmin.f32 %v176_v59, 127.0 }
 0x1c2   :  { %v326_v56 = vand.u32 2147483647, %v325_v53 }
 0x1c4   :  { %v328_v58 = vor.u32 %v327_v57, %v326_v56 }
 0x1c6   :  { %v329_v60 = vsel %vm323_vm8, %v328_v58, %v173_v48 }
 0x1c7   :  { %v177_v61 = vmax.f32 %v329_v60, -128.0 }
 0x1c9   :  { %v179_v63 = vmin.f32 %v177_v61, 127.0 }
 0x1cb   :  { %v180_v0 = vpack.c.bf16 %v179_v63, %v178_v62 }
 0x1cd   :  { %311 = vmatmul.msk.bf16.vlgmr.msra.gmra.mxu0 %vm45_vm0, %v180_v0 }
 0x24a   :  { %v203_v3 = vpop.f32.mrf.mxu0 }
 0x24b   :  { %v210_v4 = vmul.f32 %v208_v1, %v203_v3 }
 0x24d   :  { %v215_v5 = vmul.f32 %v338_v2, %v210_v4 }
 0x24f   :  { %v312_v6 = vmul.f32 -1.442695, %v215_v5  ;;  %v286_v39 = vpack.c.bf16 %v215_v5, %v215_v5 }
 0x251   :  { %353 = vpow2.f32 %v312_v6 }
 0x252   :  { %v205_v8 = vpop.f32.mrf.mxu0 }
 0x253   :  { %v211_v9 = vmul.f32 %v209_v7, %v205_v8 }
 0x255   :  { %v216_v10 = vmul.f32 %v338_v2, %v211_v9 }
 0x257   :  { %v354_v11 = vpop.eup %353  ;;  %v313_v12 = vmul.f32 -1.442695, %v216_v10  ;;  %v287_v43 = vpack.c.bf16 %v216_v10, %v216_v10 }
 0x258   :  { %v223_v13 = vadd.f32 1.0, %v354_v11 }
 0x259   :  { %355 = vpow2.f32 %v313_v12 }
 0x25a   :  { %357 = vrcp.f32 %v223_v13  ;;  %v236_v19 = vand.u32 2147483648, %v223_v13  ;;  %v234_v21 = vand.u32 2147483647, %v223_v13  ;;  %vm230_vm9 = vweird.f32 %v223_v13 }
 0x25c   :  { %v237_v24 = vor.u32 1.1754944e-38, %v236_v19  ;;  %vm235_vm11 = vcmp.eq.f32.partialorder %v234_v21, 8.507059e+37 }
 0x25f   :  { %v356_v14 = vpop.eup %355 }
 0x260   :  { %v358_v15 = vpop.eup %357  ;;  %v224_v16 = vadd.f32 1.0, %v356_v14 }
 0x261   :  { %v226_v17 = vmul.f32 %v358_v15, %v223_v13  ;;  %vm231_vm0 = vweird.f32 %v358_v15 }
 0x262   :  { %359 = vrcp.f32 %v224_v16  ;;  %vm232_vm10 = vmor %vm230_vm9, %vm231_vm0  ;;  %v251_v32 = vand.u32 2147483648, %v224_v16  ;;  %v249_v34 = vand.u32 2147483647, %v224_v16  ;;  %vm245_vm13 = vweird.f32 %v224_v16 }
 0x263   :  { %v227_v18 = vsub.f32 1.0, %v226_v17 }
 0x264   :  { %v252_v36 = vor.u32 1.1754944e-38, %v251_v32  ;;  %vm250_vm15 = vcmp.eq.f32.partialorder %v249_v34, 8.507059e+37 }
 0x265   :  { %v228_v20 = vmul.f32 %v358_v15, %v227_v18 }
 0x267   :  { %v229_v23 = vadd.f32 %v358_v15, %v228_v20 }
 0x268   :  { %v360_v22 = vpop.eup %359 }
 0x269   :  { %v233_v25 = vsel %vm232_vm10, %v358_v15, %v229_v23  ;;  %v241_v26 = vmul.f32 %v360_v22, %v224_v16  ;;  %vm246_vm12 = vweird.f32 %v360_v22 }
 0x26a   :  { %v238_v27 = vsel %vm235_vm11, %v237_v24, %v233_v25  ;;  %vm247_vm14 = vmor %vm245_vm13, %vm246_vm12 }
 0x26b   :  { %v274_v28 = vpack.c.bf16 %v238_v27, %v238_v27  ;;  %v257_v29 = vsub.f32 1.0, %v238_v27  ;;  %v242_v30 = vsub.f32 1.0, %v241_v26  ;;  %v255_v31 = vmul.f32 %v238_v27, %v215_v5 }
 0x26d   :  { %278 = vrot.lane.b32.xlu2 %v274_v28, %s391_s4  ;;  %261 = vrot.lane.b32.xlu0 %v257_v29, %s391_s4  ;;  %v243_v33 = vmul.f32 %v360_v22, %v242_v30 }
 0x26f   :  { %v244_v35 = vadd.f32 %v360_v22, %v243_v33 }
 0x271   :  { %v248_v37 = vsel %vm247_vm14, %v360_v22, %v244_v35 }
 0x272   :  { %v253_v38 = vsel %vm250_vm15, %v252_v36, %v248_v37 }
 0x273   :  { %v275_v40 = vpack.c.bf16 %v253_v38, %v253_v38  ;;  %v258_v41 = vsub.f32 1.0, %v253_v38  ;;  %v256_v42 = vmul.f32 %v253_v38, %v216_v10 }
 0x275   :  { %290 = vrot.lane.b32.xlu2 %v286_v39, %s392_s12  ;;  %280 = vrot.lane.b32.xlu0 %v275_v40, %s391_s4 }
 0x276   :  { %263 = vrot.lane.b32.xlu1 %v258_v41, %s391_s4 }
 0x27e   :  { %292 = vrot.lane.b32.xlu1 %v287_v43, %s392_s12 }
 0x2c7   :  { %v279_v44 = vpop.permute.xlu2 %278 }
 0x2c8   :  { %284 = vst.msk [vmem:[%s485_s6] sm:$0xf] %vm271_vm1, %v279_v44 }
 0x2cf   :  { %v291_v45 = vpop.permute.xlu2 %290 }
 0x2d0   :  { %296 = vst.msk [vmem:[%s486_s7] sm:$0xf] %vm271_vm1, %v291_v45 }
 0x2df   :  { %v262_v46 = vpop.permute.xlu0 %261 }
 0x2e0   :  { %v267_v47 = vmul.f32 %v262_v46, %v255_v31 }
 0x2e2   :  { %v269_v48 = vpack.c.bf16 %v267_v47, %v267_v47 }
 0x2e4   :  { %272 = vst.msk [vmem:[%s484_s5] sm:$0xf] %vm271_vm1, %v269_v48 }
 0x2e7   :  { %v281_v49 = vpop.permute.xlu0 %280 }
 0x2e8   :  { %285 = vst.msk [vmem:[%s485_s6 + $0x4] sm:$0xf] %vm271_vm1, %v281_v49  ;;  %v264_v50 = vpop.permute.xlu1 %263 }
 0x2e9   :  { %v268_v51 = vmul.f32 %v264_v50, %v256_v42 }
 0x2eb   :  { %v270_v52 = vpack.c.bf16 %v268_v51, %v268_v51 }
 0x2ed   :  { %273 = vst.msk [vmem:[%s484_s5 + $0x4] sm:$0xf] %vm271_vm1, %v270_v52 }
 0x2f0   :  { %v293_v53 = vpop.permute.xlu1 %292 }
 0x2f1   :  { %297 = vst.msk [vmem:[%s486_s7 + $0x4] sm:$0xf] %vm271_vm1, %v293_v53 }
 0x2f2   :  { %310 = vsyncpa [#allocation3], 1 }

// kernel: hgrn_bit_block_forward.9
= control target key start
LH: loop header
LB: loop body
LE: loop exit
PB: predicated region body
PF: predicated region fallthrough
CT: control target
= control target key end

     0   :  { %vm35_vm0 = vcmask 261120   ;;  %v311_v7 = vmov 32.0   ;;  %s420_s0 = inlined_call_operand.vmem [shape: bf16[16,32], index: 0, kind: input, shape index: {}]   ;;  %s421_s2 = inlined_call_operand.vmem [shape: f32[1,32], index: 2, kind: input, shape index: {}, may-alias: {2,3}]   ;;  %s422_s1 = inlined_call_operand.vmem [shape: bf16[16,32], index: 1, kind: input, shape index: {}]   ;;  %s423_s3 = inlined_call_operand.vmem [shape: f32[1,32], index: 3, kind: input, shape index: {}, may-alias: {2,3}]   ;;  %s424_s5 = inlined_call_operand.vmem [shape: f32[1,32], index: 5, kind: input, shape index: {}]   ;;  %s425_s4 = inlined_call_operand.vmem [shape: s8[32,32], index: 4, kind: input, shape index: {}]   ;;  %s426_s6 = inlined_call_operand.vmem [shape: bf16[16,32], index: 6, kind: output, shape index: {}]  }
   0x1   :  { %v262_v0 = vld [vmem:[%s420_s0] sm:$0xff]   ;;  %289 = vrcp.f32 %v311_v7 }
   0x2   :  { %v350_v1 = vunpack.c.l.bf16 %v262_v0  ;;  %v354_v3 = vunpack.c.h.bf16 %v262_v0  ;;  %v363_v8 = vld [vmem:[%s422_s1] sm:$0xff]  }
   0x3   :  { %v267_v9 = vunpack.c.l.bf16 %v363_v8  ;;  %v268_v13 = vunpack.c.h.bf16 %v363_v8  ;;  %v286_v48 = vld [vmem:[%s421_s2] ss:$0 sm:$0xff] }
   0x4   :  { %v33_v2 = vmul.f32 %v350_v1, %v350_v1  ;;  %v34_v5 = vmul.f32 %v354_v3, %v354_v3 }
   0x5   :  { %v258_v11 = vmul.f32 -1.442695, %v267_v9  ;;  %v259_v15 = vmul.f32 -1.442695, %v268_v13 }
   0x6   :  { %v36_v4 = vsel %vm35_vm0, %v33_v2, 0.0  ;;  %v39_v6 = vsel %vm35_vm0, %v34_v5, 0.0 }
   0x7   :  { %37 = vadd.xlane.f32.xlu0 %v36_v4  ;;  %v290_v10 = vpop.eup %289  ;;  %291 = vpow2.f32 %v258_v11 }
   0x8   :  { %v43_v12 = vmul.f32 32.0, %v290_v10  ;;  %293 = vpow2.f32 %v259_v15  ;;  %vm47_vm1 = vweird.f32 %v290_v10 }
   0xa   :  { %v44_v14 = vsub.f32 1.0, %v43_v12 }
   0xc   :  { %v45_v16 = vmul.f32 %v290_v10, %v44_v14 }
   0xd   :  { %v292_v17 = vpop.eup %291 }
   0xe   :  { %v46_v18 = vadd.f32 %v290_v10, %v45_v16  ;;  %v88_v19 = vadd.f32 1.0, %v292_v17  ;;  %v294_v21 = vpop.eup %293 }
   0xf   :  { %40 = vadd.xlane.f32.xlu0 %v39_v6  ;;  %v89_v24 = vadd.f32 1.0, %v294_v21 }
  0x10   :  { %v371_v20 = vsel %vm47_vm1, %v290_v10, %v46_v18  ;;  %295 = vrcp.f32 %v88_v19  ;;  %vm95_vm2 = vweird.f32 %v88_v19  ;;  %v101_v40 = vand.u32 2147483648, %v88_v19 }
  0x11   :  { %v99_v43 = vand.u32 2147483647, %v88_v19  ;;  %vm110_vm9 = vweird.f32 %v89_v24  ;;  %v116_v59 = vand.u32 2147483648, %v89_v24  ;;  %v114_v62 = vand.u32 2147483647, %v89_v24 }
  0x12   :  { %v102_v51 = vor.u32 1.1754944e-38, %v101_v40 }
  0x13   :  { %vm100_vm8 = vcmp.eq.f32.partialorder %v99_v43, 8.507059e+37  ;;  %v117_v2 = vor.u32 1.1754944e-38, %v116_v59  ;;  %vm115_vm15 = vcmp.eq.f32.partialorder %v114_v62, 8.507059e+37 }
  0x16   :  { %v296_v26 = vpop.eup %295 }
  0x17   :  { %v91_v27 = vmul.f32 %v296_v26, %v88_v19  ;;  %vm96_vm3 = vweird.f32 %v296_v26 }
  0x18   :  { %vm375_vm6 = vmor %vm95_vm2, %vm96_vm3 }
  0x19   :  { %v92_v32 = vsub.f32 1.0, %v91_v27 }
  0x1b   :  { %v93_v36 = vmul.f32 %v296_v26, %v92_v32 }
  0x1d   :  { %v94_v42 = vadd.f32 %v296_v26, %v93_v36 }
  0x1f   :  { %v98_v53 = vsel %vm375_vm6, %v296_v26, %v94_v42  ;;  %v123_v42 = vld [vmem:[%s425_s4] sm:$0xff] }
  0x20   :  { %v103_v58 = vsel %vm100_vm8, %v102_v51, %v98_v53  ;;  %v215_v43 = vunpack.c.2.s8 %v123_v42 }
  0x22   :  { %v219_v47 = vcvt.s32.f32 %v215_v43 }
  0x7a   :  { %v38_v22 = vpop.xlane.xlu0 %37 }
  0x7b   :  { %v49_v23 = vmul.f32 %v371_v20, %v38_v22 }
  0x7d   :  { %v51_v25 = vadd.f32 1e-06, %v49_v23 }
  0x7f   :  { %297 = vrsqrt.f32 %v51_v25  ;;  %vm59_vm5 = vweird.f32 %v51_v25 }
  0x80   :  { %299 = vrcp.f32 %v89_v24 }
  0x82   :  { %v41_v28 = vpop.xlane.xlu0 %40 }
  0x83   :  { %v50_v29 = vmul.f32 %v371_v20, %v41_v28  ;;  %v287_v28 = vld [vmem:[%s423_s3] ss:$0 sm:$0xff] }
  0x85   :  { %v298_v30 = vpop.eup %297  ;;  %v52_v31 = vadd.f32 1e-06, %v50_v29 }
  0x86   :  { %v300_v33 = vpop.eup %299  ;;  %v54_v34 = vmul.f32 %v298_v30, %v51_v25  ;;  %vm60_vm4 = vweird.f32 %v298_v30 }
  0x87   :  { %301 = vrsqrt.f32 %v52_v31  ;;  %v106_v37 = vmul.f32 %v300_v33, %v89_v24  ;;  %vm61_vm7 = vmor %vm59_vm5, %vm60_vm4  ;;  %vm111_vm10 = vweird.f32 %v300_v33  ;;  %vm69_vm12 = vweird.f32 %v52_v31 }
  0x88   :  { %v55_v35 = vmul.f32 %v298_v30, %v54_v34  ;;  %vm112_vm13 = vmor %vm110_vm9, %vm111_vm10 }
  0x89   :  { %v107_v44 = vsub.f32 1.0, %v106_v37 }
  0x8a   :  { %v56_v38 = vmul.f32 0.5, %v55_v35 }
  0x8b   :  { %v108_v54 = vmul.f32 %v300_v33, %v107_v44  ;;  %v216_v44 = vunpack.c.3.s8 %v123_v42 }
  0x8c   :  { %v57_v39 = vsub.f32 1.5, %v56_v38 }
  0x8d   :  { %v302_v41 = vpop.eup %301  ;;  %v109_v61 = vadd.f32 %v300_v33, %v108_v54 }
  0x8e   :  { %v58_v45 = vmul.f32 %v298_v30, %v57_v39  ;;  %v64_v46 = vmul.f32 %v302_v41, %v52_v31  ;;  %vm70_vm11 = vweird.f32 %v302_v41 }
  0x8f   :  { %vm71_vm14 = vmor %vm69_vm12, %vm70_vm11  ;;  %v113_v6 = vsel %vm112_vm13, %v300_v33, %v109_v61 }
  0x90   :  { %v62_v49 = vsel %vm61_vm7, %v298_v30, %v58_v45  ;;  %v65_v50 = vmul.f32 %v302_v41, %v64_v46  ;;  %v118_v11 = vsel %vm115_vm15, %v117_v2, %v113_v6  ;;  %v213_v45 = vunpack.c.0.s8 %v123_v42 }
  0x91   :  { %v73_v52 = vmul.f32 %v350_v1, %v62_v49  ;;  %v214_v46 = vunpack.c.1.s8 %v123_v42 }
  0x92   :  { %v66_v55 = vmul.f32 0.5, %v65_v50  ;;  %v217_v49 = vcvt.s32.f32 %v213_v45 }
  0x93   :  { %v78_v56 = vmul.f32 %v286_v48, %v73_v52  ;;  %v218_v50 = vcvt.s32.f32 %v214_v46 }
  0x94   :  { %v67_v57 = vsub.f32 1.5, %v66_v55 }
  0x95   :  { %v80_v60 = vmul.f32 %v267_v9, %v78_v56  ;;  %v221_v52 = vpack.c.bf16 %v218_v50, %v217_v49 }
  0x96   :  { %v68_v63 = vmul.f32 %v302_v41, %v67_v57 }
  0x97   :  { %v120_v0 = vmul.f32 %v103_v58, %v80_v60 }
  0x98   :  { %v72_v1 = vsel %vm71_vm14, %v302_v41, %v68_v63 }
  0x99   :  { %v74_v4 = vmul.f32 %v354_v3, %v72_v1  ;;  %v125_v5 = vmul.f32 %v120_v0, %v120_v0 }
  0x9b   :  { %v127_v7 = vsel %vm35_vm0, %v125_v5, 0.0  ;;  %v79_v10 = vmul.f32 %v286_v48, %v74_v4  ;;  %v220_v48 = vcvt.s32.f32 %v216_v44 }
  0x9c   :  { %128 = vadd.xlane.f32.xlu1 %v127_v7 }
  0x9d   :  { %v81_v9 = vmul.f32 %v268_v13, %v79_v10  ;;  %v222_v51 = vpack.c.bf16 %v220_v48, %v219_v47 }
  0x9f   :  { %v121_v12 = vmul.f32 %v118_v11, %v81_v9  ;;  %232 = vmatpush.bf16.msra.mxu0 %v222_v51 }
  0xa1   :  { %v126_v14 = vmul.f32 %v121_v12, %v121_v12 }
  0xa3   :  { %v130_v15 = vsel %vm35_vm0, %v126_v14, 0.0  ;;  %233 = vmatpush.bf16.msra.mxu0 %v221_v52 }
  0xa4   :  { %131 = vadd.xlane.f32.xlu1 %v130_v15 }
 0x10f   :  { %v129_v16 = vpop.xlane.xlu1 %128 }
 0x110   :  { %v133_v17 = vmul.f32 %v129_v16, %v371_v20 }
 0x112   :  { %v135_v3 = vadd.f32 1e-08, %v133_v17 }
 0x114   :  { %303 = vrsqrt.f32 %v135_v3  ;;  %vm143_vm2 = vweird.f32 %v135_v3 }
 0x117   :  { %v132_v18 = vpop.xlane.xlu1 %131 }
 0x118   :  { %v134_v19 = vmul.f32 %v132_v18, %v371_v20 }
 0x11a   :  { %v304_v21 = vpop.eup %303  ;;  %v136_v22 = vadd.f32 1e-08, %v134_v19 }
 0x11b   :  { %v138_v23 = vmul.f32 %v304_v21, %v135_v3  ;;  %vm144_vm1 = vweird.f32 %v304_v21 }
 0x11c   :  { %305 = vrsqrt.f32 %v136_v22  ;;  %vm145_vm3 = vmor %vm143_vm2, %vm144_vm1  ;;  %vm153_vm5 = vweird.f32 %v136_v22  ;;  %vm251_vm2 = vcmask 257024  }
 0x11d   :  { %v139_v24 = vmul.f32 %v304_v21, %v138_v23 }
 0x11f   :  { %v140_v8 = vmul.f32 0.5, %v139_v24 }
 0x121   :  { %v141_v13 = vsub.f32 1.5, %v140_v8 }
 0x122   :  { %v306_v25 = vpop.eup %305 }
 0x123   :  { %v142_v26 = vmul.f32 %v304_v21, %v141_v13  ;;  %v148_v27 = vmul.f32 %v306_v25, %v136_v22  ;;  %vm154_vm4 = vweird.f32 %v306_v25 }
 0x124   :  { %vm155_vm6 = vmor %vm153_vm5, %vm154_vm4 }
 0x125   :  { %v149_v29 = vmul.f32 %v306_v25, %v148_v27  ;;  %v146_v30 = vsel %vm145_vm3, %v304_v21, %v142_v26 }
 0x126   :  { %v157_v20 = vmul.f32 %v146_v30, %v120_v0 }
 0x127   :  { %v150_v31 = vmul.f32 0.5, %v149_v29 }
 0x128   :  { %v162_v32 = vmul.f32 %v287_v28, %v157_v20 }
 0x129   :  { %v151_v33 = vsub.f32 1.5, %v150_v31 }
 0x12a   :  { %v164_v34 = vand.u32 2147483647, %v162_v32 }
 0x12b   :  { %v152_v35 = vmul.f32 %v306_v25, %v151_v33 }
 0x12c   :  { %v166_v36 = vsel %vm35_vm0, %v164_v34, -inf }
 0x12d   :  { %167 = vmax.xlane.f32.xlu2 %v166_v36  ;;  %v156_v37 = vsel %vm155_vm6, %v306_v25, %v152_v35 }
 0x12e   :  { %v158_v38 = vmul.f32 %v156_v37, %v121_v12  ;;  %v288_v37 = vld [vmem:[%s424_s5] ss:$0 sm:$0xff] }
 0x130   :  { %v163_v39 = vmul.f32 %v287_v28, %v158_v38 }
 0x132   :  { %v165_v40 = vand.u32 2147483647, %v163_v39 }
 0x134   :  { %v169_v41 = vsel %vm35_vm0, %v165_v40, -inf }
 0x135   :  { %170 = vmax.xlane.f32.xlu2 %v169_v41 }
 0x1a0   :  { %v168_v53 = vpop.xlane.xlu2 %167 }
 0x1a1   :  { %v172_v54 = vmax.f32 %v168_v53, 1e-05 }
 0x1a3   :  { %307 = vrcp.f32 %v172_v54  ;;  %v185_v60 = vand.u32 2147483648, %v172_v54  ;;  %v183_v62 = vand.u32 2147483647, %v172_v54  ;;  %vm179_vm8 = vweird.f32 %v172_v54 }
 0x1a4   :  { %v240_v36 = vmul.f32 0.007874016, %v172_v54 }
 0x1a5   :  { %v186_v1 = vor.u32 1.1754944e-38, %v185_v60  ;;  %vm184_vm10 = vcmp.eq.f32.partialorder %v183_v62, 8.507059e+37 }
 0x1a8   :  { %v171_v55 = vpop.xlane.xlu2 %170 }
 0x1a9   :  { %v308_v56 = vpop.eup %307  ;;  %v402_v57 = vmax.f32 %v171_v55, 1e-05 }
 0x1aa   :  { %v175_v58 = vmul.f32 %v308_v56, %v172_v54  ;;  %vm180_vm7 = vweird.f32 %v308_v56 }
 0x1ab   :  { %309 = vrcp.f32 %v402_v57  ;;  %vm181_vm9 = vmor %vm179_vm8, %vm180_vm7  ;;  %v200_v10 = vand.u32 2147483648, %v402_v57  ;;  %v198_v9 = vand.u32 2147483647, %v402_v57  ;;  %vm194_vm12 = vweird.f32 %v402_v57 }
 0x1ac   :  { %v176_v59 = vsub.f32 1.0, %v175_v58  ;;  %v241_v42 = vmul.f32 0.007874016, %v402_v57 }
 0x1ad   :  { %v201_v16 = vor.u32 1.1754944e-38, %v200_v10  ;;  %vm199_vm14 = vcmp.eq.f32.partialorder %v198_v9, 8.507059e+37 }
 0x1ae   :  { %v177_v61 = vmul.f32 %v308_v56, %v176_v59 }
 0x1b0   :  { %v178_v63 = vadd.f32 %v308_v56, %v177_v61 }
 0x1b1   :  { %v310_v0 = vpop.eup %309 }
 0x1b2   :  { %v190_v2 = vmul.f32 %v310_v0, %v402_v57  ;;  %v182_v4 = vsel %vm181_vm9, %v308_v56, %v178_v63  ;;  %vm195_vm11 = vweird.f32 %v310_v0 }
 0x1b3   :  { %v187_v5 = vsel %vm184_vm10, %v186_v1, %v182_v4  ;;  %vm196_vm13 = vmor %vm194_vm12, %vm195_vm11 }
 0x1b4   :  { %v191_v6 = vsub.f32 1.0, %v190_v2  ;;  %v188_v7 = vmul.f32 127.0, %v187_v5 }
 0x1b6   :  { %v192_v11 = vmul.f32 %v310_v0, %v191_v6  ;;  %v204_v12 = vmul.f32 %v188_v7, %v162_v32 }
 0x1b8   :  { %v193_v14 = vadd.f32 %v310_v0, %v192_v11  ;;  %v271_v15 = vcvt.f32.s32 %v204_v12  ;;  %v274_v23 = vand.u32 2147483648, %v204_v12  ;;  %v269_v24 = vand.u32 2147483647, %v204_v12 }
 0x1ba   :  { %v197_v17 = vsel %vm196_vm13, %v310_v0, %v193_v14  ;;  %v272_v3 = vcvt.s32.f32 %v271_v15  ;;  %vm270_vm15 = vcmp.lt.f32.partialorder %v269_v24, 8388608.0 }
 0x1bb   :  { %v202_v18 = vsel %vm199_vm14, %v201_v16, %v197_v17 }
 0x1bc   :  { %v203_v19 = vmul.f32 127.0, %v202_v18  ;;  %v273_v21 = vand.u32 2147483647, %v272_v3 }
 0x1be   :  { %v205_v22 = vmul.f32 %v203_v19, %v163_v39  ;;  %v275_v8 = vor.u32 %v274_v23, %v273_v21 }
 0x1c0   :  { %v279_v13 = vcvt.f32.s32 %v205_v22  ;;  %v277_v26 = vand.u32 2147483647, %v205_v22  ;;  %v276_v27 = vsel %vm270_vm15, %v275_v8, %v204_v12  ;;  %v282_v29 = vand.u32 2147483648, %v205_v22 }
 0x1c1   :  { %v208_v20 = vmax.f32 %v276_v27, -128.0 }
 0x1c2   :  { %v280_v25 = vcvt.s32.f32 %v279_v13  ;;  %vm278_vm1 = vcmp.lt.f32.partialorder %v277_v26, 8388608.0 }
 0x1c3   :  { %v210_v33 = vmin.f32 %v208_v20, 127.0 }
 0x1c4   :  { %v281_v28 = vand.u32 2147483647, %v280_v25 }
 0x1c6   :  { %v283_v30 = vor.u32 %v282_v29, %v281_v28 }
 0x1c8   :  { %v284_v31 = vsel %vm278_vm1, %v283_v30, %v205_v22 }
 0x1c9   :  { %v209_v32 = vmax.f32 %v284_v31, -128.0 }
 0x1cb   :  { %v211_v34 = vmin.f32 %v209_v32, 127.0 }
 0x1cd   :  { %v212_v35 = vpack.c.bf16 %v211_v34, %v210_v33 }
 0x1cf   :  { %260 = vmatmul.msk.bf16.vlgmr.msra.gmra.mxu0 %vm35_vm0, %v212_v35 }
 0x24c   :  { %v235_v38 = vpop.f32.mrf.mxu0 }
 0x24d   :  { %v242_v39 = vmul.f32 %v240_v36, %v235_v38 }
 0x24f   :  { %v247_v40 = vmul.f32 %v288_v37, %v242_v39 }
 0x251   :  { %v249_v41 = vpack.c.bf16 %v247_v40, %v247_v40 }
 0x253   :  { %252 = vst.msk [vmem:[%s426_s6] sm:$0xf] %vm251_vm2, %v249_v41 }
 0x254   :  { %v237_v43 = vpop.f32.mrf.mxu0 }
 0x255   :  { %v243_v44 = vmul.f32 %v241_v42, %v237_v43 }
 0x257   :  { %v248_v45 = vmul.f32 %v288_v37, %v243_v44 }
 0x259   :  { %v250_v46 = vpack.c.bf16 %v248_v45, %v248_v45 }
 0x25b   :  { %253 = vst.msk [vmem:[%s426_s6 + $0x4] sm:$0xf] %vm251_vm2, %v250_v46 }

// kernel: hgrn_bit_block_forward.10
= control target key start
LH: loop header
LB: loop body
LE: loop exit
PB: predicated region body
PF: predicated region fallthrough
CT: control target
= control target key end

     0   :  { %s846_s30 = smov 0   ;;  %s848_s10 = smov 0   ;;  %s912_s0 = inlined_call_operand.vmem [shape: bf16[2,8,32], index: 0, kind: input, shape index: {}]   ;;  %s913_s1 = inlined_call_operand.vmem [shape: f32[2,1,32], index: 1, kind: input, shape index: {}]   ;;  %s914_s2 = inlined_call_operand.vmem [shape: f32[2,1,32], index: 2, kind: input, shape index: {}]   ;;  %s915_s3 = inlined_call_operand.vmem [shape: f32[2,8,32], index: 3, kind: input, shape index: {}]   ;;  %s916_s4 = inlined_call_operand.vmem [shape: f32[1,32], index: 4, kind: input, shape index: {}, may-alias: {4,5}]   ;;  %s917_s5 = inlined_call_operand.vmem [shape: f32[1,32], index: 5, kind: input, shape index: {}, may-alias: {4,5}]   ;;  %s918_s6 = inlined_call_operand.vmem [shape: s8[32,128], index: 6, kind: input, shape index: {}]   ;;  %s919_s7 = inlined_call_operand.vmem [shape: f32[1,128], index: 7, kind: input, shape index: {}]   ;;  %s920_s8 = inlined_call_operand.vmem [shape: bf16[2,8,128], index: 8, kind: output, shape index: {0}]   ;;  %s921_s9 = inlined_call_operand.vmem [shape: bf16[2,8,32], index: 9, kind: output, shape index: {1}]  }
   0x1   :  { %s850_s11 = smov 0  }
   0x2 LB: > { %s32_s12 = sadd.s32 1, %s789_s10  ;;  %p718_p0 = scmp.ge.s32.totalorder %s793_s11, 1  ;;  %s793_s11 = sphi %s850_s11, %s20_s11   ;;  %s789_s10 = sphi %s848_s10, %s923_s10   ;;  %s785_s30 = sphi %s846_s30, %s922_s30  }
   0x3   : > { %p34_p1 = scmp.ge.s32.totalorder %s32_s12, 2  ;;  %p340_p2 = scmp.lt.s32.totalorder %s793_s11, 3 }
   0x5   : > { %s925_s12 = smov (%p34_p1, %s32_s12), 0  ;;  %p341_p3 = pnand %p718_p0, %p340_p2 }
   0x6   : > { %p400_p4 = scmp.lt.s32.totalorder (!%p341_p3), %s785_s30, 1 }
   0x7   : > { %344 = sbr.rel (%p341_p3) target bundleno = 606 (0x25e), region = 52 }
   0xc   : > { %s927_s30 = smov (!%p400_p4, %s785_s30), 1  ;;  %vm451_vm0 = vcmask 257024   ;;  %vm455_vm1 = vcmask 261120   ;;  %v795_v13 = vmov 32.0   ;;  %v760_v29 = vld [vmem:[%s916_s4] ss:$0 sm:$0xff] }
   0xd   : > { %s864_s13 = sshll.u32 %s927_s30, 2  ;;  %s409_s16 = scalar_lea.vmem %s913_s1, %s927_s30  ;;  %763 = vrcp.f32 %v795_v13  ;;  %v761_v44 = vld [vmem:[%s917_s5] ss:$0 sm:$0xff] }
   0xe   : > { %s406_s19 = scalar_lea.vmem %s912_s0, %s864_s13  ;;  %s412_s22 = scalar_lea.vmem %s914_s2, %s927_s30  ;;  %v437_v0 = vld [vmem:[%s409_s16] sm:$0x1] }
   0xf   : > { %s720_s23 = sshll.u32 %s927_s30, 3  ;;  %v435_v1 = vld [vmem:[%s406_s19] sm:$0xf]  ;;  %v438_v2 = vadd.f32 1.0, %v437_v0  ;;  %s433_s29 = scalar_lea.vmem %s921_s9, %s864_s13 }
  0x10   : > { %v436_v3 = vunpack.c.l.bf16 %v435_v1  ;;  %s419_s26 = scalar_lea.vmem %s915_s3, %s720_s23  ;;  %v759_v5 = vld [vmem:[%s412_s22] ss:$0 sm:$0xff]  ;;  %s426_s23 = scalar_lea.vmem %s920_s8, %s864_s13 }
  0x11   : > { %v440_v4 = vperm.slane %v438_v2, 0  ;;  %v448_v7 = vld [vmem:[%s419_s26] sm:$0xff] }
  0x12   : > { %v484_v50 = vld [vmem:[%s918_s6] sm:$0xff] }
  0x13   : > { %v442_v6 = vmul.f32 %v440_v4, %v436_v3  ;;  %v764_v14 = vpop.eup %763  ;;  %v534_v51 = vunpack.c.2.s8 %v484_v50  ;;  %v535_v52 = vunpack.c.3.s8 %v484_v50  ;;  %v532_v53 = vunpack.c.0.s8 %v484_v50 }
  0x14   : > { %v460_v15 = vmul.f32 32.0, %v764_v14  ;;  %vm464_vm2 = vweird.f32 %v764_v14  ;;  %v533_v54 = vunpack.c.1.s8 %v484_v50 }
  0x15   : > { %v447_v8 = vadd.f32 %v759_v5, %v442_v6  ;;  %v538_v55 = vcvt.s32.f32 %v534_v51  ;;  %v539_v56 = vcvt.s32.f32 %v535_v52  ;;  %v536_v57 = vcvt.s32.f32 %v532_v53 }
  0x16   : > { %v461_v16 = vsub.f32 1.0, %v460_v15  ;;  %v537_v58 = vcvt.s32.f32 %v533_v54 }
  0x17   : > { %v449_v9 = vadd.f32 %v448_v7, %v447_v8  ;;  %v541_v59 = vpack.c.bf16 %v539_v56, %v538_v55 }
  0x18   : > { %v462_v17 = vmul.f32 %v764_v14, %v461_v16  ;;  %v540_v60 = vpack.c.bf16 %v537_v58, %v536_v57 }
  0x19   : > { %v454_v10 = vmul.f32 %v449_v9, %v449_v9  ;;  %v450_v11 = vpack.c.bf16 %v449_v9, %v449_v9  ;;  %551 = vmatpush.bf16.msra.mxu0 %v541_v59 }
  0x1a   : > { %v463_v18 = vadd.f32 %v764_v14, %v462_v17 }
  0x1b   : > { %v456_v12 = vsel %vm455_vm1, %v454_v10, 0.0  ;;  %452 = vst.msk [vmem:[%s433_s29] sm:$0xf] %vm451_vm0, %v450_v11 }
  0x1c   : > { %457 = vadd.xlane.f32.xlu0 %v456_v12  ;;  %v465_v19 = vsel %vm464_vm2, %v764_v14, %v463_v18 }
  0x1d   : > { %552 = vmatpush.bf16.msra.mxu0 %v540_v60 }
  0x8f   : > { %v458_v20 = vpop.xlane.xlu0 %457 }
  0x90   : > { %v466_v21 = vmul.f32 %v465_v19, %v458_v20 }
  0x92   : > { %v467_v22 = vadd.f32 1e-06, %v466_v21 }
  0x94   : > { %765 = vrsqrt.f32 %v467_v22  ;;  %vm474_vm4 = vweird.f32 %v467_v22 }
  0x9a   : > { %v766_v23 = vpop.eup %765 }
  0x9b   : > { %v469_v24 = vmul.f32 %v766_v23, %v467_v22  ;;  %vm475_vm3 = vweird.f32 %v766_v23  ;;  %v762_v22 = vld [vmem:[%s919_s7] ss:$0 sm:$0xff] }
  0x9c   : > { %vm476_vm5 = vmor %vm474_vm4, %vm475_vm3 }
  0x9d   : > { %v470_v25 = vmul.f32 %v766_v23, %v469_v24 }
  0x9f   : > { %v471_v26 = vmul.f32 0.5, %v470_v25 }
  0xa1   : > { %v472_v27 = vsub.f32 1.5, %v471_v26 }
  0xa3   : > { %v473_v28 = vmul.f32 %v766_v23, %v472_v27 }
  0xa5   : > { %v477_v30 = vsel %vm476_vm5, %v766_v23, %v473_v28 }
  0xa6   : > { %v478_v31 = vmul.f32 %v477_v30, %v449_v9 }
  0xa8   : > { %v482_v32 = vmul.f32 %v760_v29, %v478_v31 }
  0xaa   : > { %v486_v33 = vmul.f32 %v482_v32, %v482_v32 }
  0xac   : > { %v487_v34 = vsel %vm455_vm1, %v486_v33, 0.0 }
  0xad   : > { %488 = vadd.xlane.f32.xlu0 %v487_v34 }
 0x120   : > { %v489_v35 = vpop.xlane.xlu0 %488 }
 0x121   : > { %v490_v36 = vmul.f32 %v489_v35, %v465_v19 }
 0x123   : > { %v491_v37 = vadd.f32 1e-08, %v490_v36 }
 0x125   : > { %767 = vrsqrt.f32 %v491_v37  ;;  %vm498_vm7 = vweird.f32 %v491_v37 }
 0x12b   : > { %v768_v38 = vpop.eup %767 }
 0x12c   : > { %v493_v39 = vmul.f32 %v768_v38, %v491_v37  ;;  %vm499_vm6 = vweird.f32 %v768_v38 }
 0x12d   : > { %vm500_vm8 = vmor %vm498_vm7, %vm499_vm6 }
 0x12e   : > { %v494_v40 = vmul.f32 %v768_v38, %v493_v39 }
 0x130   : > { %v495_v41 = vmul.f32 0.5, %v494_v40 }
 0x132   : > { %v496_v42 = vsub.f32 1.5, %v495_v41 }
 0x134   : > { %v497_v43 = vmul.f32 %v768_v38, %v496_v42 }
 0x136   : > { %v501_v45 = vsel %vm500_vm8, %v768_v38, %v497_v43 }
 0x137   : > { %v502_v46 = vmul.f32 %v501_v45, %v482_v32 }
 0x139   : > { %v506_v47 = vmul.f32 %v761_v44, %v502_v46 }
 0x13b   : > { %v507_v48 = vand.u32 2147483647, %v506_v47 }
 0x13d   : > { %v508_v49 = vsel %vm455_vm1, %v507_v48, -inf }
 0x13e   : > { %509 = vmax.xlane.f32.xlu1 %v508_v49 }
 0x1b1   : > { %v510_v61 = vpop.xlane.xlu1 %509 }
 0x1b2   : > { %v511_v62 = vmax.f32 %v510_v61, 1e-05 }
 0x1b4   : > { %769 = vrcp.f32 %v511_v62  ;;  %v523_v2 = vand.u32 2147483648, %v511_v62  ;;  %v521_v4 = vand.u32 2147483647, %v511_v62  ;;  %vm517_vm10 = vweird.f32 %v511_v62 }
 0x1b5   : > { %v558_v21 = vmul.f32 0.007874016, %v511_v62 }
 0x1b6   : > { %v524_v6 = vor.u32 1.1754944e-38, %v523_v2  ;;  %vm522_vm12 = vcmp.eq.f32.partialorder %v521_v4, 8.507059e+37 }
 0x1ba   : > { %v770_v63 = vpop.eup %769 }
 0x1bb   : > { %v513_v0 = vmul.f32 %v770_v63, %v511_v62  ;;  %vm518_vm9 = vweird.f32 %v770_v63 }
 0x1bc   : > { %vm519_vm11 = vmor %vm517_vm10, %vm518_vm9 }
 0x1bd   : > { %v514_v1 = vsub.f32 1.0, %v513_v0 }
 0x1bf   : > { %v515_v3 = vmul.f32 %v770_v63, %v514_v1 }
 0x1c1   : > { %v516_v5 = vadd.f32 %v770_v63, %v515_v3 }
 0x1c3   : > { %v520_v7 = vsel %vm519_vm11, %v770_v63, %v516_v5 }
 0x1c4   : > { %v525_v8 = vsel %vm522_vm12, %v524_v6, %v520_v7 }
 0x1c5   : > { %v526_v9 = vmul.f32 127.0, %v525_v8 }
 0x1c7   : > { %v527_v10 = vmul.f32 %v526_v9, %v506_v47 }
 0x1c9   : > { %v728_v11 = vcvt.f32.s32 %v527_v10  ;;  %v726_v13 = vand.u32 2147483647, %v527_v10  ;;  %v731_v15 = vand.u32 2147483648, %v527_v10 }
 0x1cb   : > { %v729_v12 = vcvt.s32.f32 %v728_v11  ;;  %vm727_vm13 = vcmp.lt.f32.partialorder %v726_v13, 8388608.0 }
 0x1cd   : > { %v730_v14 = vand.u32 2147483647, %v729_v12 }
 0x1cf   : > { %v732_v16 = vor.u32 %v731_v15, %v730_v14 }
 0x1d1   : > { %v733_v17 = vsel %vm727_vm13, %v732_v16, %v527_v10 }
 0x1d2   : > { %v529_v18 = vmax.f32 %v733_v17, -128.0 }
 0x1d4   : > { %v530_v19 = vmin.f32 %v529_v18, 127.0 }
 0x1d6   : > { %v531_v20 = vpack.c.bf16 %v530_v19, %v530_v19 }
 0x1d8   : > { %723 = vmatmul.msk.bf16.vlgmr.msra.gmra.mxu0 %vm455_vm1, %v531_v20 }
 0x255   : > { %v554_v23 = vpop.f32.mrf.mxu0 }
 0x256   : > { %v559_v24 = vmul.f32 %v558_v21, %v554_v23 }
 0x258   : > { %v563_v25 = vmul.f32 %v762_v22, %v559_v24 }
 0x25a   : > { %v564_v26 = vpack.c.bf16 %v563_v25, %v563_v25 }
 0x25c   : > { %565 = vst [vmem:[%s426_s23] sm:$0xf] %v564_v26 }
 0x25d   : > { %v556_v27 = vpop.f32.mrf.mxu0 }
 0x25e PF: > { %s20_s11 = sadd.s32 1, %s793_s11   ;;  %s922_s30 = smov %s789_s10 }
 0x25f   : > { %p17_p5 = scmp.ge.s32.totalorder %s20_s11, 4   ;;  %s923_s10 = smov %s925_s12 }
 0x261   :  { %19 = sbr.rel (!%p17_p5) target bundleno = 2 (0x2), region = 103 }

// kernel: hgrn_bit_block_forward.11
= control target key start
LH: loop header
LB: loop body
LE: loop exit
PB: predicated region body
PF: predicated region fallthrough
CT: control target
= control target key end

     0   :  { %s964_s0 = inlined_call_operand.vmem [shape: bf16[2,8,128], index: 0, kind: input, shape index: {}]   ;;  %s965_s1 = inlined_call_operand.vmem [shape: f32[2,1,32], index: 1, kind: input, shape index: {}]   ;;  %s966_s2 = inlined_call_operand.vmem [shape: f32[2,1,32], index: 2, kind: input, shape index: {}]   ;;  %s967_s3 = inlined_call_operand.vmem [shape: bf16[2,8,32], index: 3, kind: input, shape index: {}]   ;;  %s968_s4 = inlined_call_operand.vmem [shape: f32[1,64], index: 4, kind: input, shape index: {}]   ;;  %s969_s5 = inlined_call_operand.vmem [shape: s8[64,32], index: 5, kind: input, shape index: {}]   ;;  %s970_s6 = inlined_call_operand.vmem [shape: f32[1,32], index: 6, kind: input, shape index: {}]   ;;  %s971_s7 = inlined_call_operand.hbm [shape: f32[2,8,32], index: 7, kind: output, shape index: {}]  }
   0x1   :  { %972 = sst [smem:[#allocation5_spill]] %s964_s0 }
   0x2   :  { %12 = vsyncpa [#allocation3], 0 }
   0x3   :  { %14 = vsyncpa [#allocation3 + $0x1], 0  ;;  %s834_s24 = smov 0   ;;  %s836_s25 = smov 0  }
   0x4   :  { %s838_s26 = smov 0   ;;  %s840_s27 = smov 0  }
   0x5   :  { %s842_s28 = smov 0   ;;  %s844_s29 = smov 0  }
   0x6 LB: > { %s620_s30 = sadd.s32 4294967295, %s790_s29   ;;  %s621_s8 = sadd.s32 4294967294, %s790_s29   ;;  %s790_s29 = sphi %s844_s29, %s20_s29   ;;  %s786_s28 = sphi %s842_s28, %s980_s28   ;;  %s782_s27 = sphi %s840_s27, %s979_s27   ;;  %s778_s26 = sphi %s838_s26, %s978_s26   ;;  %s774_s25 = sphi %s836_s25, %s977_s25   ;;  %s770_s24 = sphi %s834_s24, %s976_s24  }
   0x7   : > { %s32_s9 = sadd.s32 1, %s786_s28  ;;  %s212_s10 = sadd.s32 1, %s778_s26 }
   0x8   : > { %p34_p0 = scmp.ge.s32.totalorder %s32_s9, 2  ;;  %p222_p1 = scmp.ne.s32.totalorder %s778_s26, %s774_s25 }
   0x9   : > { %p223_p2 = scmp.eq.s32.totalorder %s620_s30, 1  ;;  %p228_p3 = scmp.ne.s32.totalorder %s774_s25, %s770_s24 }
   0xa   : > { %s982_s9 = smov (%p34_p0, %s32_s9), 0  ;;  %p229_p5 = scmp.eq.s32.totalorder %s621_s8, 1 }
   0xb   : > { %p874_p4 = por %p223_p2, %p222_p1  ;;  %s207_s12 = ssub.s32 %s786_s28, %s982_s9 }
   0xc   : > { %p624_p6 = scmp.ge.s32.totalorder %s790_s29, 1  ;;  %p210_p7 = scmp.eq.s32.totalorder %s207_s12, 0 }
   0xd   : > { %p881_p8 = por %p229_p5, %p228_p3  ;;  %p288_p9 = scmp.lt.s32.totalorder %s790_s29, 3 }
   0xe   : > { %s887_s14 = scalar_select %p210_p7, %s778_s26, %s212_s10  }
   0xf   : > { %p289_p10 = pnand %p624_p6, %p288_p9 }
  0x10   : > { %p335_p11 = scmp.lt.s32.totalorder (!%p289_p10), %s782_s27, 1  ;;  %s975_s0 = sld [smem:[#allocation5_spill]] (!%p289_p10) }
  0x11   : > { %292 = sbr.rel (%p289_p10) target bundleno = 587 (0x24b), region = 48  ;;  %s792_s20 = smov (!%p289_p10), 64  }
  0x12   : > { %s332_s8 = sand.u32 (!%p289_p10), 1, %s774_s25   ;;  %s631_s17 = sshll.u32 (!%p289_p10), %s782_s27, 3 }
  0x13   : > { %s625_s12 = sshll.u32 (!%p289_p10), %s332_s8, 3  ;;  %s732_s10 = scalar_lea.hbm (!%p289_p10), %s971_s7, 16 }
  0x16   : > { %s891_s15 = scalar_select %p335_p11, %s782_s27, 1  ;;  %vm388_vm4 = vcmask 523264   ;;  %v793_v20 = vmov 64.0   ;;  %v699_v36 = vld [vmem:[%s968_s4] ss:$0 sm:$0xff]  ;;  %v385_v42 = vld [vmem:[%s969_s5 + $0x8] sm:$0xff] }
  0x17   : > { %v384_v43 = vld [vmem:[%s969_s5] sm:$0xff]  ;;  %v447_v44 = vunpack.c.2.s8 %v385_v42  ;;  %v448_v45 = vunpack.c.3.s8 %v385_v42  ;;  %v445_v46 = vunpack.c.0.s8 %v385_v42  ;;  %v446_v47 = vunpack.c.1.s8 %v385_v42 }
  0x18   : > { %s626_s16 = sshll.u32 %s891_s15, 2  ;;  %v443_v48 = vunpack.c.2.s8 %v384_v43  ;;  %v444_v49 = vunpack.c.3.s8 %v384_v43  ;;  %v441_v55 = vunpack.c.0.s8 %v384_v43  ;;  %v442_v59 = vunpack.c.1.s8 %v384_v43  ;;  %s347_s18 = scalar_lea.vmem %s966_s2, %s891_s15 }
  0x19   : > { %s341_s19 = scalar_lea.vmem %s975_s0, %s626_s16  ;;  %v455_v50 = vcvt.s32.f32 %v447_v44  ;;  %v456_v51 = vcvt.s32.f32 %v448_v45  ;;  %v453_v52 = vcvt.s32.f32 %v445_v46  ;;  %v454_v53 = vcvt.s32.f32 %v446_v47  ;;  %s344_s21 = scalar_lea.vmem %s965_s1, %s891_s15 }
  0x1a   : > { %v356_v0 = vld [vmem:[%s341_s19] sm:$0xf]  ;;  %v451_v57 = vcvt.s32.f32 %v443_v48  ;;  %v452_v58 = vcvt.s32.f32 %v444_v49  ;;  %v449_v61 = vcvt.s32.f32 %v441_v55  ;;  %v450_v62 = vcvt.s32.f32 %v442_v59  ;;  %s354_s30 = scalar_lea.vmem %s967_s3, %s626_s16  ;;  %s334_s16 = scalar_lea.vmem [#allocation2], %s625_s12 }
  0x1b   : > { %v357_v1 = vunpack.c.l.bf16 %v356_v0  ;;  %v460_v54 = vpack.c.bf16 %v456_v51, %v455_v50  ;;  %v459_v56 = vpack.c.bf16 %v454_v53, %v453_v52  ;;  %vm497_vm14 = vcmask 261120   ;;  %s500_s0 = scalar_lea.sflag [#allocation3], %s332_s8 }
  0x1c   : > { %v458_v60 = vpack.c.bf16 %v452_v58, %v451_v57  ;;  %v457_v63 = vpack.c.bf16 %v450_v62, %v449_v61 }
  0x1d   : > { %379 = vrot.lane.b32.xlu0 %v357_v1, %s792_s20  ;;  %v628_v2 = vmul.f32 -1.442695, %v357_v1  ;;  %468 = vmatpush.bf16.msra.mxu0 %v460_v54  ;;  %s511_s20 = scalar_lea.hbm %s971_s7, %s631_s17 }
  0x1e   : > { %s515_s22 = sshll.u32 %s511_s20, 4  ;;  %s516_s22 = int_to_ptr.hbm [resolvable:$true] %s515_s22 }
  0x1f   : > { %702 = vpow2.f32 %v628_v2  ;;  %s726_s27 = sshra.s32 %s516_s22, 4  ;;  %s727_s27 = int_to_ptr.hbm [resolvable:$true] %s726_s27 }
  0x20   : > { %s728_s23 = scalar_lea.hbm %s727_s27, 8  ;;  %p733_p1 = scmp.lt.s32.totalorder %s727_s27, %s971_s7 }
  0x21   : > { %469 = vmatpush.bf16.msra.mxu0 %v459_v56  ;;  %p729_p12 = scmp.ne.s32.totalorder %s727_s27, %s728_s23  ;;  %p734_p2 = scmp.lt.s32.totalorder %s732_s10, %s728_s23 }
  0x23   : > { %p730_p13 = pnand %p729_p12, %p874_p4  ;;  %p735_p3 = por %p734_p2, %p733_p1 }
  0x25   : > { %v703_v3 = vpop.eup %702  ;;  %470 = vmatpush.bf16.msra.mxu0 %v458_v60  ;;  %p731_p0 = pneg %p730_p13 }
  0x26   : > { %v361_v4 = vadd.f32 1.0, %v703_v3 }
  0x27   : > { %p736_p5 = pnand %p735_p3, %p731_p0 }
  0x28   : > { %704 = vrcp.f32 %v361_v4  ;;  %vm367_vm0 = vweird.f32 %v361_v4  ;;  %v373_v9 = vand.u32 2147483648, %v361_v4  ;;  %v371_v11 = vand.u32 2147483647, %v361_v4 }
  0x29   : > { %706 = vrcp.f32 %v793_v20  ;;  %471 = vmatpush.bf16.msra.mxu0 %v457_v63 }
  0x2a   : > { %v374_v12 = vor.u32 1.1754944e-38, %v373_v9  ;;  %vm372_vm3 = vcmp.eq.f32.partialorder %v371_v11, 8.507059e+37 }
  0x2e   : > { %v705_v5 = vpop.eup %704 }
  0x2f   : > { %v363_v6 = vmul.f32 %v705_v5, %v361_v4  ;;  %vm368_vm1 = vweird.f32 %v705_v5  ;;  %v707_v21 = vpop.eup %706 }
  0x30   : > { %vm369_vm2 = vmor %vm367_vm0, %vm368_vm1  ;;  %v393_v22 = vmul.f32 64.0, %v707_v21  ;;  %vm397_vm5 = vweird.f32 %v707_v21 }
  0x31   : > { %v364_v7 = vsub.f32 1.0, %v363_v6 }
  0x32   : > { %v394_v23 = vsub.f32 1.0, %v393_v22 }
  0x33   : > { %v365_v8 = vmul.f32 %v705_v5, %v364_v7 }
  0x34   : > { %v395_v24 = vmul.f32 %v707_v21, %v394_v23 }
  0x35   : > { %v366_v10 = vadd.f32 %v705_v5, %v365_v8 }
  0x36   : > { %v396_v25 = vadd.f32 %v707_v21, %v395_v24  ;;  %v485_v24 = vld [vmem:[%s344_s21] sm:$0x1]  ;;  %s513_s21 = sshll.u32 %s334_s16, 4  ;;  %s514_s21 = int_to_ptr.vmem [resolvable:$true] %s513_s21 }
  0x37   : > { %v370_v13 = vsel %vm369_vm2, %v705_v5, %v366_v10 }
  0x38   : > { %v375_v14 = vsel %vm372_vm3, %v374_v12, %v370_v13  ;;  %v398_v26 = vsel %vm397_vm5, %v707_v21, %v396_v25  ;;  %v486_v25 = vadd.f32 1.0, %v485_v24 }
  0x39   : > { %v377_v15 = vmul.f32 %v375_v14, %v357_v1 }
  0x8f   : > { %v380_v16 = vpop.permute.xlu0 %379 }
  0x90   : > { %v382_v17 = vmul.f32 %v380_v16, %v377_v15 }
  0x92   : > { %v387_v18 = vmul.f32 %v382_v17, %v382_v17 }
  0x94   : > { %v389_v19 = vsel %vm388_vm4, %v387_v18, 0.0 }
  0x95   : > { %390 = vadd.xlane.f32.xlu0 %v389_v19 }
 0x108   : > { %v391_v27 = vpop.xlane.xlu0 %390 }
 0x109   : > { %v399_v28 = vmul.f32 %v398_v26, %v391_v27  ;;  %v700_v27 = vld [vmem:[%s970_s6] ss:$0 sm:$0xff] }
 0x10b   : > { %v400_v29 = vadd.f32 1e-08, %v399_v28  ;;  %v483_v28 = vld [vmem:[%s354_s30] sm:$0xf] }
 0x10d   : > { %708 = vrsqrt.f32 %v400_v29  ;;  %vm407_vm7 = vweird.f32 %v400_v29 }
 0x113   : > { %v709_v30 = vpop.eup %708 }
 0x114   : > { %v402_v31 = vmul.f32 %v709_v30, %v400_v29  ;;  %vm408_vm6 = vweird.f32 %v709_v30 }
 0x115   : > { %vm409_vm8 = vmor %vm407_vm7, %vm408_vm6 }
 0x116   : > { %v403_v32 = vmul.f32 %v709_v30, %v402_v31  ;;  %v488_v31 = vperm.slane %v486_v25, 0 }
 0x118   : > { %v404_v33 = vmul.f32 0.5, %v403_v32  ;;  %v484_v32 = vunpack.c.l.bf16 %v483_v28 }
 0x11a   : > { %v405_v34 = vsub.f32 1.5, %v404_v33 }
 0x11c   : > { %v406_v35 = vmul.f32 %v709_v30, %v405_v34 }
 0x11e   : > { %v410_v37 = vsel %vm409_vm8, %v709_v30, %v406_v35  ;;  %v701_v35 = vld [vmem:[%s347_s18] ss:$0 sm:$0xff] }
 0x11f   : > { %v411_v38 = vmul.f32 %v410_v37, %v382_v17 }
 0x121   : > { %v415_v39 = vmul.f32 %v699_v36, %v411_v38 }
 0x123   : > { %v416_v40 = vand.u32 2147483647, %v415_v39 }
 0x125   : > { %v417_v41 = vsel %vm388_vm4, %v416_v40, -inf }
 0x126   : > { %418 = vmax.xlane.f32.xlu1 %v417_v41 }
 0x199   : > { %v419_v0 = vpop.xlane.xlu1 %418 }
 0x19a   : > { %v420_v1 = vmax.f32 %v419_v0, 1e-05 }
 0x19c   : > { %710 = vrcp.f32 %v420_v1  ;;  %v432_v5 = vand.u32 2147483648, %v420_v1  ;;  %v430_v7 = vand.u32 2147483647, %v420_v1  ;;  %vm426_vm10 = vweird.f32 %v420_v1 }
 0x19d   : > { %v477_v26 = vmul.f32 0.007874016, %v420_v1 }
 0x19e   : > { %v433_v9 = vor.u32 1.1754944e-38, %v432_v5  ;;  %vm431_vm12 = vcmp.eq.f32.partialorder %v430_v7, 8.507059e+37 }
 0x1a2   : > { %v711_v2 = vpop.eup %710 }
 0x1a3   : > { %v422_v3 = vmul.f32 %v711_v2, %v420_v1  ;;  %vm427_vm9 = vweird.f32 %v711_v2 }
 0x1a4   : > { %vm428_vm11 = vmor %vm426_vm10, %vm427_vm9 }
 0x1a5   : > { %v423_v4 = vsub.f32 1.0, %v422_v3 }
 0x1a7   : > { %v424_v6 = vmul.f32 %v711_v2, %v423_v4 }
 0x1a9   : > { %v425_v8 = vadd.f32 %v711_v2, %v424_v6 }
 0x1ab   : > { %v429_v10 = vsel %vm428_vm11, %v711_v2, %v425_v8 }
 0x1ac   : > { %v434_v11 = vsel %vm431_vm12, %v433_v9, %v429_v10 }
 0x1ad   : > { %v435_v12 = vmul.f32 127.0, %v434_v11 }
 0x1af   : > { %v436_v13 = vmul.f32 %v435_v12, %v415_v39 }
 0x1b1   : > { %v636_v14 = vcvt.f32.s32 %v436_v13  ;;  %v634_v16 = vand.u32 2147483647, %v436_v13  ;;  %v639_v18 = vand.u32 2147483648, %v436_v13 }
 0x1b3   : > { %v637_v15 = vcvt.s32.f32 %v636_v14  ;;  %vm635_vm13 = vcmp.lt.f32.partialorder %v634_v16, 8388608.0 }
 0x1b5   : > { %v638_v17 = vand.u32 2147483647, %v637_v15 }
 0x1b7   : > { %v640_v19 = vor.u32 %v639_v18, %v638_v17 }
 0x1b9   : > { %v641_v20 = vsel %vm635_vm13, %v640_v19, %v436_v13 }
 0x1ba   : > { %v438_v21 = vmax.f32 %v641_v20, -128.0 }
 0x1bc   : > { %v439_v22 = vmin.f32 %v438_v21, 127.0 }
 0x1be   : > { %v440_v23 = vpack.c.bf16 %v439_v22, %v439_v22 }
 0x1c0   : > { %629 = vmatmul.msk.bf16.vlgmr.msra.gmra.mxu0 %vm388_vm4, %v440_v23 }
 0x23d   : > { %v473_v29 = vpop.f32.mrf.mxu0 }
 0x23e   : > { %v478_v30 = vmul.f32 %v477_v26, %v473_v29 }
 0x240   : > { %v482_v33 = vmul.f32 %v700_v27, %v478_v30 }
 0x242   : > { %v490_v34 = vmul.f32 %v488_v31, %v482_v33 }
 0x244   : > { %v491_v36 = vadd.f32 %v490_v34, %v484_v32 }
 0x245   : > { %v475_v37 = vpop.f32.mrf.mxu0 }
 0x246   : > { %v496_v38 = vadd.f32 %v701_v35, %v491_v36 }
 0x248   : > { %498 = vst.msk [vmem:[%s334_s16] sm:$0xff] %vm497_vm14, %v496_v38 }
 0x249   : > { %739 = shalt.err (!%p736_p5)
}
 0x24a   : > { %642 = dma.vmem_to_hbm [thread:$0]  (%p874_p4), %s514_s21, 128, %s516_s22, %s500_s0  }
 0x24b PF: > { %p648_p6 = scmp.ge.s32.totalorder %s790_s29, 2  ;;  %s527_s8 = sand.u32 1, %s770_s24  }
 0x24c   : > { %s528_s15 = scalar_lea.sflag [#allocation3], %s527_s8 }
 0x24d   : > { %p645_p7 = pnand %p648_p6, %p881_p8 }
 0x24f   : > { %p646_p9 = pneg %p645_p7 }
 0x251   : > { %765 = dma.done.wait (%p646_p9), %s528_s15, 128  }
 0x252   : > { %767 = vsyncadd (%p646_p9), %s528_s15, 4294967168  ;;  %s20_s29 = sadd.s32 1, %s790_s29   ;;  %s976_s24 = smov %s774_s25 }
 0x253   : > { %p17_p10 = scmp.ge.s32.totalorder %s20_s29, 4   ;;  %s977_s25 = smov %s778_s26 }
 0x254   : > { %s978_s26 = smov %s887_s14  ;;  %s979_s27 = smov %s786_s28 }
 0x255   : > { %s980_s28 = smov %s982_s9  ;;  %19 = sbr.rel (!%p17_p10) target bundleno = 6 (0x6), region = 92 }
 0x25a   :  { %534 = vsyncpa [#allocation3], 1 }
 0x25b   :  { %536 = vsyncpa [#allocation3 + $0x1], 1 }

// kernel: hgrn_bit_block_forward.6
= control target key start
LH: loop header
LB: loop body
LE: loop exit
PB: predicated region body
PF: predicated region fallthrough
CT: control target
= control target key end

     0   :  { %vm78_vm0 = vcmask 254976   ;;  %v839_v3 = vmov 32.0   ;;  %vm141_vm15 = vcmask 261120   ;;  %s840_s29 = smov 64   ;;  %s1153_s0 = inlined_call_operand.vmem [shape: f32[2,32], index: 0, kind: input, shape index: {}]   ;;  %s1154_s11 = inlined_call_operand.vmem [shape: f32[1,32], index: 11, kind: input, shape index: {}, may-alias: {1,11}]   ;;  %s1155_s1 = inlined_call_operand.vmem [shape: f32[1,32], index: 1, kind: input, shape index: {}, may-alias: {1,11}]   ;;  %s1156_s3 = inlined_call_operand.vmem [shape: f32[1,128], index: 3, kind: input, shape index: {}]   ;;  %s1157_s2 = inlined_call_operand.vmem [shape: s8[32,128], index: 2, kind: input, shape index: {}]   ;;  %s1158_s12 = inlined_call_operand.vmem [shape: s8[32,128], index: 12, kind: input, shape index: {}]   ;;  %s1159_s13 = inlined_call_operand.vmem [shape: f32[1,128], index: 13, kind: input, shape index: {}]   ;;  %s1160_s14 = inlined_call_operand.vmem [shape: f32[1,64], index: 14, kind: input, shape index: {}, may-alias: {4,7,8,14,17,18}]   ;;  %s1161_s4 = inlined_call_operand.vmem [shape: f32[1,64], index: 4, kind: input, shape index: {}, may-alias: {4,7,8,14,17,18}]   ;;  %s1162_s6 = inlined_call_operand.vmem [shape: f32[1,64], index: 6, kind: input, shape index: {}]   ;;  %s1163_s5 = inlined_call_operand.vmem [shape: s8[64,64], index: 5, kind: input, shape index: {}]   ;;  %s1164_s15 = inlined_call_operand.vmem [shape: s8[64,64], index: 15, kind: input, shape index: {}]   ;;  %s1165_s16 = inlined_call_operand.vmem [shape: f32[1,64], index: 16, kind: input, shape index: {}]   ;;  %s1166_s7 = inlined_call_operand.vmem [shape: f32[1,64], index: 7, kind: input, shape index: {}, may-alias: {4,7,8,14,17,18}]   ;;  %s1167_s17 = inlined_call_operand.vmem [shape: f32[1,64], index: 17, kind: input, shape index: {}, may-alias: {4,7,8,14,17,18}]   ;;  %s1168_s8 = inlined_call_operand.vmem [shape: f32[1,64], index: 8, kind: input, shape index: {}, may-alias: {4,7,8,14,17,18}]   ;;  %s1169_s18 = inlined_call_operand.vmem [shape: f32[1,64], index: 18, kind: input, shape index: {}, may-alias: {4,7,8,14,17,18}]   ;;  %s1170_s10 = inlined_call_operand.vmem [shape: f32[1,64], index: 10, kind: input, shape index: {}]   ;;  %s1171_s9 = inlined_call_operand.vmem [shape: s8[64,64], index: 9, kind: input, shape index: {}]   ;;  %s1172_s19 = inlined_call_operand.vmem [shape: s8[64,64], index: 19, kind: input, shape index: {}]   ;;  %s1173_s20 = inlined_call_operand.vmem [shape: f32[1,64], index: 20, kind: input, shape index: {}]   ;;  %s1174_s21 = inlined_call_operand.vmem [shape: f32[2,32], index: 21, kind: output, shape index: {0}]   ;;  %s1175_s23 = inlined_call_operand.vmem [shape: f32[2,32], index: 23, kind: output, shape index: {2}]   ;;  %s1176_s24 = inlined_call_operand.vmem [shape: f32[2,32], index: 24, kind: output, shape index: {3}]   ;;  %s1177_s22 = inlined_call_operand.vmem [shape: f32[2,32], index: 22, kind: output, shape index: {1}]  }
   0x1   :  { %1178 = sst [smem:[#allocation2_spill]] %s1153_s0  ;;  %801 = vrcp.f32 %v839_v3 }
   0x2   :  { %1179 = sst [smem:[#allocation3_spill]] %s1154_s11 }
   0x3   :  { %1180 = sst [smem:[#allocation4_spill]] %s1155_s1 }
   0x4   :  { %1181 = sst [smem:[#allocation5_spill]] %s1156_s3 }
   0x5   :  { %1182 = sst [smem:[#allocation6_spill]] %s1157_s2 }
   0x6   :  { %1183 = sst [smem:[#allocation7_spill]] %s1158_s12 }
   0x7   :  { %1184 = sst [smem:[#allocation8_spill]] %s1159_s13  ;;  %v802_v4 = vpop.eup %801  ;;  %s842_s13 = smov 96  }
   0x8   :  { %1185 = sst [smem:[#allocation9_spill]] %s1160_s14  ;;  %v83_v5 = vmul.f32 32.0, %v802_v4  ;;  %vm87_vm1 = vweird.f32 %v802_v4 }
   0x9   :  { %1186 = sst [smem:[#allocation10_spill]] %s1161_s4 }
   0xa   :  { %s1187_s27 = sld [smem:[#allocation2_spill]]  ;;  %v84_v6 = vsub.f32 1.0, %v83_v5 }
   0xb   :  { %s1188_s1 = sld [smem:[#allocation3_spill]] }
   0xc   :  { %v85_v7 = vmul.f32 %v802_v4, %v84_v6  ;;  %s1189_s14 = sld [smem:[#allocation4_spill]] }
   0xd   :  { %s1190_s25 = sld [smem:[#allocation6_spill]] }
   0xe   :  { %v86_v8 = vadd.f32 %v802_v4, %v85_v7  ;;  %s1191_s11 = sld [smem:[#allocation7_spill]] }
   0xf   :  { %s1194_s30 = sld [smem:[#allocation10_spill]] }
  0x10   :  { %v73_v0 = vld [vmem:[%s1187_s27] sm:$0x3]  ;;  %v88_v9 = vsel %vm87_vm1, %v802_v4, %v86_v8  ;;  %s1192_s27 = sld [smem:[#allocation5_spill]] }
  0x11   :  { %v77_v1 = vmul.f32 %v73_v0, %v73_v0  ;;  %v787_v19 = vld [vmem:[%s1188_s1] ss:$0 sm:$0xff]  ;;  %s1193_s1 = sld [smem:[#allocation8_spill]] }
  0x12   :  { %v788_v20 = vld [vmem:[%s1189_s14] ss:$0 sm:$0xff]  ;;  %s1195_s4 = sld [smem:[#allocation9_spill]] }
  0x13   :  { %v79_v2 = vsel %vm78_vm0, %v77_v1, 0.0  ;;  %v75_v29 = vld [vmem:[%s1190_s25] sm:$0xff] }
  0x14   :  { %80 = vadd.xlane.f32.xlu0 %v79_v2  ;;  %v411_v30 = vld [vmem:[%s1191_s11] sm:$0xff]  ;;  %v133_v31 = vunpack.c.2.s8 %v75_v29  ;;  %v134_v32 = vunpack.c.3.s8 %v75_v29  ;;  %v131_v35 = vunpack.c.0.s8 %v75_v29  ;;  %v132_v36 = vunpack.c.1.s8 %v75_v29 }
  0x15   :  { %v444_v33 = vunpack.c.2.s8 %v411_v30  ;;  %v445_v34 = vunpack.c.3.s8 %v411_v30  ;;  %v442_v37 = vunpack.c.0.s8 %v411_v30  ;;  %v443_v38 = vunpack.c.1.s8 %v411_v30 }
  0x16   :  { %v137_v39 = vcvt.s32.f32 %v133_v31  ;;  %v138_v40 = vcvt.s32.f32 %v134_v32  ;;  %v135_v43 = vcvt.s32.f32 %v131_v35  ;;  %v136_v44 = vcvt.s32.f32 %v132_v36  ;;  %v789_v36 = vld [vmem:[%s1192_s27] ss:$0 sm:$0xff] }
  0x17   :  { %v448_v41 = vcvt.s32.f32 %v444_v33  ;;  %v449_v42 = vcvt.s32.f32 %v445_v34  ;;  %v446_v45 = vcvt.s32.f32 %v442_v37  ;;  %v447_v46 = vcvt.s32.f32 %v443_v38 }
  0x18   :  { %v140_v47 = vpack.c.bf16 %v138_v40, %v137_v39  ;;  %v139_v49 = vpack.c.bf16 %v136_v44, %v135_v43 }
  0x19   :  { %v451_v48 = vpack.c.bf16 %v449_v42, %v448_v41  ;;  %v450_v50 = vpack.c.bf16 %v447_v46, %v446_v45  ;;  %v790_v41 = vld [vmem:[%s1193_s1] ss:$0 sm:$0xff] }
  0x1a   :  { %151 = vmatpush.bf16.msra.mxu0 %v140_v47 }
  0x1b   :  { %461 = vmatpush.bf16.msra.mxu3 %v451_v48 }
  0x1e   :  { %152 = vmatpush.bf16.msra.mxu0 %v139_v49 }
  0x1f   :  { %462 = vmatpush.bf16.msra.mxu3 %v450_v50 }
  0x87   :  { %v81_v10 = vpop.xlane.xlu0 %80 }
  0x88   :  { %v89_v11 = vmul.f32 %v88_v9, %v81_v10 }
  0x8a   :  { %v90_v12 = vadd.f32 1e-08, %v89_v11 }
  0x8c   :  { %803 = vrsqrt.f32 %v90_v12  ;;  %vm97_vm3 = vweird.f32 %v90_v12 }
  0x92   :  { %v804_v13 = vpop.eup %803 }
  0x93   :  { %v92_v14 = vmul.f32 %v804_v13, %v90_v12  ;;  %vm98_vm2 = vweird.f32 %v804_v13 }
  0x94   :  { %vm99_vm4 = vmor %vm97_vm3, %vm98_vm2 }
  0x95   :  { %v93_v15 = vmul.f32 %v804_v13, %v92_v14 }
  0x97   :  { %v94_v16 = vmul.f32 0.5, %v93_v15 }
  0x99   :  { %v95_v17 = vsub.f32 1.5, %v94_v16 }
  0x9b   :  { %v96_v18 = vmul.f32 %v804_v13, %v95_v17 }
  0x9d   :  { %v100_v21 = vsel %vm99_vm4, %v804_v13, %v96_v18 }
  0x9e   :  { %v101_v22 = vmul.f32 %v100_v21, %v73_v0 }
  0xa0   :  { %v978_v23 = vmul.f32 %v787_v19, %v101_v22  ;;  %v980_v24 = vmul.f32 %v788_v20, %v101_v22 }
  0xa2   :  { %v417_v25 = vand.u32 2147483647, %v978_v23  ;;  %v106_v26 = vand.u32 2147483647, %v980_v24 }
  0xa4   :  { %v418_v27 = vsel %vm78_vm0, %v417_v25, -inf  ;;  %v107_v28 = vsel %vm78_vm0, %v106_v26, -inf }
  0xa5   :  { %419 = vmax.xlane.f32.xlu0 %v418_v27  ;;  %108 = vmax.xlane.f32.xlu1 %v107_v28 }
 0x118   :  { %v420_v51 = vpop.xlane.xlu0 %419  ;;  %v109_v52 = vpop.xlane.xlu1 %108 }
 0x119   :  { %v992_v53 = vmax.f32 %v420_v51, 1e-05  ;;  %v110_v54 = vmax.f32 %v109_v52, 1e-05 }
 0x11b   :  { %805 = vrcp.f32 %v992_v53  ;;  %v433_v60 = vand.u32 2147483648, %v992_v53  ;;  %v122_v63 = vand.u32 2147483648, %v110_v54  ;;  %v431_v0 = vand.u32 2147483647, %v992_v53 }
 0x11c   :  { %807 = vrcp.f32 %v110_v54  ;;  %v120_v2 = vand.u32 2147483647, %v110_v54  ;;  %vm427_vm7 = vweird.f32 %v992_v53  ;;  %vm116_vm9 = vweird.f32 %v110_v54 }
 0x11d   :  { %v434_v4 = vor.u32 1.1754944e-38, %v433_v60  ;;  %v123_v6 = vor.u32 1.1754944e-38, %v122_v63  ;;  %vm432_vm11 = vcmp.eq.f32.partialorder %v431_v0, 8.507059e+37  ;;  %v158_v35 = vmul.f32 0.007874016, %v110_v54 }
 0x11e   :  { %vm121_vm12 = vcmp.eq.f32.partialorder %v120_v2, 8.507059e+37  ;;  %v468_v40 = vmul.f32 0.007874016, %v992_v53 }
 0x121   :  { %v806_v55 = vpop.eup %805 }
 0x122   :  { %v808_v56 = vpop.eup %807  ;;  %v423_v57 = vmul.f32 %v806_v55, %v992_v53  ;;  %vm428_vm5 = vweird.f32 %v806_v55 }
 0x123   :  { %v112_v58 = vmul.f32 %v808_v56, %v110_v54  ;;  %vm117_vm6 = vweird.f32 %v808_v56  ;;  %vm429_vm8 = vmor %vm427_vm7, %vm428_vm5  ;;  %vm194_vm5 = vcmask 517120  }
 0x124   :  { %v424_v59 = vsub.f32 1.0, %v423_v57  ;;  %vm118_vm10 = vmor %vm116_vm9, %vm117_vm6 }
 0x125   :  { %v113_v61 = vsub.f32 1.0, %v112_v58 }
 0x126   :  { %v425_v62 = vmul.f32 %v806_v55, %v424_v59 }
 0x127   :  { %v114_v1 = vmul.f32 %v808_v56, %v113_v61 }
 0x128   :  { %v426_v3 = vadd.f32 %v806_v55, %v425_v62 }
 0x129   :  { %v115_v5 = vadd.f32 %v808_v56, %v114_v1 }
 0x12a   :  { %v430_v7 = vsel %vm429_vm8, %v806_v55, %v426_v3 }
 0x12b   :  { %v119_v8 = vsel %vm118_vm10, %v808_v56, %v115_v5  ;;  %v435_v9 = vsel %vm432_vm11, %v434_v4, %v430_v7 }
 0x12c   :  { %v124_v10 = vsel %vm121_vm12, %v123_v6, %v119_v8  ;;  %v436_v11 = vmul.f32 127.0, %v435_v9 }
 0x12d   :  { %v125_v12 = vmul.f32 127.0, %v124_v10 }
 0x12e   :  { %v437_v13 = vmul.f32 %v436_v11, %v978_v23 }
 0x12f   :  { %v126_v14 = vmul.f32 %v125_v12, %v980_v24 }
 0x130   :  { %v761_v15 = vcvt.f32.s32 %v437_v13  ;;  %v759_v19 = vand.u32 2147483647, %v437_v13  ;;  %v764_v22 = vand.u32 2147483648, %v437_v13 }
 0x131   :  { %v737_v16 = vcvt.f32.s32 %v126_v14  ;;  %v735_v20 = vand.u32 2147483647, %v126_v14  ;;  %v740_v26 = vand.u32 2147483648, %v126_v14 }
 0x132   :  { %v762_v17 = vcvt.s32.f32 %v761_v15  ;;  %vm760_vm13 = vcmp.lt.f32.partialorder %v759_v19, 8388608.0  ;;  %v841_v19 = vmov 64.0  }
 0x133   :  { %v738_v18 = vcvt.s32.f32 %v737_v16  ;;  %vm736_vm14 = vcmp.lt.f32.partialorder %v735_v20, 8388608.0 }
 0x134   :  { %v763_v21 = vand.u32 2147483647, %v762_v17 }
 0x135   :  { %v739_v25 = vand.u32 2147483647, %v738_v18 }
 0x136   :  { %v765_v27 = vor.u32 %v764_v22, %v763_v21 }
 0x137   :  { %v741_v28 = vor.u32 %v740_v26, %v739_v25 }
 0x138   :  { %v766_v29 = vsel %vm760_vm13, %v765_v27, %v437_v13 }
 0x139   :  { %v742_v30 = vsel %vm736_vm14, %v741_v28, %v126_v14  ;;  %v439_v31 = vmax.f32 %v766_v29, -128.0 }
 0x13a   :  { %v128_v23 = vmax.f32 %v742_v30, -128.0 }
 0x13b   :  { %v440_v32 = vmin.f32 %v439_v31, 127.0 }
 0x13c   :  { %v129_v24 = vmin.f32 %v128_v23, 127.0 }
 0x13d   :  { %v441_v33 = vpack.c.bf16 %v440_v32, %v440_v32 }
 0x13e   :  { %v130_v34 = vpack.c.bf16 %v129_v24, %v129_v24 }
 0x13f   :  { %731 = vmatmul.msk.bf16.vlgmr.msra.gmra.mxu3 %vm141_vm15, %v441_v33 }
 0x140   :  { %727 = vmatmul.msk.bf16.vlgmr.msra.gmra.mxu0 %vm141_vm15, %v130_v34 }
 0x1bd   :  { %v154_v37 = vpop.f32.mrf.mxu0 }
 0x1be   :  { %v159_v38 = vmul.f32 %v158_v35, %v154_v37 }
 0x1c0   :  { %v163_v39 = vmul.f32 %v789_v36, %v159_v38 }
 0x1c2   :  { %185 = vrot.lane.b32.xlu1 %v163_v39, %s840_s29  ;;  %v464_v42 = vpop.f32.mrf.mxu3  ;;  %v728_v61 = vmul.f32 -1.442695, %v163_v39 }
 0x1c3   :  { %v469_v43 = vmul.f32 %v468_v40, %v464_v42 }
 0x1c5   :  { %v473_v44 = vmul.f32 %v790_v41, %v469_v43  ;;  %v156_v45 = vpop.f32.mrf.mxu0 }
 0x1c7   :  { %v732_v46 = vmul.f32 -1.442695, %v473_v44  ;;  %495 = vrot.lane.b32.xlu2 %v473_v44, %s840_s29 }
 0x1c9   :  { %809 = vpow2.f32 %v732_v46 }
 0x1ca   :  { %v466_v47 = vpop.f32.mrf.mxu3 }
 0x1cf   :  { %v810_v48 = vpop.eup %809 }
 0x1d0   :  { %v477_v49 = vadd.f32 1.0, %v810_v48 }
 0x1d2   :  { %811 = vrcp.f32 %v477_v49  ;;  %v489_v53 = vand.u32 2147483648, %v477_v49  ;;  %v487_v55 = vand.u32 2147483647, %v477_v49  ;;  %vm483_vm2 = vweird.f32 %v477_v49 }
 0x1d3   :  { %813 = vpow2.f32 %v728_v61 }
 0x1d4   :  { %v490_v57 = vor.u32 1.1754944e-38, %v489_v53  ;;  %vm488_vm4 = vcmp.eq.f32.partialorder %v487_v55, 8.507059e+37 }
 0x1d8   :  { %v812_v50 = vpop.eup %811 }
 0x1d9   :  { %v479_v51 = vmul.f32 %v812_v50, %v477_v49  ;;  %vm484_vm1 = vweird.f32 %v812_v50  ;;  %v814_v62 = vpop.eup %813 }
 0x1da   :  { %vm485_vm3 = vmor %vm483_vm2, %vm484_vm1  ;;  %v167_v63 = vadd.f32 1.0, %v814_v62 }
 0x1db   :  { %v480_v52 = vsub.f32 1.0, %v479_v51 }
 0x1dc   :  { %815 = vrcp.f32 %v167_v63  ;;  %v179_v9 = vand.u32 2147483648, %v167_v63  ;;  %vm173_vm7 = vweird.f32 %v167_v63  ;;  %v177_v10 = vand.u32 2147483647, %v167_v63 }
 0x1dd   :  { %v481_v54 = vmul.f32 %v812_v50, %v480_v52  ;;  %817 = vrcp.f32 %v841_v19 }
 0x1de   :  { %v180_v12 = vor.u32 1.1754944e-38, %v179_v9  ;;  %vm178_vm9 = vcmp.eq.f32.partialorder %v177_v10, 8.507059e+37 }
 0x1df   :  { %v482_v56 = vadd.f32 %v812_v50, %v481_v54 }
 0x1e1   :  { %v486_v58 = vsel %vm485_vm3, %v812_v50, %v482_v56  ;;  %v792_v50 = vld [vmem:[%s1195_s4] ss:$0 sm:$0xff]  ;;  %v191_v56 = vld [vmem:[%s1163_s5 + $0x8] sm:$0xff] }
 0x1e2   :  { %v491_v59 = vsel %vm488_vm4, %v490_v57, %v486_v58  ;;  %v816_v0 = vpop.eup %815  ;;  %v253_v57 = vunpack.c.2.s8 %v191_v56  ;;  %v254_v58 = vunpack.c.3.s8 %v191_v56  ;;  %v251_v62 = vunpack.c.0.s8 %v191_v56 }
 0x1e3   :  { %v493_v60 = vmul.f32 %v491_v59, %v473_v44  ;;  %v169_v1 = vmul.f32 %v816_v0, %v167_v63  ;;  %vm174_vm6 = vweird.f32 %v816_v0  ;;  %v818_v20 = vpop.eup %817  ;;  %v791_v44 = vld [vmem:[%s1194_s30] ss:$0 sm:$0xff]  ;;  %v252_v63 = vunpack.c.1.s8 %v191_v56 }
 0x1e4   :  { %vm175_vm8 = vmor %vm173_vm7, %vm174_vm6  ;;  %v199_v21 = vmul.f32 64.0, %v818_v20  ;;  %vm203_vm10 = vweird.f32 %v818_v20  ;;  %v261_v59 = vcvt.s32.f32 %v253_v57 }
 0x1e5   :  { %v170_v3 = vsub.f32 1.0, %v169_v1  ;;  %v501_v1 = vld [vmem:[%s1164_s15 + $0x8] sm:$0xff] }
 0x1e6   :  { %v200_v22 = vsub.f32 1.0, %v199_v21  ;;  %v554_v19 = vunpack.c.1.s8 %v501_v1 }
 0x1e7   :  { %v171_v6 = vmul.f32 %v816_v0, %v170_v3  ;;  %v260_v3 = vcvt.s32.f32 %v252_v63 }
 0x1e8   :  { %v201_v25 = vmul.f32 %v818_v20, %v200_v22  ;;  %v562_v22 = vcvt.s32.f32 %v554_v19 }
 0x1e9   :  { %v172_v8 = vadd.f32 %v816_v0, %v171_v6  ;;  %v555_v6 = vunpack.c.2.s8 %v501_v1 }
 0x1ea   :  { %v202_v26 = vadd.f32 %v818_v20, %v201_v25 }
 0x1eb   :  { %v176_v11 = vsel %vm175_vm8, %v816_v0, %v172_v8  ;;  %v190_v0 = vld [vmem:[%s1163_s5] sm:$0xff] }
 0x1ec   :  { %v181_v13 = vsel %vm178_vm9, %v180_v12, %v176_v11  ;;  %v1014_v27 = vsel %vm203_vm10, %v818_v20, %v202_v26  ;;  %v247_v8 = vunpack.c.0.s8 %v190_v0  ;;  %v248_v9 = vunpack.c.1.s8 %v190_v0 }
 0x1ed   :  { %v183_v14 = vmul.f32 %v181_v13, %v163_v39  ;;  %v553_v13 = vunpack.c.0.s8 %v501_v1 }
 0x1ef   :  { %v561_v20 = vcvt.s32.f32 %v553_v13 }
 0x221   :  { %v496_v2 = vpop.permute.xlu2 %495 }
 0x222   :  { %v1008_v4 = vmul.f32 %v496_v2, %v493_v60  ;;  %v262_v60 = vcvt.s32.f32 %v254_v58  ;;  %v259_v2 = vcvt.s32.f32 %v251_v62 }
 0x224   :  { %v503_v5 = vmul.f32 %v1008_v4, %v1008_v4  ;;  %v266_v61 = vpack.c.bf16 %v262_v60, %v261_v59  ;;  %v265_v10 = vpack.c.bf16 %v260_v3, %v259_v2 }
 0x226   :  { %v504_v7 = vsel %vm194_vm5, %v503_v5, 0.0  ;;  %275 = vmatpush.bf16.msra.mxu1 %v266_v61  ;;  %v250_v5 = vunpack.c.3.s8 %v190_v0 }
 0x227   :  { %505 = vadd.xlane.f32.xlu0 %v504_v7  ;;  %v556_v7 = vunpack.c.3.s8 %v501_v1 }
 0x228   :  { %v258_v12 = vcvt.s32.f32 %v250_v5 }
 0x22a   :  { %276 = vmatpush.bf16.msra.mxu1 %v265_v10 }
 0x234   :  { %v186_v15 = vpop.permute.xlu1 %185 }
 0x235   :  { %v188_v16 = vmul.f32 %v186_v15, %v183_v14  ;;  %v563_v14 = vcvt.s32.f32 %v555_v6  ;;  %v564_v15 = vcvt.s32.f32 %v556_v7 }
 0x237   :  { %v193_v17 = vmul.f32 %v188_v16, %v188_v16  ;;  %v568_v21 = vpack.c.bf16 %v564_v15, %v563_v14 }
 0x239   :  { %v195_v18 = vsel %vm194_vm5, %v193_v17, 0.0  ;;  %576 = vmatpush.bf16.msrb.mxu0 %v568_v21 }
 0x23a   :  { %196 = vadd.xlane.f32.xlu2 %v195_v18  ;;  %v256_v18 = vcvt.s32.f32 %v248_v9 }
 0x29a   :  { %v506_v28 = vpop.xlane.xlu0 %505 }
 0x29b   :  { %v507_v29 = vmul.f32 %v506_v28, %v1014_v27 }
 0x29d   :  { %v508_v30 = vadd.f32 1e-08, %v507_v29  ;;  %v567_v29 = vpack.c.bf16 %v562_v22, %v561_v20  ;;  %v793_v22 = vld [vmem:[%s1162_s6] ss:$0 sm:$0xff] }
 0x29f   :  { %819 = vrsqrt.f32 %v508_v30  ;;  %vm515_vm13 = vweird.f32 %v508_v30  ;;  %577 = vmatpush.bf16.msrb.mxu0 %v567_v29 }
 0x2a5   :  { %v820_v31 = vpop.eup %819 }
 0x2a6   :  { %v510_v24 = vmul.f32 %v820_v31, %v508_v30  ;;  %vm516_vm11 = vweird.f32 %v820_v31  ;;  %v500_v30 = vld [vmem:[%s1164_s15] sm:$0xff] }
 0x2a7   :  { %vm517_vm14 = vmor %vm515_vm13, %vm516_vm11 }
 0x2a8   :  { %v511_v34 = vmul.f32 %v820_v31, %v510_v24 }
 0x2aa   :  { %v512_v35 = vmul.f32 0.5, %v511_v34  ;;  %v550_v34 = vunpack.c.1.s8 %v500_v30 }
 0x2ac   :  { %v513_v38 = vsub.f32 1.5, %v512_v35 }
 0x2ad   :  { %v197_v23 = vpop.xlane.xlu2 %196 }
 0x2ae   :  { %v205_v32 = vmul.f32 %v1014_v27, %v197_v23  ;;  %v514_v41 = vmul.f32 %v820_v31, %v513_v38  ;;  %v552_v23 = vunpack.c.3.s8 %v500_v30 }
 0x2b0   :  { %v206_v33 = vadd.f32 1e-08, %v205_v32  ;;  %v518_v46 = vsel %vm517_vm14, %v820_v31, %v514_v41  ;;  %v551_v31 = vunpack.c.2.s8 %v500_v30  ;;  %v560_v24 = vcvt.s32.f32 %v552_v23 }
 0x2b1   :  { %v519_v49 = vmul.f32 %v518_v46, %v1008_v4  ;;  %v249_v4 = vunpack.c.2.s8 %v190_v0 }
 0x2b2   :  { %821 = vrsqrt.f32 %v206_v33  ;;  %vm213_vm15 = vweird.f32 %v206_v33  ;;  %v559_v32 = vcvt.s32.f32 %v551_v31 }
 0x2b3   :  { %v1029_v53 = vmul.f32 %v792_v50, %v519_v49  ;;  %v257_v11 = vcvt.s32.f32 %v249_v4 }
 0x2b5   :  { %v524_v54 = vand.u32 2147483647, %v1029_v53  ;;  %v264_v17 = vpack.c.bf16 %v258_v12, %v257_v11 }
 0x2b7   :  { %v525_v55 = vsel %vm194_vm5, %v524_v54, -inf  ;;  %277 = vmatpush.bf16.msra.mxu1 %v264_v17 }
 0x2b8   :  { %v822_v36 = vpop.eup %821 }
 0x2b9   :  { %v208_v37 = vmul.f32 %v822_v36, %v206_v33  ;;  %vm214_vm12 = vweird.f32 %v822_v36  ;;  %v549_v33 = vunpack.c.0.s8 %v500_v30 }
 0x2ba   :  { %vm215_vm1 = vmor %vm213_vm15, %vm214_vm12  ;;  %vm267_vm12 = vcmask 523264  }
 0x2bb   :  { %v209_v39 = vmul.f32 %v822_v36, %v208_v37 }
 0x2bd   :  { %v210_v40 = vmul.f32 0.5, %v209_v39  ;;  %v557_v39 = vcvt.s32.f32 %v549_v33 }
 0x2bf   :  { %v211_v42 = vsub.f32 1.5, %v210_v40  ;;  %v558_v40 = vcvt.s32.f32 %v550_v34 }
 0x2c1   :  { %v212_v43 = vmul.f32 %v822_v36, %v211_v42 }
 0x2c3   :  { %v216_v45 = vsel %vm215_vm1, %v822_v36, %v212_v43  ;;  %v566_v36 = vpack.c.bf16 %v560_v24, %v559_v32  ;;  %v565_v43 = vpack.c.bf16 %v558_v40, %v557_v39  ;;  %v794_v32 = vld [vmem:[%s1165_s16] ss:$0 sm:$0xff] }
 0x2c4   :  { %v217_v47 = vmul.f32 %v216_v45, %v188_v16  ;;  %v255_v16 = vcvt.s32.f32 %v247_v8 }
 0x2c5   :  { %578 = vmatpush.bf16.msrb.mxu0 %v566_v36 }
 0x2c6   :  { %v1021_v48 = vmul.f32 %v791_v44, %v217_v47  ;;  %v263_v28 = vpack.c.bf16 %v256_v18, %v255_v16 }
 0x2c8   :  { %v222_v51 = vand.u32 2147483647, %v1021_v48  ;;  %278 = vmatpush.bf16.msra.mxu1 %v263_v28 }
 0x2c9   :  { %579 = vmatpush.bf16.msrb.mxu0 %v565_v43 }
 0x2ca   :  { %v223_v52 = vsel %vm194_vm5, %v222_v51, -inf }
 0x2cb   :  { %224 = vmax.xlane.f32.xlu0 %v223_v52 }
 0x2d3   :  { %526 = vmax.xlane.f32.xlu0 %v525_v55 }
 0x33e   :  { %v225_v25 = vpop.xlane.xlu0 %224 }
 0x33f   :  { %v1042_v26 = vmax.f32 %v225_v25, 1e-05 }
 0x341   :  { %823 = vrcp.f32 %v1042_v26  ;;  %v238_v44 = vand.u32 2147483648, %v1042_v26  ;;  %v236_v46 = vand.u32 2147483647, %v1042_v26  ;;  %vm232_vm3 = vweird.f32 %v1042_v26 }
 0x343   :  { %v239_v50 = vor.u32 1.1754944e-38, %v238_v44  ;;  %vm237_vm6 = vcmp.eq.f32.partialorder %v236_v46, 8.507059e+37 }
 0x346   :  { %v527_v35 = vpop.xlane.xlu0 %526 }
 0x347   :  { %v824_v37 = vpop.eup %823  ;;  %v1048_v38 = vmax.f32 %v527_v35, 1e-05 }
 0x348   :  { %v228_v41 = vmul.f32 %v824_v37, %v1042_v26  ;;  %vm233_vm2 = vweird.f32 %v824_v37 }
 0x349   :  { %825 = vrcp.f32 %v1048_v38  ;;  %vm234_vm4 = vmor %vm232_vm3, %vm233_vm2  ;;  %v540_v57 = vand.u32 2147483648, %v1048_v38  ;;  %v538_v59 = vand.u32 2147483647, %v1048_v38  ;;  %vm534_vm8 = vweird.f32 %v1048_v38 }
 0x34a   :  { %v229_v42 = vsub.f32 1.0, %v228_v41  ;;  %v585_v23 = vmul.f32 0.007874016, %v1048_v38 }
 0x34b   :  { %v541_v63 = vor.u32 1.1754944e-38, %v540_v57  ;;  %vm539_vm10 = vcmp.eq.f32.partialorder %v538_v59, 8.507059e+37 }
 0x34c   :  { %v230_v45 = vmul.f32 %v824_v37, %v229_v42 }
 0x34e   :  { %v231_v47 = vadd.f32 %v824_v37, %v230_v45 }
 0x34f   :  { %v826_v49 = vpop.eup %825 }
 0x350   :  { %v530_v51 = vmul.f32 %v826_v49, %v1048_v38  ;;  %v235_v52 = vsel %vm234_vm4, %v824_v37, %v231_v47  ;;  %vm535_vm7 = vweird.f32 %v826_v49 }
 0x351   :  { %v240_v54 = vsel %vm237_vm6, %v239_v50, %v235_v52  ;;  %vm536_vm9 = vmor %vm534_vm8, %vm535_vm7 }
 0x352   :  { %v531_v55 = vsub.f32 1.0, %v530_v51  ;;  %v241_v56 = vmul.f32 127.0, %v240_v54  ;;  %v795_v54 = vld [vmem:[%s1166_s7] ss:$0 sm:$0xff] }
 0x354   :  { %v532_v58 = vmul.f32 %v826_v49, %v531_v55  ;;  %v242_v60 = vmul.f32 %v241_v56, %v1021_v48 }
 0x356   :  { %v533_v61 = vadd.f32 %v826_v49, %v532_v58  ;;  %v745_v62 = vcvt.f32.s32 %v242_v60  ;;  %v743_v2 = vand.u32 2147483647, %v242_v60  ;;  %v748_v5 = vand.u32 2147483648, %v242_v60 }
 0x358   :  { %v746_v0 = vcvt.s32.f32 %v745_v62  ;;  %v537_v1 = vsel %vm536_vm9, %v826_v49, %v533_v61  ;;  %vm744_vm11 = vcmp.lt.f32.partialorder %v743_v2, 8388608.0 }
 0x359   :  { %v542_v3 = vsel %vm539_vm10, %v541_v63, %v537_v1 }
 0x35a   :  { %v747_v4 = vand.u32 2147483647, %v746_v0  ;;  %v543_v6 = vmul.f32 127.0, %v542_v3  ;;  %v796_v0 = vld [vmem:[%s1167_s17] ss:$0 sm:$0xff] }
 0x35c   :  { %v749_v7 = vor.u32 %v748_v5, %v747_v4  ;;  %v544_v8 = vmul.f32 %v543_v6, %v1029_v53  ;;  %v284_v53 = vmul.f32 0.007874016, %v1042_v26 }
 0x35e   :  { %v750_v9 = vsel %vm744_vm11, %v749_v7, %v242_v60  ;;  %v769_v48 = vcvt.f32.s32 %v544_v8  ;;  %v767_v13 = vand.u32 2147483647, %v544_v8  ;;  %v772_v15 = vand.u32 2147483648, %v544_v8 }
 0x35f   :  { %v244_v10 = vmax.f32 %v750_v9, -128.0 }
 0x360   :  { %v770_v11 = vcvt.s32.f32 %v769_v48  ;;  %vm768_vm13 = vcmp.lt.f32.partialorder %v767_v13, 8388608.0 }
 0x361   :  { %v245_v12 = vmin.f32 %v244_v10, 127.0 }
 0x362   :  { %v771_v14 = vand.u32 2147483647, %v770_v11 }
 0x363   :  { %v246_v16 = vpack.c.bf16 %v245_v12, %v245_v12 }
 0x364   :  { %v773_v17 = vor.u32 %v772_v15, %v771_v14 }
 0x365   :  { %729 = vmatmul.msk.bf16.vlgmr.msra.gmra.mxu1 %vm267_vm12, %v246_v16 }
 0x366   :  { %v774_v18 = vsel %vm768_vm13, %v773_v17, %v544_v8 }
 0x367   :  { %v546_v19 = vmax.f32 %v774_v18, -128.0 }
 0x369   :  { %v547_v20 = vmin.f32 %v546_v19, 127.0  ;;  %v797_v19 = vld [vmem:[%s1168_s8] ss:$0 sm:$0xff] }
 0x36b   :  { %v548_v21 = vpack.c.bf16 %v547_v20, %v547_v20 }
 0x36d   :  { %733 = vmatmul.msk.bf16.vlgmr.msrb.gmra.mxu0 %vm267_vm12, %v548_v21 }
 0x3e2   :  { %v280_v25 = vpop.f32.mrf.mxu1 }
 0x3e3   :  { %v285_v28 = vmul.f32 %v284_v53, %v280_v25 }
 0x3e5   :  { %v289_v29 = vmul.f32 %v793_v22, %v285_v28 }
 0x3e7   :  { %v291_v30 = vmul.f32 %v289_v29, %v289_v29 }
 0x3e9   :  { %v292_v31 = vsel %vm194_vm5, %v291_v30, 0.0 }
 0x3ea   :  { %293 = vadd.xlane.f32.xlu1 %v292_v31  ;;  %v282_v24 = vpop.f32.mrf.mxu1  ;;  %v581_v33 = vpop.f32.mrf.mxu0  ;;  %v798_v31 = vld [vmem:[%s1169_s18] ss:$0 sm:$0xff] }
 0x3eb   :  { %v586_v26 = vmul.f32 %v585_v23, %v581_v33 }
 0x3ed   :  { %v590_v34 = vmul.f32 %v794_v32, %v586_v26 }
 0x3ef   :  { %v592_v35 = vmul.f32 %v590_v34, %v590_v34 }
 0x3f1   :  { %v593_v36 = vsel %vm194_vm5, %v592_v35, 0.0 }
 0x3f2   :  { %594 = vadd.xlane.f32.xlu0 %v593_v36  ;;  %v583_v37 = vpop.f32.mrf.mxu0 }
 0x45d   :  { %v294_v39 = vpop.xlane.xlu1 %293 }
 0x45e   :  { %v295_v40 = vmul.f32 %v294_v39, %v1014_v27 }
 0x460   :  { %v296_v41 = vadd.f32 1e-06, %v295_v40 }
 0x462   :  { %827 = vrsqrt.f32 %v296_v41  ;;  %vm303_vm15 = vweird.f32 %v296_v41 }
 0x465   :  { %v595_v38 = vpop.xlane.xlu0 %594 }
 0x466   :  { %v596_v42 = vmul.f32 %v595_v38, %v1014_v27 }
 0x468   :  { %v828_v43 = vpop.eup %827  ;;  %v597_v44 = vadd.f32 1e-06, %v596_v42  ;;  %v313_v42 = vld [vmem:[%s1171_s9] sm:$0xff] }
 0x469   :  { %v298_v45 = vmul.f32 %v828_v43, %v296_v41  ;;  %vm304_vm14 = vweird.f32 %v828_v43 }
 0x46a   :  { %829 = vrsqrt.f32 %v597_v44  ;;  %vm305_vm1 = vmor %vm303_vm15, %vm304_vm14  ;;  %vm604_vm3 = vweird.f32 %v597_v44 }
 0x46b   :  { %v299_v46 = vmul.f32 %v828_v43, %v298_v45 }
 0x46d   :  { %v300_v47 = vmul.f32 0.5, %v299_v46  ;;  %v364_v46 = vunpack.c.2.s8 %v313_v42 }
 0x46f   :  { %v301_v49 = vsub.f32 1.5, %v300_v47  ;;  %v365_v47 = vunpack.c.3.s8 %v313_v42 }
 0x470   :  { %v830_v50 = vpop.eup %829 }
 0x471   :  { %v302_v51 = vmul.f32 %v828_v43, %v301_v49  ;;  %v599_v52 = vmul.f32 %v830_v50, %v597_v44  ;;  %vm605_vm2 = vweird.f32 %v830_v50 }
 0x472   :  { %vm606_vm4 = vmor %vm604_vm3, %vm605_vm2 }
 0x473   :  { %v600_v55 = vmul.f32 %v830_v50, %v599_v52  ;;  %v306_v56 = vsel %vm305_vm1, %v828_v43, %v302_v51  ;;  %v615_v43 = vld [vmem:[%s1172_s19 + $0x8] sm:$0xff]  ;;  %v362_v51 = vunpack.c.0.s8 %v313_v42  ;;  %v363_v52 = vunpack.c.1.s8 %v313_v42 }
 0x474   :  { %v307_v57 = vmul.f32 %v306_v56, %v289_v29  ;;  %v669_v49 = vunpack.c.2.s8 %v615_v43  ;;  %v373_v56 = vcvt.s32.f32 %v365_v47 }
 0x475   :  { %v601_v58 = vmul.f32 0.5, %v600_v55  ;;  %v372_v55 = vcvt.s32.f32 %v364_v46 }
 0x476   :  { %v311_v59 = vmul.f32 %v795_v54, %v307_v57  ;;  %v667_v57 = vunpack.c.0.s8 %v615_v43 }
 0x477   :  { %v602_v60 = vsub.f32 1.5, %v601_v58  ;;  %v677_v58 = vcvt.s32.f32 %v669_v49 }
 0x478   :  { %v316_v61 = vmul.f32 %v311_v59, %v311_v59 }
 0x479   :  { %v603_v62 = vmul.f32 %v830_v50, %v602_v60  ;;  %v370_v60 = vcvt.s32.f32 %v362_v51 }
 0x47a   :  { %v317_v63 = vsel %vm194_vm5, %v316_v61, 0.0  ;;  %v379_v61 = vpack.c.bf16 %v373_v56, %v372_v55 }
 0x47b   :  { %318 = vadd.xlane.f32.xlu0 %v317_v63  ;;  %v607_v1 = vsel %vm606_vm4, %v830_v50, %v603_v62  ;;  %v670_v50 = vunpack.c.3.s8 %v615_v43  ;;  %v371_v62 = vcvt.s32.f32 %v363_v52  ;;  %v668_v63 = vunpack.c.1.s8 %v615_v43 }
 0x47c   :  { %v608_v2 = vmul.f32 %v607_v1, %v590_v34  ;;  %v314_v34 = vld [vmem:[%s1171_s9 + $0x8] sm:$0xff] }
 0x47d   :  { %v368_v35 = vunpack.c.2.s8 %v314_v34  ;;  %v369_v36 = vunpack.c.3.s8 %v314_v34  ;;  %v366_v41 = vunpack.c.0.s8 %v314_v34  ;;  %v367_v38 = vunpack.c.1.s8 %v314_v34 }
 0x47e   :  { %v612_v3 = vmul.f32 %v796_v0, %v608_v2  ;;  %v675_v0 = vcvt.s32.f32 %v667_v57  ;;  %v676_v2 = vcvt.s32.f32 %v668_v63 }
 0x47f   :  { %v376_v37 = vcvt.s32.f32 %v368_v35  ;;  %v377_v39 = vcvt.s32.f32 %v369_v36  ;;  %v374_v44 = vcvt.s32.f32 %v366_v41  ;;  %v375_v45 = vcvt.s32.f32 %v367_v38 }
 0x480   :  { %v617_v4 = vmul.f32 %v612_v3, %v612_v3 }
 0x481   :  { %v381_v40 = vpack.c.bf16 %v377_v39, %v376_v37  ;;  %v380_v54 = vpack.c.bf16 %v375_v45, %v374_v44 }
 0x482   :  { %v618_v5 = vsel %vm194_vm5, %v617_v4, 0.0 }
 0x483   :  { %619 = vadd.xlane.f32.xlu2 %v618_v5  ;;  %389 = vmatpush.bf16.msra.mxu2 %v381_v40  ;;  %v378_v5 = vpack.c.bf16 %v371_v62, %v370_v60 }
 0x487   :  { %390 = vmatpush.bf16.msra.mxu2 %v380_v54 }
 0x48b   :  { %391 = vmatpush.bf16.msra.mxu2 %v379_v61 }
 0x48f   :  { %392 = vmatpush.bf16.msra.mxu2 %v378_v5 }
 0x4ee   :  { %v319_v6 = vpop.xlane.xlu0 %318 }
 0x4ef   :  { %v320_v7 = vmul.f32 %v319_v6, %v1014_v27  ;;  %v681_v6 = vpack.c.bf16 %v676_v2, %v675_v0 }
 0x4f1   :  { %v321_v8 = vadd.f32 1e-08, %v320_v7  ;;  %v614_v7 = vld [vmem:[%s1172_s19] sm:$0xff] }
 0x4f3   :  { %831 = vrsqrt.f32 %v321_v8  ;;  %vm328_vm7 = vweird.f32 %v321_v8 }
 0x4f6   :  { %v620_v9 = vpop.xlane.xlu2 %619 }
 0x4f7   :  { %v621_v48 = vmul.f32 %v620_v9, %v1014_v27  ;;  %v666_v9 = vunpack.c.3.s8 %v614_v7 }
 0x4f9   :  { %v832_v10 = vpop.eup %831  ;;  %v622_v11 = vadd.f32 1e-08, %v621_v48 }
 0x4fa   :  { %v323_v12 = vmul.f32 %v832_v10, %v321_v8  ;;  %vm329_vm6 = vweird.f32 %v832_v10  ;;  %v665_v8 = vunpack.c.2.s8 %v614_v7 }
 0x4fb   :  { %833 = vrsqrt.f32 %v622_v11  ;;  %vm330_vm8 = vmor %vm328_vm7, %vm329_vm6  ;;  %vm629_vm10 = vweird.f32 %v622_v11 }
 0x4fc   :  { %v324_v13 = vmul.f32 %v832_v10, %v323_v12  ;;  %v673_v48 = vcvt.s32.f32 %v665_v8  ;;  %v664_v12 = vunpack.c.1.s8 %v614_v7 }
 0x4fe   :  { %v325_v14 = vmul.f32 0.5, %v324_v13 }
 0x500   :  { %v326_v15 = vsub.f32 1.5, %v325_v14 }
 0x501   :  { %v834_v16 = vpop.eup %833 }
 0x502   :  { %v327_v17 = vmul.f32 %v832_v10, %v326_v15  ;;  %v624_v18 = vmul.f32 %v834_v16, %v622_v11  ;;  %vm630_vm9 = vweird.f32 %v834_v16  ;;  %v663_v11 = vunpack.c.0.s8 %v614_v7 }
 0x503   :  { %vm631_vm11 = vmor %vm629_vm10, %vm630_vm9 }
 0x504   :  { %v625_v20 = vmul.f32 %v834_v16, %v624_v18  ;;  %v331_v21 = vsel %vm330_vm8, %v832_v10, %v327_v17  ;;  %v674_v10 = vcvt.s32.f32 %v666_v9  ;;  %v671_v17 = vcvt.s32.f32 %v663_v11 }
 0x505   :  { %v332_v27 = vmul.f32 %v331_v21, %v311_v59  ;;  %v678_v59 = vcvt.s32.f32 %v670_v50  ;;  %v672_v18 = vcvt.s32.f32 %v664_v12 }
 0x506   :  { %v626_v53 = vmul.f32 0.5, %v625_v20  ;;  %v680_v14 = vpack.c.bf16 %v674_v10, %v673_v48 }
 0x507   :  { %v1088_v22 = vmul.f32 %v797_v19, %v332_v27  ;;  %v682_v1 = vpack.c.bf16 %v678_v59, %v677_v58  ;;  %v679_v21 = vpack.c.bf16 %v672_v18, %v671_v17 }
 0x508   :  { %v627_v25 = vsub.f32 1.5, %v626_v53 }
 0x509   :  { %v337_v28 = vand.u32 2147483647, %v1088_v22  ;;  %690 = vmatpush.bf16.msrb.mxu3 %v682_v1  ;;  %v799_v1 = vld [vmem:[%s1170_s10] ss:$0 sm:$0xff] }
 0x50a   :  { %v628_v29 = vmul.f32 %v834_v16, %v627_v25 }
 0x50b   :  { %v338_v30 = vsel %vm194_vm5, %v337_v28, -inf }
 0x50c   :  { %339 = vmax.xlane.f32.xlu0 %v338_v30  ;;  %v632_v23 = vsel %vm631_vm11, %v834_v16, %v628_v29 }
 0x50d   :  { %v633_v32 = vmul.f32 %v632_v23, %v612_v3  ;;  %691 = vmatpush.bf16.msrb.mxu3 %v681_v6 }
 0x50f   :  { %v1095_v24 = vmul.f32 %v798_v31, %v633_v32 }
 0x511   :  { %v638_v33 = vand.u32 2147483647, %v1095_v24  ;;  %692 = vmatpush.bf16.msrb.mxu3 %v680_v14 }
 0x513   :  { %v639_v26 = vsel %vm194_vm5, %v638_v33, -inf }
 0x514   :  { %640 = vmax.xlane.f32.xlu2 %v639_v26 }
 0x515   :  { %693 = vmatpush.bf16.msrb.mxu3 %v679_v21 }
 0x57f   :  { %v340_v3 = vpop.xlane.xlu0 %339 }
 0x580   :  { %v1108_v4 = vmax.f32 %v340_v3, 1e-05 }
 0x582   :  { %835 = vrcp.f32 %v1108_v4  ;;  %v353_v27 = vand.u32 2147483648, %v1108_v4  ;;  %v351_v25 = vand.u32 2147483647, %v1108_v4  ;;  %vm347_vm13 = vweird.f32 %v1108_v4 }
 0x584   :  { %v354_v30 = vor.u32 1.1754944e-38, %v353_v27  ;;  %vm352_vm15 = vcmp.eq.f32.partialorder %v351_v25, 8.507059e+37 }
 0x587   :  { %v641_v13 = vpop.xlane.xlu2 %640 }
 0x588   :  { %v836_v15 = vpop.eup %835  ;;  %v1114_v16 = vmax.f32 %v641_v13, 1e-05 }
 0x589   :  { %v343_v19 = vmul.f32 %v836_v15, %v1108_v4  ;;  %vm348_vm5 = vweird.f32 %v836_v15 }
 0x58a   :  { %837 = vrcp.f32 %v1114_v16  ;;  %vm349_vm14 = vmor %vm347_vm13, %vm348_vm5  ;;  %v654_v34 = vand.u32 2147483648, %v1114_v16  ;;  %v652_v36 = vand.u32 2147483647, %v1114_v16  ;;  %vm648_vm2 = vweird.f32 %v1114_v16 }
 0x58b   :  { %v344_v20 = vsub.f32 1.0, %v343_v19  ;;  %v699_v6 = vmul.f32 0.007874016, %v1114_v16 }
 0x58c   :  { %v655_v41 = vor.u32 1.1754944e-38, %v654_v34  ;;  %vm653_vm4 = vcmp.eq.f32.partialorder %v652_v36, 8.507059e+37 }
 0x58d   :  { %v345_v53 = vmul.f32 %v836_v15, %v344_v20 }
 0x58f   :  { %v346_v28 = vadd.f32 %v836_v15, %v345_v53 }
 0x590   :  { %v838_v29 = vpop.eup %837 }
 0x591   :  { %v644_v31 = vmul.f32 %v838_v29, %v1114_v16  ;;  %v350_v23 = vsel %vm349_vm14, %v836_v15, %v346_v28  ;;  %vm649_vm1 = vweird.f32 %v838_v29 }
 0x592   :  { %v355_v32 = vsel %vm352_vm15, %v354_v30, %v350_v23  ;;  %vm650_vm3 = vmor %vm648_vm2, %vm649_vm1 }
 0x593   :  { %v645_v33 = vsub.f32 1.0, %v644_v31  ;;  %v356_v26 = vmul.f32 127.0, %v355_v32 }
 0x595   :  { %v646_v35 = vmul.f32 %v838_v29, %v645_v33  ;;  %v357_v37 = vmul.f32 %v356_v26, %v1088_v22 }
 0x597   :  { %v647_v39 = vadd.f32 %v838_v29, %v646_v35  ;;  %v753_v40 = vcvt.f32.s32 %v357_v37  ;;  %v751_v43 = vand.u32 2147483647, %v357_v37  ;;  %v756_v46 = vand.u32 2147483648, %v357_v37 }
 0x599   :  { %v754_v38 = vcvt.s32.f32 %v753_v40  ;;  %v651_v42 = vsel %vm650_vm3, %v838_v29, %v647_v39  ;;  %vm752_vm6 = vcmp.lt.f32.partialorder %v751_v43, 8388608.0 }
 0x59a   :  { %v656_v44 = vsel %vm653_vm4, %v655_v41, %v651_v42 }
 0x59b   :  { %v755_v45 = vand.u32 2147483647, %v754_v38  ;;  %v657_v47 = vmul.f32 127.0, %v656_v44 }
 0x59d   :  { %v757_v49 = vor.u32 %v756_v46, %v755_v45  ;;  %v658_v50 = vmul.f32 %v657_v47, %v1095_v24  ;;  %v398_v24 = vmul.f32 0.007874016, %v1108_v4  ;;  %v800_v4 = vld [vmem:[%s1173_s20] ss:$0 sm:$0xff] }
 0x59f   :  { %v758_v51 = vsel %vm752_vm6, %v757_v49, %v357_v37  ;;  %v777_v22 = vcvt.f32.s32 %v658_v50  ;;  %v775_v56 = vand.u32 2147483647, %v658_v50  ;;  %v780_v58 = vand.u32 2147483648, %v658_v50 }
 0x5a0   :  { %v359_v52 = vmax.f32 %v758_v51, -128.0 }
 0x5a1   :  { %v778_v54 = vcvt.s32.f32 %v777_v22  ;;  %vm776_vm7 = vcmp.lt.f32.partialorder %v775_v56, 8388608.0 }
 0x5a2   :  { %v360_v55 = vmin.f32 %v359_v52, 127.0 }
 0x5a3   :  { %v779_v57 = vand.u32 2147483647, %v778_v54 }
 0x5a4   :  { %v361_v59 = vpack.c.bf16 %v360_v55, %v360_v55 }
 0x5a5   :  { %v781_v60 = vor.u32 %v780_v58, %v779_v57 }
 0x5a6   :  { %730 = vmatmul.msk.bf16.vlgmr.msra.gmra.mxu2 %vm267_vm12, %v361_v59 }
 0x5a7   :  { %v782_v61 = vsel %vm776_vm7, %v781_v60, %v658_v50 }
 0x5a8   :  { %v660_v62 = vmax.f32 %v782_v61, -128.0 }
 0x5aa   :  { %v661_v63 = vmin.f32 %v660_v62, 127.0 }
 0x5ac   :  { %v662_v0 = vpack.c.bf16 %v661_v63, %v661_v63 }
 0x5ae   :  { %734 = vmatmul.msk.bf16.vlgmr.msrb.gmra.mxu3 %vm267_vm12, %v662_v0 }
 0x629   :  { %v394_v2 = vpop.f32.mrf.mxu2 }
 0x62a   :  { %v399_v3 = vmul.f32 %v398_v24, %v394_v2 }
 0x62c   :  { %v403_v5 = vmul.f32 %v799_v1, %v399_v3 }
 0x62e   :  { %404 = vst.msk [vmem:[%s1174_s21] sm:$0x3] %vm78_vm0, %v403_v5  ;;  %406 = vrot.lane.b32.xlu0 %v403_v5, %s842_s13 }
 0x631   :  { %v396_v7 = vpop.f32.mrf.mxu2  ;;  %v695_v8 = vpop.f32.mrf.mxu3 }
 0x632   :  { %v700_v9 = vmul.f32 %v699_v6, %v695_v8 }
 0x634   :  { %v704_v48 = vmul.f32 %v800_v4, %v700_v9 }
 0x636   :  { %705 = vst.msk [vmem:[%s1175_s23] sm:$0x3] %vm78_vm0, %v704_v48  ;;  %707 = vrot.lane.b32.xlu2 %v704_v48, %s842_s13 }
 0x639   :  { %v697_v10 = vpop.f32.mrf.mxu3 }
 0x690   :  { %v708_v11 = vpop.permute.xlu2 %707 }
 0x691   :  { %710 = vst.msk [vmem:[%s1176_s24] sm:$0x3] %vm78_vm0, %v708_v11 }
 0x6a0   :  { %v407_v12 = vpop.permute.xlu0 %406 }
 0x6a1   :  { %409 = vst.msk [vmem:[%s1177_s22] sm:$0x3] %vm78_vm0, %v407_v12 }

</bundles_post_ra>
